<compile_context>
chip_gen: v7x
topology: tpu7x:2x2x1
jax: 0.10.0
libtpu: 0.0.40
codegen_flags: <defaults>
</compile_context>

<pallas_src>
import functools

import jax
import jax.numpy as jnp
from jax.experimental import pallas as pl
from jax.experimental.pallas import tpu as pltpu

BN_EPS = 1e-5


def _vmem_limit_bytes():
    """Generation-aware scoped-VMEM limit: ~3/4 of physical VMEM, clamped."""
    cap = 64 * 1024 * 1024  # conservative default (v7x physical per-TC VMEM)
    try:
        cap = int(pltpu.get_tpu_info().vmem_capacity_bytes)
    except Exception:
        pass
    return max(32 * 1024 * 1024, min((cap * 3) // 4, 112 * 1024 * 1024))


def _pick_tile(n, vmem_budget):
    """Largest power-of-two node tile (<=1024) dividing n that fits the budget."""
    for t in (1024, 512, 256, 128):
        # int8 adj double-buffer (2*t*t) + in-kernel f32/bf16 widen intermediates
        # (~6*t*t) must stay well inside the scoped-VMEM budget.
        if t <= n and n % t == 0 and 8 * t * t <= vmem_budget // 2:
            return t
    # TODO(synk): pad N to a multiple of 128 (masking padded rows out of the BN
    # statistics and pooling matrix) instead of falling back to a full-extent tile.
    return n


# ---------------------------------------------------------------------------
# Kernel 1: one GIN layer's pre-BN output, tiled over (node-rows, node-cols).
#   h  = x + A @ x                      (raw previous activations; BN folded away)
#   z  = relu( relu(h W1' + b1 + (1+deg)(b W1)) W2 + b2 )
# plus fused per-row-tile BatchNorm partial sums (sum, sum of squares).
# ---------------------------------------------------------------------------

def _make_gin_layer_kernel(tm, tk):
    def kernel(adj_ref, x_ref, deg_ref, w1e_ref, b1_ref, bw1_ref, w2_ref, b2_ref,
               zpre_ref, stats_ref, acc_ref):
        i = pl.program_id(0)
        k = pl.program_id(1)

        @pl.when(k == 0)
        def _():
            acc_ref[...] = jnp.zeros_like(acc_ref)

        # Neighbor sum A @ X on the MXU with bf16 inputs / f32 accumulation.
        # Adjacency arrives as int8 (exact counts <= 127) and is widened on the
        # VPU; X is resident in VMEM and its column slice is cast per step.
        col0 = pl.multiple_of(k * tk, tk)
        adj_bf = adj_ref[...].astype(jnp.float32).astype(jnp.bfloat16)
        xk = x_ref[pl.ds(col0, tk), :].astype(jnp.bfloat16)
        acc_ref[...] += jnp.dot(adj_bf, xk, preferred_element_type=jnp.float32)

        @pl.when(k == pl.num_programs(1) - 1)
        def _():
            row0 = pl.multiple_of(i * tm, tm)
            # GIN with eps = 0 on RAW activations; the previous layer's BatchNorm
            # is folded into W1' = diag(a) W1 and the (1 + deg)*(b W1) row shift.
            h = x_ref[pl.ds(row0, tm), :] + acc_ref[...]
            h1 = (jnp.dot(h, w1e_ref[...], preferred_element_type=jnp.float32)
                  + b1_ref[...] + (1.0 + deg_ref[...]) * bw1_ref[...])
            h1 = jnp.maximum(h1, 0.0)
            h2 = jnp.dot(h1, w2_ref[...], preferred_element_type=jnp.float32) + b2_ref[...]
            zp = jnp.maximum(h2, 0.0)                 # F.relu after the conv
            zpre_ref[...] = zp
            # Fused BN partials (sum, sum of squares) so the wrapper never has to
            # re-read z_pre from HBM for the statistics.
            s = jnp.sum(zp, axis=0, keepdims=True)
            ss = jnp.sum(zp * zp, axis=0, keepdims=True)
            stats_ref[...] = jnp.concatenate([s, ss], axis=0)

    return kernel


def gin_layer_pre(adj_i8, x, deg, w1e, b1, bw1, w2, b2, *, tm, tk, vmem_limit):
    n, fin = x.shape
    h = w1e.shape[1]
    grid = (n // tm, n // tk)
    # TODO(synk): for large sparse graphs, feed a compacted list of non-empty
    # (i, k) blocks through scalar prefetch so the grid skips all-zero tiles.
    return pl.pallas_call(
        _make_gin_layer_kernel(tm, tk),
        out_shape=(jax.ShapeDtypeStruct((n, h), jnp.float32),
                   jax.ShapeDtypeStruct((n // tm, 2, h), jnp.float32)),
        grid_spec=pltpu.PrefetchScalarGridSpec(
            num_scalar_prefetch=0,
            grid=grid,
            in_specs=[
                pl.BlockSpec((tm, tk), lambda i, k: (i, k)),      # adjacency (int8)
                pl.BlockSpec((n, fin), lambda i, k: (0, 0)),      # X resident in VMEM
                pl.BlockSpec((tm, 1), lambda i, k: (i, 0)),       # in-degree column
                pl.BlockSpec((fin, h), lambda i, k: (0, 0)),      # W1' = diag(a) W1
                pl.BlockSpec((1, h), lambda i, k: (0, 0)),        # b1
                pl.BlockSpec((1, h), lambda i, k: (0, 0)),        # b @ W1
                pl.BlockSpec((h, h), lambda i, k: (0, 0)),        # W2
                pl.BlockSpec((1, h), lambda i, k: (0, 0)),        # b2
            ],
            out_specs=(
                pl.BlockSpec((tm, h), lambda i, k: (i, 0)),        # z_pre rows
                pl.BlockSpec((None, 2, h), lambda i, k: (i, 0, 0)),  # BN partials
            ),
            scratch_shapes=[pltpu.VMEM((tm, fin), jnp.float32)],
        ),
        compiler_params=pltpu.CompilerParams(
            dimension_semantics=("parallel", "arbitrary"),
            vmem_limit_bytes=vmem_limit,
        ),
    )(adj_i8, x, deg, w1e, b1, bw1, w2, b2)


# ---------------------------------------------------------------------------
# Kernel 2: fused BN-apply (all layers) + lane-dense [N, H*L] concat slab +
# per-row-tile partial global_add_pool (bf16 MXU dot).  The grid axis is fully
# parallel; the tiny [G, H*L] reduction + graph-BN + fc run on the partials in
# JAX afterwards.
# ---------------------------------------------------------------------------

def _make_concat_pool_kernel(n_layers, hidden):
    def kernel(*refs):
        z_refs = refs[:n_layers]
        pool_ref, a_ref, b_ref = refs[n_layers:n_layers + 3]
        zcat_ref, pp_ref = refs[n_layers + 3:]

        a = a_ref[...]
        b = b_ref[...]
        tiles = []
        for l in range(n_layers):
            sl = slice(l * hidden, (l + 1) * hidden)
            tiles.append(z_refs[l][...] * a[:, sl] + b[:, sl])
        zcat = jnp.concatenate(tiles, axis=1)
        zcat_ref[...] = zcat                                   # lane-dense slab store
        pp_ref[...] = jnp.dot(pool_ref[...], zcat.astype(jnp.bfloat16),
                              preferred_element_type=jnp.float32)

    return kernel


def concat_pool(z_pres, pool_mat, a_cat, b_cat, *, tm, vmem_limit):
    n_layers = len(z_pres)
    n, hidden = z_pres[0].shape
    gpad = pool_mat.shape[0]
    proj = hidden * n_layers
    grid = (n // tm,)

    in_specs = (
        [pl.BlockSpec((tm, hidden), lambda i: (i, 0))] * n_layers
        + [
            pl.BlockSpec((gpad, tm), lambda i: (0, i)),   # pooling one-hot (bf16)
            pl.BlockSpec((1, proj), lambda i: (0, 0)),    # folded-BN scale (concat)
            pl.BlockSpec((1, proj), lambda i: (0, 0)),    # folded-BN shift (concat)
        ]
    )
    out_specs = (
        pl.BlockSpec((tm, proj), lambda i: (i, 0)),            # [N, H*L] slab
        pl.BlockSpec((None, gpad, proj), lambda i: (i, 0, 0)),  # partial pools
    )
    return pl.pallas_call(
        _make_concat_pool_kernel(n_layers, hidden),
        out_shape=(jax.ShapeDtypeStruct((n, proj), jnp.float32),
                   jax.ShapeDtypeStruct((n // tm, gpad, proj), jnp.float32)),
        grid_spec=pltpu.PrefetchScalarGridSpec(
            num_scalar_prefetch=0,
            grid=grid,
            in_specs=in_specs,
            out_specs=out_specs,
        ),
        compiler_params=pltpu.CompilerParams(
            dimension_semantics=("parallel",),
            vmem_limit_bytes=vmem_limit,
        ),
    )(*z_pres, pool_mat, a_cat, b_cat)


# ---------------------------------------------------------------------------
# Parameter construction (deterministic, PyTorch-Linear-style init)
# ---------------------------------------------------------------------------

def _linear_params(key, fan_in, fan_out):
    kw, kb = jax.random.split(key)
    bound = 1.0 / (fan_in ** 0.5)
    w = jax.random.uniform(kw, (fan_in, fan_out), jnp.float32, -bound, bound)
    b = jax.random.uniform(kb, (1, fan_out), jnp.float32, -bound, bound)
    return w, b


def init_gcn_params(key, input_dim, hidden_dim, latent_dim, n_layers):
    params = {"layers": []}
    for i in range(n_layers):
        key, k1, k2 = jax.random.split(key, 3)
        din = input_dim if i == 0 else hidden_dim
        w1, b1 = _linear_params(k1, din, hidden_dim)
        w2, b2 = _linear_params(k2, hidden_dim, hidden_dim)
        params["layers"].append(dict(
            w1=w1, b1=b1, w2=w2, b2=b2,
            bn_gamma=jnp.ones((1, hidden_dim), jnp.float32),
            bn_beta=jnp.zeros((1, hidden_dim), jnp.float32),
        ))
    proj_dim = hidden_dim * n_layers
    key, kfc = jax.random.split(key)
    wfc, bfc = _linear_params(kfc, proj_dim, latent_dim)
    params["bn_gamma"] = jnp.ones((1, proj_dim), jnp.float32)
    params["bn_beta"] = jnp.zeros((1, proj_dim), jnp.float32)
    params["wfc"] = wfc
    params["bfc"] = bfc
    # TODO(synk): self.project (2-layer MLP) and dropout are instantiated in
    # __init__ but never used in forward(), so they are intentionally not built.
    return params


# ---------------------------------------------------------------------------
# Full forward (tiny glue in JAX, all heavy compute in the Pallas kernels)
# ---------------------------------------------------------------------------

@functools.partial(jax.jit, static_argnames=("num_nodes", "num_graphs", "node_tile"))
def gcn_forward(params, x, edge_index, batch, *, num_nodes, num_graphs,
                node_tile=None):
    n = num_nodes
    vmem_limit = _vmem_limit_bytes()
    tm = node_tile if node_tile is not None else _pick_tile(n, vmem_limit)
    tk = tm

    src, dst = edge_index[0], edge_index[1]
    # Dense adjacency A[dst, src] streamed as int8 (exact for edge multiplicities
    # <= 127, trivially true for simple graphs): halves the dominant N^2 HBM
    # stream vs bf16; widened to bf16 on the VPU inside the kernel.
    adj = (jnp.zeros((n, n), jnp.int32).at[dst, src].add(1)).astype(jnp.int8)
    # In-degree (with multiplicity) = A @ 1; carries the folded-BN shift term.
    deg = jnp.zeros((n, 1), jnp.float32).at[dst, 0].add(1.0)

    # Dense pooling one-hot P[g, n] (rows padded to a multiple of 8), exact in bf16.
    gpad = ((num_graphs + 7) // 8) * 8
    pool_mat = (batch[None, :] == jnp.arange(gpad)[:, None]).astype(jnp.bfloat16)

    z_pres, a_list, b_list = [], [], []
    x_raw = x
    # Identity affine before the first layer (no preceding BatchNorm).
    a = jnp.ones((1, x.shape[1]), jnp.float32)
    b = jnp.zeros((1, x.shape[1]), jnp.float32)

    for lp in params["layers"]:
        # Fold the previous layer's BatchNorm y = x*a + b into the first Linear:
        #   (y + A y) W1 + b1 = (x + A x)(diag(a) W1) + (1 + deg)(b W1) + b1
        w1e = lp["w1"] * a.reshape(-1, 1)
        bw1 = b @ lp["w1"]
        z_pre, stats = gin_layer_pre(adj, x_raw, deg, w1e, lp["b1"], bw1,
                                     lp["w2"], lp["b2"], tm=tm, tk=tk,
                                     vmem_limit=vmem_limit)
        # Training-mode BatchNorm statistics from the fused per-tile partials
        # (biased variance, one-pass E[z^2] - m^2) -> exact per-feature affine.
        s = jnp.sum(stats[:, 0, :], axis=0, keepdims=True)
        ss = jnp.sum(stats[:, 1, :], axis=0, keepdims=True)
        m = s / n
        var = jnp.maximum(ss / n - m * m, 0.0)
        inv = jax.lax.rsqrt(var + BN_EPS)
        a = lp["bn_gamma"] * inv
        b = lp["bn_beta"] - m * a

        z_pres.append(z_pre)
        a_list.append(a)
        b_list.append(b)
        x_raw = z_pre

    a_cat = jnp.concatenate(a_list, axis=1)
    b_cat = jnp.concatenate(b_list, axis=1)

    z_cat, pool_part = concat_pool(z_pres, pool_mat, a_cat, b_cat,
                                   tm=tm, vmem_limit=vmem_limit)

    # Tiny graph-level head in JAX ([G, H*L] -> [G, latent]); keeping it out of
    # the node-tiled kernel lets that kernel's grid axis stay fully parallel.
    g_sum = jnp.sum(pool_part, axis=0)[:num_graphs]
    gm = jnp.mean(g_sum, axis=0, keepdims=True)
    gv = jnp.mean((g_sum - gm) ** 2, axis=0, keepdims=True)
    gn = (g_sum - gm) * jax.lax.rsqrt(gv + BN_EPS) * params["bn_gamma"] + params["bn_beta"]
    g = gn @ params["wfc"] + params["bfc"]
    return z_cat, g


# ---------------------------------------------------------------------------
# Pure-JAX reference (sanity check of the fused/tiled kernels)
# ---------------------------------------------------------------------------

def gcn_forward_reference(params, x, edge_index, batch, num_nodes, num_graphs):
    src, dst = edge_index[0], edge_index[1]
    adj = jnp.zeros((num_nodes, num_nodes), jnp.float32).at[dst, src].add(1.0)
    pool = (batch[None, :] == jnp.arange(num_graphs)[:, None]).astype(jnp.float32)
    z = x
    zs = []
    for lp in params["layers"]:
        h = z + adj @ z
        h1 = jnp.maximum(h @ lp["w1"] + lp["b1"], 0.0)
        h2 = h1 @ lp["w2"] + lp["b2"]
        zr = jnp.maximum(h2, 0.0)
        m = zr.mean(0, keepdims=True)
        v = ((zr - m) ** 2).mean(0, keepdims=True)
        z = (zr - m) / jnp.sqrt(v + BN_EPS) * lp["bn_gamma"] + lp["bn_beta"]
        zs.append(z)
    z_cat = jnp.concatenate(zs, axis=1)
    gsum = pool @ z_cat
    m = gsum.mean(0, keepdims=True)
    v = ((gsum - m) ** 2).mean(0, keepdims=True)
    gn = (gsum - m) / jnp.sqrt(v + BN_EPS) * params["bn_gamma"] + params["bn_beta"]
    g = gn @ params["wfc"] + params["bfc"]
    return z_cat, g


# ---------------------------------------------------------------------------
# Demo
# ---------------------------------------------------------------------------

if __name__ == "__main__":
    INPUT_DIM, HIDDEN_DIM, LATENT_DIM, N_LAYERS = 16, 32, 8, 2
    NUM_NODES, NUM_GRAPHS, NUM_EDGES = 256, 4, 1024

    key = jax.random.PRNGKey(0)
    kx, ke, kp = jax.random.split(key, 3)

    x = jax.random.normal(kx, (NUM_NODES, INPUT_DIM), jnp.float32)
    edge_index = jax.random.randint(ke, (2, NUM_EDGES), 0, NUM_NODES, jnp.int32)
    # 4 graphs of contiguous nodes.
    batch = jnp.repeat(jnp.arange(NUM_GRAPHS, dtype=jnp.int32),
                       NUM_NODES // NUM_GRAPHS)

    params = init_gcn_params(kp, INPUT_DIM, HIDDEN_DIM, LATENT_DIM, N_LAYERS)

    # node_tile=128 -> (2, 2) grid for the layer kernel and (2,) for the fused
    # concat/pool kernel, exercising accumulator init/finalize and the pipeline.
    z_out, g_out = gcn_forward(params, x, edge_index, batch,
                               num_nodes=NUM_NODES, num_graphs=NUM_GRAPHS,
                               node_tile=128)
    jax.block_until_ready((z_out, g_out))

    assert z_out.shape == (NUM_NODES, HIDDEN_DIM * N_LAYERS)
    assert g_out.shape == (NUM_GRAPHS, LATENT_DIM)

    z_ref, g_ref = gcn_forward_reference(params, x, edge_index, batch,
                                         NUM_NODES, NUM_GRAPHS)
    # bf16 MXU inputs on the neighbor-sum dot introduce small (amplified-by-BN)
    # rounding differences vs the all-f32 reference; 2e-1 still catches real bugs.
    assert float(jnp.max(jnp.abs(z_out - z_ref))) < 2e-1
    assert float(jnp.max(jnp.abs(g_out - g_ref))) < 2e-1

    print("KERNEL_OK")
</pallas_src>

<mosaic_0001>
module attributes {stable_mosaic.version = 11 : i64} {
  func.func private @main(%arg0: i32) attributes {dimension_semantics = [#tpu.dimension_semantics<core_parallel>], iteration_bounds = array<i64: 2>, tpu.core_type = #tpu.core_type<sc_scalar_subcore>, window_params = []} {
    return
  }
}

module attributes {stable_mosaic.version = 11 : i64} {
  func.func private @main(%arg0: i32) attributes {dimension_semantics = [#tpu.dimension_semantics<core_parallel>], iteration_bounds = array<i64: 2>, tpu.core_type = #tpu.core_type<sc_scalar_subcore>, window_params = []} {
    return
  }
}

module attributes {stable_mosaic.version = 11 : i64} {
  func.func @kernel(%arg0: i32, %arg1: i32, %arg2: memref<128x128xi8, #tpu.memory_space<vmem>>, %arg3: memref<256x16xf32, #tpu.memory_space<vmem>>, %arg4: memref<128x1xf32, #tpu.memory_space<vmem>>, %arg5: memref<16x32xf32, #tpu.memory_space<vmem>>, %arg6: memref<1x32xf32, #tpu.memory_space<vmem>>, %arg7: memref<1x32xf32, #tpu.memory_space<vmem>>, %arg8: memref<32x32xf32, #tpu.memory_space<vmem>>, %arg9: memref<1x32xf32, #tpu.memory_space<vmem>>, %arg10: memref<128x32xf32, #tpu.memory_space<vmem>>, %arg11: memref<1x2x32xf32, #tpu.memory_space<vmem>>, %arg12: memref<128x16xf32, #tpu.memory_space<vmem>>) attributes {dimension_semantics = [#tpu.dimension_semantics<parallel>, #tpu.dimension_semantics<arbitrary>], iteration_bounds = array<i64: 2, 2>, scalar_prefetch = 0 : i64, scratch_operands = 1 : i64, tpu.core_type = #tpu.core_type<tc>, window_params = [{transform_indices = @transform_0, window_bounds = array<i64: 128, 128>}, {pipeline_mode = #tpu.pipeline_mode<synchronous>, transform_indices = @transform_1, window_bounds = array<i64: 256, 16>}, {transform_indices = @transform_2, window_bounds = array<i64: 128, 1>}, {pipeline_mode = #tpu.pipeline_mode<synchronous>, transform_indices = @transform_3, window_bounds = array<i64: 16, 32>}, {pipeline_mode = #tpu.pipeline_mode<synchronous>, transform_indices = @transform_4, window_bounds = array<i64: 1, 32>}, {pipeline_mode = #tpu.pipeline_mode<synchronous>, transform_indices = @transform_5, window_bounds = array<i64: 1, 32>}, {pipeline_mode = #tpu.pipeline_mode<synchronous>, transform_indices = @transform_6, window_bounds = array<i64: 32, 32>}, {pipeline_mode = #tpu.pipeline_mode<synchronous>, transform_indices = @transform_7, window_bounds = array<i64: 1, 32>}, {transform_indices = @transform_8, window_bounds = array<i64: 128, 32>}, {transform_indices = @transform_9, window_bounds = array<i64: 1, 2, 32>}]} {
    %c0_i32 = arith.constant 0 : i32
    %0 = arith.cmpi eq, %arg1, %c0_i32 : i32
    %1 = arith.extui %0 : i1 to i32
    %c0_i32_0 = arith.constant 0 : i32
    %2 = arith.cmpi ne, %1, %c0_i32_0 : i32
    scf.if %2 {
      %cst_8 = arith.constant 0.000000e+00 : f32
      %18 = vector.broadcast %cst_8 : f32 to vector<128x16xf32>
      %c0_9 = arith.constant 0 : index
      %c0_10 = arith.constant 0 : index
      %19 = vector.load %arg12[%c0_9, %c0_10] : memref<128x16xf32, #tpu.memory_space<vmem>>, vector<128x16xf32>
      tpu.vector_store %arg12[%c0_9, %c0_10], %18 {strides = array<i32>} : memref<128x16xf32, #tpu.memory_space<vmem>>, vector<128x16xf32>,
    } else {
    }
    %c128_i32 = arith.constant 128 : i32
    %3 = arith.muli %arg1, %c128_i32 : i32
    %4 = tpu.assume_multiple %3, 128 : i32
    %c0 = arith.constant 0 : index
    %c0_1 = arith.constant 0 : index
    %5 = vector.load %arg2[%c0, %c0_1] : memref<128x128xi8, #tpu.memory_space<vmem>>, vector<128x128xi8>
    %6 = arith.sitofp %5 : vector<128x128xi8> to vector<128x128xf32>
    %7 = arith.truncf %6 : vector<128x128xf32> to vector<128x128xbf16>
    %8 = arith.index_cast %4 : i32 to index
    %c0_2 = arith.constant 0 : index
    %9 = vector.load %arg3[%8, %c0_2] : memref<256x16xf32, #tpu.memory_space<vmem>>, vector<128x16xf32>
    %10 = arith.truncf %9 : vector<128x16xf32> to vector<128x16xbf16>
    %c0_3 = arith.constant 0 : index
    %c0_4 = arith.constant 0 : index
    %11 = vector.load %arg12[%c0_3, %c0_4] : memref<128x16xf32, #tpu.memory_space<vmem>>, vector<128x16xf32>
    %cst = arith.constant dense<0.000000e+00> : vector<128x16xf32>
    %12 = tpu.matmul %7, %10, %cst {dimension_numbers = #tpu.dot_dimension_numbers<[1], [0], [0], [1], [0, 0, 1, 1], [], []>} : vector<128x128xbf16>, vector<128x16xbf16>, vector<128x16xf32> -> vector<128x16xf32>
    %13 = arith.addf %11, %12 : vector<128x16xf32>
    %c0_5 = arith.constant 0 : index
    %c0_6 = arith.constant 0 : index
    %14 = vector.load %arg12[%c0_5, %c0_6] : memref<128x16xf32, #tpu.memory_space<vmem>>, vector<128x16xf32>
    tpu.vector_store %arg12[%c0_5, %c0_6], %13 {strides = array<i32>} : memref<128x16xf32, #tpu.memory_space<vmem>>, vector<128x16xf32>,
    %c1_i32 = arith.constant 1 : i32
    %15 = arith.cmpi eq, %arg1, %c1_i32 : i32
    %16 = arith.extui %15 : i1 to i32
    %c0_i32_7 = arith.constant 0 : i32
    %17 = arith.cmpi ne, %16, %c0_i32_7 : i32
    scf.if %17 {
      %c128_i32_8 = arith.constant 128 : i32
      %18 = arith.muli %arg0, %c128_i32_8 : i32
      %19 = tpu.assume_multiple %18, 128 : i32
      %20 = arith.index_cast %19 : i32 to index
      %c0_9 = arith.constant 0 : index
      %21 = vector.load %arg3[%20, %c0_9] : memref<256x16xf32, #tpu.memory_space<vmem>>, vector<128x16xf32>
      %c0_10 = arith.constant 0 : index
      %c0_11 = arith.constant 0 : index
      %22 = vector.load %arg12[%c0_10, %c0_11] : memref<128x16xf32, #tpu.memory_space<vmem>>, vector<128x16xf32>
      %23 = arith.addf %21, %22 : vector<128x16xf32>
      %c0_12 = arith.constant 0 : index
      %c0_13 = arith.constant 0 : index
      %24 = vector.load %arg5[%c0_12, %c0_13] : memref<16x32xf32, #tpu.memory_space<vmem>>, vector<16x32xf32>
      %cst_14 = arith.constant dense<0.000000e+00> : vector<128x32xf32>
      %25 = tpu.matmul %23, %24, %cst_14 {dimension_numbers = #tpu.dot_dimension_numbers<[1], [0], [0], [1], [0, 0, 1, 1], [], []>} : vector<128x16xf32>, vector<16x32xf32>, vector<128x32xf32> -> vector<128x32xf32>
      %c0_15 = arith.constant 0 : index
      %c0_16 = arith.constant 0 : index
      %26 = vector.load %arg6[%c0_15, %c0_16] : memref<1x32xf32, #tpu.memory_space<vmem>>, vector<1x32xf32>
      %27 = vector.broadcast %26 : vector<1x32xf32> to vector<128x32xf32>
      %28 = arith.addf %25, %27 : vector<128x32xf32>
      %c0_17 = arith.constant 0 : index
      %c0_18 = arith.constant 0 : index
      %29 = vector.load %arg4[%c0_17, %c0_18] : memref<128x1xf32, #tpu.memory_space<vmem>>, vector<128x1xf32>
      %cst_19 = arith.constant 1.000000e+00 : f32
      %30 = vector.broadcast %cst_19 : f32 to vector<128x1xf32>
      %31 = arith.addf %30, %29 : vector<128x1xf32>
      %c0_20 = arith.constant 0 : index
      %c0_21 = arith.constant 0 : index
      %32 = vector.load %arg7[%c0_20, %c0_21] : memref<1x32xf32, #tpu.memory_space<vmem>>, vector<1x32xf32>
      %33 = vector.broadcast %31 : vector<128x1xf32> to vector<128x32xf32>
      %34 = vector.broadcast %32 : vector<1x32xf32> to vector<128x32xf32>
      %35 = arith.mulf %33, %34 : vector<128x32xf32>
      %36 = arith.addf %28, %35 : vector<128x32xf32>
      %cst_22 = arith.constant 0.000000e+00 : f32
      %37 = vector.broadcast %cst_22 : f32 to vector<128x32xf32>
      %38 = arith.maximumf %36, %37 : vector<128x32xf32>
      %c0_23 = arith.constant 0 : index
      %c0_24 = arith.constant 0 : index
      %39 = vector.load %arg8[%c0_23, %c0_24] : memref<32x32xf32, #tpu.memory_space<vmem>>, vector<32x32xf32>
      %cst_25 = arith.constant dense<0.000000e+00> : vector<128x32xf32>
      %40 = tpu.matmul %38, %39, %cst_25 {dimension_numbers = #tpu.dot_dimension_numbers<[1], [0], [0], [1], [0, 0, 1, 1], [], []>} : vector<128x32xf32>, vector<32x32xf32>, vector<128x32xf32> -> vector<128x32xf32>
      %c0_26 = arith.constant 0 : index
      %c0_27 = arith.constant 0 : index
      %41 = vector.load %arg9[%c0_26, %c0_27] : memref<1x32xf32, #tpu.memory_space<vmem>>, vector<1x32xf32>
      %42 = vector.broadcast %41 : vector<1x32xf32> to vector<128x32xf32>
      %43 = arith.addf %40, %42 : vector<128x32xf32>
      %cst_28 = arith.constant 0.000000e+00 : f32
      %44 = vector.broadcast %cst_28 : f32 to vector<128x32xf32>
      %45 = arith.maximumf %43, %44 : vector<128x32xf32>
      %c0_29 = arith.constant 0 : index
      %c0_30 = arith.constant 0 : index
      %46 = vector.load %arg10[%c0_29, %c0_30] : memref<128x32xf32, #tpu.memory_space<vmem>>, vector<128x32xf32>
      tpu.vector_store %arg10[%c0_29, %c0_30], %45 {strides = array<i32>} : memref<128x32xf32, #tpu.memory_space<vmem>>, vector<128x32xf32>,
      %cst_31 = arith.constant dense<0.000000e+00> : vector<32xf32>
      %47 = vector.multi_reduction <add>, %45, %cst_31 [0] : vector<128x32xf32> to vector<32xf32>
      %48 = vector.shape_cast %47 : vector<32xf32> to vector<1x32xf32>
      %49 = arith.mulf %45, %45 : vector<128x32xf32>
      %cst_32 = arith.constant dense<0.000000e+00> : vector<32xf32>
      %50 = vector.multi_reduction <add>, %49, %cst_32 [0] : vector<128x32xf32> to vector<32xf32>
      %51 = vector.shape_cast %50 : vector<32xf32> to vector<1x32xf32>
      %52 = tpu.concatenate %48, %51 in 0 : vector<1x32xf32>, vector<1x32xf32> -> vector<2x32xf32>
      %c0_33 = arith.constant 0 : index
      %c0_34 = arith.constant 0 : index
      %c0_35 = arith.constant 0 : index
      %53 = vector.load %arg11[%c0_33, %c0_34, %c0_35] : memref<1x2x32xf32, #tpu.memory_space<vmem>>, vector<1x2x32xf32>
      %54 = vector.shape_cast %53 : vector<1x2x32xf32> to vector<2x32xf32>
      %55 = vector.shape_cast %52 : vector<2x32xf32> to vector<1x2x32xf32>
      tpu.vector_store %arg11[%c0_33, %c0_34, %c0_35], %55 {strides = array<i32>} : memref<1x2x32xf32, #tpu.memory_space<vmem>>, vector<1x2x32xf32>,
    } else {
    }
    return
  }
  func.func @transform_0(%arg0: i32, %arg1: i32) -> (i32, i32) {
    %c0_i32 = arith.constant 0 : i32
    return %arg0, %arg1 : i32, i32
  }
  func.func @transform_1(%arg0: i32, %arg1: i32) -> (i32, i32) {
    %c0_i32 = arith.constant 0 : i32
    %c0_i32_0 = arith.constant 0 : i32
    %c0_i32_1 = arith.constant 0 : i32
    return %c0_i32, %c0_i32_0 : i32, i32
  }
  func.func @transform_2(%arg0: i32, %arg1: i32) -> (i32, i32) {
    %c0_i32 = arith.constant 0 : i32
    %c0_i32_0 = arith.constant 0 : i32
    return %arg0, %c0_i32 : i32, i32
  }
  func.func @transform_3(%arg0: i32, %arg1: i32) -> (i32, i32) {
    %c0_i32 = arith.constant 0 : i32
    %c0_i32_0 = arith.constant 0 : i32
    %c0_i32_1 = arith.constant 0 : i32
    return %c0_i32, %c0_i32_0 : i32, i32
  }
  func.func @transform_4(%arg0: i32, %arg1: i32) -> (i32, i32) {
    %c0_i32 = arith.constant 0 : i32
    %c0_i32_0 = arith.constant 0 : i32
    %c0_i32_1 = arith.constant 0 : i32
    return %c0_i32, %c0_i32_0 : i32, i32
  }
  func.func @transform_5(%arg0: i32, %arg1: i32) -> (i32, i32) {
    %c0_i32 = arith.constant 0 : i32
    %c0_i32_0 = arith.constant 0 : i32
    %c0_i32_1 = arith.constant 0 : i32
    return %c0_i32, %c0_i32_0 : i32, i32
  }
  func.func @transform_6(%arg0: i32, %arg1: i32) -> (i32, i32) {
    %c0_i32 = arith.constant 0 : i32
    %c0_i32_0 = arith.constant 0 : i32
    %c0_i32_1 = arith.constant 0 : i32
    return %c0_i32, %c0_i32_0 : i32, i32
  }
  func.func @transform_7(%arg0: i32, %arg1: i32) -> (i32, i32) {
    %c0_i32 = arith.constant 0 : i32
    %c0_i32_0 = arith.constant 0 : i32
    %c0_i32_1 = arith.constant 0 : i32
    return %c0_i32, %c0_i32_0 : i32, i32
  }
  func.func @transform_8(%arg0: i32, %arg1: i32) -> (i32, i32) {
    %c0_i32 = arith.constant 0 : i32
    %c0_i32_0 = arith.constant 0 : i32
    return %arg0, %c0_i32 : i32, i32
  }
  func.func @transform_9(%arg0: i32, %arg1: i32) -> (i32, i32, i32) {
    %c0_i32 = arith.constant 0 : i32
    %c0_i32_0 = arith.constant 0 : i32
    %c0_i32_1 = arith.constant 0 : i32
    return %arg0, %c0_i32, %c0_i32_0 : i32, i32, i32
  }
}

module attributes {stable_mosaic.version = 11 : i64} {
  func.func @kernel(%arg0: i32, %arg1: i32, %arg2: memref<128x128xi8, #tpu.memory_space<vmem>>, %arg3: memref<256x32xf32, #tpu.memory_space<vmem>>, %arg4: memref<128x1xf32, #tpu.memory_space<vmem>>, %arg5: memref<32x32xf32, #tpu.memory_space<vmem>>, %arg6: memref<1x32xf32, #tpu.memory_space<vmem>>, %arg7: memref<1x32xf32, #tpu.memory_space<vmem>>, %arg8: memref<32x32xf32, #tpu.memory_space<vmem>>, %arg9: memref<1x32xf32, #tpu.memory_space<vmem>>, %arg10: memref<128x32xf32, #tpu.memory_space<vmem>>, %arg11: memref<1x2x32xf32, #tpu.memory_space<vmem>>, %arg12: memref<128x32xf32, #tpu.memory_space<vmem>>) attributes {dimension_semantics = [#tpu.dimension_semantics<parallel>, #tpu.dimension_semantics<arbitrary>], iteration_bounds = array<i64: 2, 2>, scalar_prefetch = 0 : i64, scratch_operands = 1 : i64, tpu.core_type = #tpu.core_type<tc>, window_params = [{transform_indices = @transform_0, window_bounds = array<i64: 128, 128>}, {pipeline_mode = #tpu.pipeline_mode<synchronous>, transform_indices = @transform_1, window_bounds = array<i64: 256, 32>}, {transform_indices = @transform_2, window_bounds = array<i64: 128, 1>}, {pipeline_mode = #tpu.pipeline_mode<synchronous>, transform_indices = @transform_3, window_bounds = array<i64: 32, 32>}, {pipeline_mode = #tpu.pipeline_mode<synchronous>, transform_indices = @transform_4, window_bounds = array<i64: 1, 32>}, {pipeline_mode = #tpu.pipeline_mode<synchronous>, transform_indices = @transform_5, window_bounds = array<i64: 1, 32>}, {pipeline_mode = #tpu.pipeline_mode<synchronous>, transform_indices = @transform_6, window_bounds = array<i64: 32, 32>}, {pipeline_mode = #tpu.pipeline_mode<synchronous>, transform_indices = @transform_7, window_bounds = array<i64: 1, 32>}, {transform_indices = @transform_8, window_bounds = array<i64: 128, 32>}, {transform_indices = @transform_9, window_bounds = array<i64: 1, 2, 32>}]} {
    %c0_i32 = arith.constant 0 : i32
    %0 = arith.cmpi eq, %arg1, %c0_i32 : i32
    %1 = arith.extui %0 : i1 to i32
    %c0_i32_0 = arith.constant 0 : i32
    %2 = arith.cmpi ne, %1, %c0_i32_0 : i32
    scf.if %2 {
      %cst_8 = arith.constant 0.000000e+00 : f32
      %18 = vector.broadcast %cst_8 : f32 to vector<128x32xf32>
      %c0_9 = arith.constant 0 : index
      %c0_10 = arith.constant 0 : index
      %19 = vector.load %arg12[%c0_9, %c0_10] : memref<128x32xf32, #tpu.memory_space<vmem>>, vector<128x32xf32>
      tpu.vector_store %arg12[%c0_9, %c0_10], %18 {strides = array<i32>} : memref<128x32xf32, #tpu.memory_space<vmem>>, vector<128x32xf32>,
    } else {
    }
    %c128_i32 = arith.constant 128 : i32
    %3 = arith.muli %arg1, %c128_i32 : i32
    %4 = tpu.assume_multiple %3, 128 : i32
    %c0 = arith.constant 0 : index
    %c0_1 = arith.constant 0 : index
    %5 = vector.load %arg2[%c0, %c0_1] : memref<128x128xi8, #tpu.memory_space<vmem>>, vector<128x128xi8>
    %6 = arith.sitofp %5 : vector<128x128xi8> to vector<128x128xf32>
    %7 = arith.truncf %6 : vector<128x128xf32> to vector<128x128xbf16>
    %8 = arith.index_cast %4 : i32 to index
    %c0_2 = arith.constant 0 : index
    %9 = vector.load %arg3[%8, %c0_2] : memref<256x32xf32, #tpu.memory_space<vmem>>, vector<128x32xf32>
    %10 = arith.truncf %9 : vector<128x32xf32> to vector<128x32xbf16>
    %c0_3 = arith.constant 0 : index
    %c0_4 = arith.constant 0 : index
    %11 = vector.load %arg12[%c0_3, %c0_4] : memref<128x32xf32, #tpu.memory_space<vmem>>, vector<128x32xf32>
    %cst = arith.constant dense<0.000000e+00> : vector<128x32xf32>
    %12 = tpu.matmul %7, %10, %cst {dimension_numbers = #tpu.dot_dimension_numbers<[1], [0], [0], [1], [0, 0, 1, 1], [], []>} : vector<128x128xbf16>, vector<128x32xbf16>, vector<128x32xf32> -> vector<128x32xf32>
    %13 = arith.addf %11, %12 : vector<128x32xf32>
    %c0_5 = arith.constant 0 : index
    %c0_6 = arith.constant 0 : index
    %14 = vector.load %arg12[%c0_5, %c0_6] : memref<128x32xf32, #tpu.memory_space<vmem>>, vector<128x32xf32>
    tpu.vector_store %arg12[%c0_5, %c0_6], %13 {strides = array<i32>} : memref<128x32xf32, #tpu.memory_space<vmem>>, vector<128x32xf32>,
    %c1_i32 = arith.constant 1 : i32
    %15 = arith.cmpi eq, %arg1, %c1_i32 : i32
    %16 = arith.extui %15 : i1 to i32
    %c0_i32_7 = arith.constant 0 : i32
    %17 = arith.cmpi ne, %16, %c0_i32_7 : i32
    scf.if %17 {
      %c128_i32_8 = arith.constant 128 : i32
      %18 = arith.muli %arg0, %c128_i32_8 : i32
      %19 = tpu.assume_multiple %18, 128 : i32
      %20 = arith.index_cast %19 : i32 to index
      %c0_9 = arith.constant 0 : index
      %21 = vector.load %arg3[%20, %c0_9] : memref<256x32xf32, #tpu.memory_space<vmem>>, vector<128x32xf32>
      %c0_10 = arith.constant 0 : index
      %c0_11 = arith.constant 0 : index
      %22 = vector.load %arg12[%c0_10, %c0_11] : memref<128x32xf32, #tpu.memory_space<vmem>>, vector<128x32xf32>
      %23 = arith.addf %21, %22 : vector<128x32xf32>
      %c0_12 = arith.constant 0 : index
      %c0_13 = arith.constant 0 : index
      %24 = vector.load %arg5[%c0_12, %c0_13] : memref<32x32xf32, #tpu.memory_space<vmem>>, vector<32x32xf32>
      %cst_14 = arith.constant dense<0.000000e+00> : vector<128x32xf32>
      %25 = tpu.matmul %23, %24, %cst_14 {dimension_numbers = #tpu.dot_dimension_numbers<[1], [0], [0], [1], [0, 0, 1, 1], [], []>} : vector<128x32xf32>, vector<32x32xf32>, vector<128x32xf32> -> vector<128x32xf32>
      %c0_15 = arith.constant 0 : index
      %c0_16 = arith.constant 0 : index
      %26 = vector.load %arg6[%c0_15, %c0_16] : memref<1x32xf32, #tpu.memory_space<vmem>>, vector<1x32xf32>
      %27 = vector.broadcast %26 : vector<1x32xf32> to vector<128x32xf32>
      %28 = arith.addf %25, %27 : vector<128x32xf32>
      %c0_17 = arith.constant 0 : index
      %c0_18 = arith.constant 0 : index
      %29 = vector.load %arg4[%c0_17, %c0_18] : memref<128x1xf32, #tpu.memory_space<vmem>>, vector<128x1xf32>
      %cst_19 = arith.constant 1.000000e+00 : f32
      %30 = vector.broadcast %cst_19 : f32 to vector<128x1xf32>
      %31 = arith.addf %30, %29 : vector<128x1xf32>
      %c0_20 = arith.constant 0 : index
      %c0_21 = arith.constant 0 : index
      %32 = vector.load %arg7[%c0_20, %c0_21] : memref<1x32xf32, #tpu.memory_space<vmem>>, vector<1x32xf32>
      %33 = vector.broadcast %31 : vector<128x1xf32> to vector<128x32xf32>
      %34 = vector.broadcast %32 : vector<1x32xf32> to vector<128x32xf32>
      %35 = arith.mulf %33, %34 : vector<128x32xf32>
      %36 = arith.addf %28, %35 : vector<128x32xf32>
      %cst_22 = arith.constant 0.000000e+00 : f32
      %37 = vector.broadcast %cst_22 : f32 to vector<128x32xf32>
      %38 = arith.maximumf %36, %37 : vector<128x32xf32>
      %c0_23 = arith.constant 0 : index
      %c0_24 = arith.constant 0 : index
      %39 = vector.load %arg8[%c0_23, %c0_24] : memref<32x32xf32, #tpu.memory_space<vmem>>, vector<32x32xf32>
      %cst_25 = arith.constant dense<0.000000e+00> : vector<128x32xf32>
      %40 = tpu.matmul %38, %39, %cst_25 {dimension_numbers = #tpu.dot_dimension_numbers<[1], [0], [0], [1], [0, 0, 1, 1], [], []>} : vector<128x32xf32>, vector<32x32xf32>, vector<128x32xf32> -> vector<128x32xf32>
      %c0_26 = arith.constant 0 : index
      %c0_27 = arith.constant 0 : index
      %41 = vector.load %arg9[%c0_26, %c0_27] : memref<1x32xf32, #tpu.memory_space<vmem>>, vector<1x32xf32>
      %42 = vector.broadcast %41 : vector<1x32xf32> to vector<128x32xf32>
      %43 = arith.addf %40, %42 : vector<128x32xf32>
      %cst_28 = arith.constant 0.000000e+00 : f32
      %44 = vector.broadcast %cst_28 : f32 to vector<128x32xf32>
      %45 = arith.maximumf %43, %44 : vector<128x32xf32>
      %c0_29 = arith.constant 0 : index
      %c0_30 = arith.constant 0 : index
      %46 = vector.load %arg10[%c0_29, %c0_30] : memref<128x32xf32, #tpu.memory_space<vmem>>, vector<128x32xf32>
      tpu.vector_store %arg10[%c0_29, %c0_30], %45 {strides = array<i32>} : memref<128x32xf32, #tpu.memory_space<vmem>>, vector<128x32xf32>,
      %cst_31 = arith.constant dense<0.000000e+00> : vector<32xf32>
      %47 = vector.multi_reduction <add>, %45, %cst_31 [0] : vector<128x32xf32> to vector<32xf32>
      %48 = vector.shape_cast %47 : vector<32xf32> to vector<1x32xf32>
      %49 = arith.mulf %45, %45 : vector<128x32xf32>
      %cst_32 = arith.constant dense<0.000000e+00> : vector<32xf32>
      %50 = vector.multi_reduction <add>, %49, %cst_32 [0] : vector<128x32xf32> to vector<32xf32>
      %51 = vector.shape_cast %50 : vector<32xf32> to vector<1x32xf32>
      %52 = tpu.concatenate %48, %51 in 0 : vector<1x32xf32>, vector<1x32xf32> -> vector<2x32xf32>
      %c0_33 = arith.constant 0 : index
      %c0_34 = arith.constant 0 : index
      %c0_35 = arith.constant 0 : index
      %53 = vector.load %arg11[%c0_33, %c0_34, %c0_35] : memref<1x2x32xf32, #tpu.memory_space<vmem>>, vector<1x2x32xf32>
      %54 = vector.shape_cast %53 : vector<1x2x32xf32> to vector<2x32xf32>
      %55 = vector.shape_cast %52 : vector<2x32xf32> to vector<1x2x32xf32>
      tpu.vector_store %arg11[%c0_33, %c0_34, %c0_35], %55 {strides = array<i32>} : memref<1x2x32xf32, #tpu.memory_space<vmem>>, vector<1x2x32xf32>,
    } else {
    }
    return
  }
  func.func @transform_0(%arg0: i32, %arg1: i32) -> (i32, i32) {
    %c0_i32 = arith.constant 0 : i32
    return %arg0, %arg1 : i32, i32
  }
  func.func @transform_1(%arg0: i32, %arg1: i32) -> (i32, i32) {
    %c0_i32 = arith.constant 0 : i32
    %c0_i32_0 = arith.constant 0 : i32
    %c0_i32_1 = arith.constant 0 : i32
    return %c0_i32, %c0_i32_0 : i32, i32
  }
  func.func @transform_2(%arg0: i32, %arg1: i32) -> (i32, i32) {
    %c0_i32 = arith.constant 0 : i32
    %c0_i32_0 = arith.constant 0 : i32
    return %arg0, %c0_i32 : i32, i32
  }
  func.func @transform_3(%arg0: i32, %arg1: i32) -> (i32, i32) {
    %c0_i32 = arith.constant 0 : i32
    %c0_i32_0 = arith.constant 0 : i32
    %c0_i32_1 = arith.constant 0 : i32
    return %c0_i32, %c0_i32_0 : i32, i32
  }
  func.func @transform_4(%arg0: i32, %arg1: i32) -> (i32, i32) {
    %c0_i32 = arith.constant 0 : i32
    %c0_i32_0 = arith.constant 0 : i32
    %c0_i32_1 = arith.constant 0 : i32
    return %c0_i32, %c0_i32_0 : i32, i32
  }
  func.func @transform_5(%arg0: i32, %arg1: i32) -> (i32, i32) {
    %c0_i32 = arith.constant 0 : i32
    %c0_i32_0 = arith.constant 0 : i32
    %c0_i32_1 = arith.constant 0 : i32
    return %c0_i32, %c0_i32_0 : i32, i32
  }
  func.func @transform_6(%arg0: i32, %arg1: i32) -> (i32, i32) {
    %c0_i32 = arith.constant 0 : i32
    %c0_i32_0 = arith.constant 0 : i32
    %c0_i32_1 = arith.constant 0 : i32
    return %c0_i32, %c0_i32_0 : i32, i32
  }
  func.func @transform_7(%arg0: i32, %arg1: i32) -> (i32, i32) {
    %c0_i32 = arith.constant 0 : i32
    %c0_i32_0 = arith.constant 0 : i32
    %c0_i32_1 = arith.constant 0 : i32
    return %c0_i32, %c0_i32_0 : i32, i32
  }
  func.func @transform_8(%arg0: i32, %arg1: i32) -> (i32, i32) {
    %c0_i32 = arith.constant 0 : i32
    %c0_i32_0 = arith.constant 0 : i32
    return %arg0, %c0_i32 : i32, i32
  }
  func.func @transform_9(%arg0: i32, %arg1: i32) -> (i32, i32, i32) {
    %c0_i32 = arith.constant 0 : i32
    %c0_i32_0 = arith.constant 0 : i32
    %c0_i32_1 = arith.constant 0 : i32
    return %arg0, %c0_i32, %c0_i32_0 : i32, i32, i32
  }
}

module attributes {stable_mosaic.version = 11 : i64} {
  func.func @kernel(%arg0: i32, %arg1: memref<128x32xf32, #tpu.memory_space<vmem>>, %arg2: memref<128x32xf32, #tpu.memory_space<vmem>>, %arg3: memref<8x128xbf16, #tpu.memory_space<vmem>>, %arg4: memref<1x64xf32, #tpu.memory_space<vmem>>, %arg5: memref<1x64xf32, #tpu.memory_space<vmem>>, %arg6: memref<128x64xf32, #tpu.memory_space<vmem>>, %arg7: memref<1x8x64xf32, #tpu.memory_space<vmem>>) attributes {dimension_semantics = [#tpu.dimension_semantics<parallel>], iteration_bounds = array<i64: 2>, scalar_prefetch = 0 : i64, scratch_operands = 0 : i64, tpu.core_type = #tpu.core_type<tc>, window_params = [{transform_indices = @transform_0, window_bounds = array<i64: 128, 32>}, {transform_indices = @transform_1, window_bounds = array<i64: 128, 32>}, {transform_indices = @transform_2, window_bounds = array<i64: 8, 128>}, {pipeline_mode = #tpu.pipeline_mode<synchronous>, transform_indices = @transform_3, window_bounds = array<i64: 1, 64>}, {pipeline_mode = #tpu.pipeline_mode<synchronous>, transform_indices = @transform_4, window_bounds = array<i64: 1, 64>}, {transform_indices = @transform_5, window_bounds = array<i64: 128, 64>}, {transform_indices = @transform_6, window_bounds = array<i64: 1, 8, 64>}]} {
    %c0 = arith.constant 0 : index
    %c0_0 = arith.constant 0 : index
    %0 = vector.load %arg4[%c0, %c0_0] : memref<1x64xf32, #tpu.memory_space<vmem>>, vector<1x64xf32>
    %c0_1 = arith.constant 0 : index
    %c0_2 = arith.constant 0 : index
    %1 = vector.load %arg5[%c0_1, %c0_2] : memref<1x64xf32, #tpu.memory_space<vmem>>, vector<1x64xf32>
    %c0_3 = arith.constant 0 : index
    %c0_4 = arith.constant 0 : index
    %2 = vector.load %arg1[%c0_3, %c0_4] : memref<128x32xf32, #tpu.memory_space<vmem>>, vector<128x32xf32>
    %3 = vector.extract_strided_slice %0 {offsets = [0, 0], sizes = [1, 32], strides = [1, 1]} : vector<1x64xf32> to vector<1x32xf32>
    %4 = vector.broadcast %3 : vector<1x32xf32> to vector<128x32xf32>
    %5 = arith.mulf %2, %4 : vector<128x32xf32>
    %6 = vector.extract_strided_slice %1 {offsets = [0, 0], sizes = [1, 32], strides = [1, 1]} : vector<1x64xf32> to vector<1x32xf32>
    %7 = vector.broadcast %6 : vector<1x32xf32> to vector<128x32xf32>
    %8 = arith.addf %5, %7 : vector<128x32xf32>
    %c0_5 = arith.constant 0 : index
    %c0_6 = arith.constant 0 : index
    %9 = vector.load %arg2[%c0_5, %c0_6] : memref<128x32xf32, #tpu.memory_space<vmem>>, vector<128x32xf32>
    %10 = vector.extract_strided_slice %0 {offsets = [0, 32], sizes = [1, 32], strides = [1, 1]} : vector<1x64xf32> to vector<1x32xf32>
    %11 = vector.broadcast %10 : vector<1x32xf32> to vector<128x32xf32>
    %12 = arith.mulf %9, %11 : vector<128x32xf32>
    %13 = vector.extract_strided_slice %1 {offsets = [0, 32], sizes = [1, 32], strides = [1, 1]} : vector<1x64xf32> to vector<1x32xf32>
    %14 = vector.broadcast %13 : vector<1x32xf32> to vector<128x32xf32>
    %15 = arith.addf %12, %14 : vector<128x32xf32>
    %16 = tpu.concatenate %8, %15 in 1 : vector<128x32xf32>, vector<128x32xf32> -> vector<128x64xf32>
    %c0_7 = arith.constant 0 : index
    %c0_8 = arith.constant 0 : index
    %17 = vector.load %arg6[%c0_7, %c0_8] : memref<128x64xf32, #tpu.memory_space<vmem>>, vector<128x64xf32>
    tpu.vector_store %arg6[%c0_7, %c0_8], %16 {strides = array<i32>} : memref<128x64xf32, #tpu.memory_space<vmem>>, vector<128x64xf32>,
    %c0_9 = arith.constant 0 : index
    %c0_10 = arith.constant 0 : index
    %18 = vector.load %arg3[%c0_9, %c0_10] : memref<8x128xbf16, #tpu.memory_space<vmem>>, vector<8x128xbf16>
    %19 = arith.truncf %16 : vector<128x64xf32> to vector<128x64xbf16>
    %cst = arith.constant dense<0.000000e+00> : vector<8x64xf32>
    %20 = tpu.matmul %18, %19, %cst {dimension_numbers = #tpu.dot_dimension_numbers<[1], [0], [0], [1], [0, 0, 1, 1], [], []>} : vector<8x128xbf16>, vector<128x64xbf16>, vector<8x64xf32> -> vector<8x64xf32>
    %c0_11 = arith.constant 0 : index
    %c0_12 = arith.constant 0 : index
    %c0_13 = arith.constant 0 : index
    %21 = vector.load %arg7[%c0_11, %c0_12, %c0_13] : memref<1x8x64xf32, #tpu.memory_space<vmem>>, vector<1x8x64xf32>
    %22 = vector.shape_cast %21 : vector<1x8x64xf32> to vector<8x64xf32>
    %23 = vector.shape_cast %20 : vector<8x64xf32> to vector<1x8x64xf32>
    tpu.vector_store %arg7[%c0_11, %c0_12, %c0_13], %23 {strides = array<i32>} : memref<1x8x64xf32, #tpu.memory_space<vmem>>, vector<1x8x64xf32>,
    return
  }
  func.func @transform_0(%arg0: i32) -> (i32, i32) {
    %c0_i32 = arith.constant 0 : i32
    %c0_i32_0 = arith.constant 0 : i32
    return %arg0, %c0_i32 : i32, i32
  }
  func.func @transform_1(%arg0: i32) -> (i32, i32) {
    %c0_i32 = arith.constant 0 : i32
    %c0_i32_0 = arith.constant 0 : i32
    return %arg0, %c0_i32 : i32, i32
  }
  func.func @transform_2(%arg0: i32) -> (i32, i32) {
    %c0_i32 = arith.constant 0 : i32
    %c0_i32_0 = arith.constant 0 : i32
    return %c0_i32, %arg0 : i32, i32
  }
  func.func @transform_3(%arg0: i32) -> (i32, i32) {
    %c0_i32 = arith.constant 0 : i32
    %c0_i32_0 = arith.constant 0 : i32
    %c0_i32_1 = arith.constant 0 : i32
    return %c0_i32, %c0_i32_0 : i32, i32
  }
  func.func @transform_4(%arg0: i32) -> (i32, i32) {
    %c0_i32 = arith.constant 0 : i32
    %c0_i32_0 = arith.constant 0 : i32
    %c0_i32_1 = arith.constant 0 : i32
    return %c0_i32, %c0_i32_0 : i32, i32
  }
  func.func @transform_5(%arg0: i32) -> (i32, i32) {
    %c0_i32 = arith.constant 0 : i32
    %c0_i32_0 = arith.constant 0 : i32
    return %arg0, %c0_i32 : i32, i32
  }
  func.func @transform_6(%arg0: i32) -> (i32, i32, i32) {
    %c0_i32 = arith.constant 0 : i32
    %c0_i32_0 = arith.constant 0 : i32
    %c0_i32_1 = arith.constant 0 : i32
    return %arg0, %c0_i32, %c0_i32_0 : i32, i32, i32
  }
}

</mosaic_0001>

<bundles_post_ra>
// kernel: gcn_forward.5
= control target key start
LH: loop header
LB: loop body
LE: loop exit
PB: predicated region body
PF: predicated region fallthrough
CT: control target
= control target key end

     0   :  { %s786_s21 = smov 0   ;;  %s996_s0 = inlined_call_operand.vmem [shape: f32[256,32], index: 0, kind: input, shape index: {}]   ;;  %s997_s1 = inlined_call_operand.vmem [shape: f32[256,32], index: 1, kind: input, shape index: {}]   ;;  %s998_s2 = inlined_call_operand.vmem [shape: bf16[8,256], index: 2, kind: input, shape index: {}]   ;;  %s999_s3 = inlined_call_operand.vmem [shape: f32[1,64], index: 3, kind: input, shape index: {}]   ;;  %s1000_s4 = inlined_call_operand.vmem [shape: f32[1,64], index: 4, kind: input, shape index: {}]   ;;  %s1001_s5 = inlined_call_operand.vmem [shape: f32[256,64], index: 5, kind: output, shape index: {0}]   ;;  %s1002_s6 = inlined_call_operand.vmem [shape: f32[2,8,64], index: 6, kind: output, shape index: {1}]  }
   0x1 LB: > { %s792_s22 = sadd.s32 4294967295, %s745_s21   ;;  %p685_p0 = scmp.ge.s32.totalorder %s745_s21, 1  ;;  %s745_s21 = sphi %s786_s21, %s17_s21  }
   0x2   : > { %p236_p1 = scmp.lt.s32.totalorder %s745_s21, 3 }
   0x4   : > { %p237_p2 = pnand %p685_p0, %p236_p1 }
   0x5   : > { %v799_v0 = vld [vmem:[%s999_s3] ss:$0 sm:$0xff] (!%p237_p2)  ;;  %s747_s25 = smov (!%p237_p2), 96   ;;  %s686_s28 = sshll.u32 (!%p237_p2), %s792_s22, 4  ;;  %v748_v5 = vmov (!%p237_p2), 0.0   ;;  %vm750_vm0 = vmmov (!%p237_p2), 0  }
   0x6   : > { %240 = sbr.rel (%p237_p2) target bundleno = 495 (0x1ef), region = 40  ;;  %384 = vrot.lane.b32.xlu0 (!%p237_p2), %v799_v0, %s747_s25  ;;  %v805_v1 = vld [vmem:[%s1000_s4] ss:$0 sm:$0xff] (!%p237_p2)  ;;  %p280_p3 = scmp.lt.s32.totalorder (!%p237_p2), %s686_s28, 31  ;;  %707 = vmatprep.subr.bf16.mxu0 (!%p237_p2), %v748_v5  ;;  %vm486_vm1 = vcmask (!%p237_p2), 261120   ;;  %vm503_vm2 = vcmask (!%p237_p2), 523264  }
   0x7   : > { %s749_s9 = smov (!%p237_p2), 32   ;;  %723 = vmatprep.mubr.msk.bf16.mxu0 (!%p237_p2), %vm750_vm0, %v748_v5  ;;  %p291_p4 = scmp.lt.s32.totalorder (!%p237_p2), %s792_s22, 1 }
   0xa   : > { %403 = vrot.lane.b32.xlu0 (!%p237_p2), %v805_v1, %s747_s25 }
   0xd   : > { %s1004_s28 = smov (!%p280_p3, %s686_s28), 31  ;;  %s1006_s22 = smov (!%p291_p4, %s792_s22), 1 }
   0xe   : > { %s809_s29 = sshll.u32 %s1004_s28, 3  ;;  %s690_s16 = sshll.u32 %s1006_s22, 2 }
   0xf   : > { %s815_s8 = scalar_lea.vmem %s997_s1, %s809_s29  ;;  %s873_s12 = scalar_lea.vmem %s996_s0, %s809_s29 }
  0x10   : > { %v370_v3 = vld [vmem:[%s815_s8 + $0x10] sm:$0xff]  ;;  %v368_v4 = vld [vmem:[%s815_s8] sm:$0xff]  ;;  %v369_v10 = vld [vmem:[%s815_s8 + $0x8] sm:$0xff]  ;;  %s891_s15 = scalar_lea.vmem %s1001_s5, %s809_s29  ;;  %s294_s19 = scalar_lea.vmem %s998_s2, %s690_s16 }
  0x11   : > { %v372_v9 = vld [vmem:[%s815_s8 + $0x20] sm:$0xff]  ;;  %v374_v15 = vld [vmem:[%s815_s8 + $0x30] sm:$0xff]  ;;  %v371_v16 = vld [vmem:[%s815_s8 + $0x18] sm:$0xff]  ;;  %s693_s20 = sshll.u32 %s1006_s22, 3 }
  0x12   : > { %v376_v21 = vld [vmem:[%s815_s8 + $0x40] sm:$0xff]  ;;  %v373_v22 = vld [vmem:[%s815_s8 + $0x28] sm:$0xff]  ;;  %v378_v27 = vld [vmem:[%s815_s8 + $0x50] sm:$0xff]  ;;  %s304_s25 = scalar_lea.vmem %s1002_s6, %s693_s20 }
  0x13   : > { %v375_v28 = vld [vmem:[%s815_s8 + $0x38] sm:$0xff]  ;;  %v380_v33 = vld [vmem:[%s815_s8 + $0x60] sm:$0xff]  ;;  %v377_v34 = vld [vmem:[%s815_s8 + $0x48] sm:$0xff] }
  0x14   : > { %v382_v39 = vld [vmem:[%s815_s8 + $0x70] sm:$0xff]  ;;  %v379_v40 = vld [vmem:[%s815_s8 + $0x58] sm:$0xff]  ;;  %v381_v45 = vld [vmem:[%s815_s8 + $0x68] sm:$0xff] }
  0x15   : > { %v383_v49 = vld [vmem:[%s815_s8 + $0x78] sm:$0xff]  ;;  %v310_v53 = vld [vmem:[%s873_s12 + $0x10] sm:$0xff]  ;;  %v308_v54 = vld [vmem:[%s873_s12] sm:$0xff] }
  0x16   : > { %v332_v55 = vmul.f32 %v799_v0, %v310_v53  ;;  %v330_v56 = vmul.f32 %v799_v0, %v308_v54  ;;  %v312_v57 = vld [vmem:[%s873_s12 + $0x20] sm:$0xff]  ;;  %v309_v58 = vld [vmem:[%s873_s12 + $0x8] sm:$0xff]  ;;  %v314_v63 = vld [vmem:[%s873_s12 + $0x30] sm:$0xff] }
  0x17   : > { %v334_v59 = vmul.f32 %v799_v0, %v312_v57  ;;  %v331_v60 = vmul.f32 %v799_v0, %v309_v58 }
  0x18   : > { %v354_v61 = vadd.f32 %v805_v1, %v332_v55  ;;  %v352_v62 = vadd.f32 %v805_v1, %v330_v56  ;;  %v321_v56 = vld [vmem:[%s873_s12 + $0x68] sm:$0xff] }
  0x78   : > { %v817_v2 = vpop.permute.xlu0 %384 }
  0x79   : > { %v389_v6 = vmul.f32 %v817_v2, %v370_v3  ;;  %v387_v7 = vmul.f32 %v817_v2, %v368_v4  ;;  %v391_v13 = vmul.f32 %v817_v2, %v372_v9  ;;  %v388_v14 = vmul.f32 %v817_v2, %v369_v10 }
  0x7a   : > { %v393_v19 = vmul.f32 %v817_v2, %v374_v15  ;;  %v390_v20 = vmul.f32 %v817_v2, %v371_v16  ;;  %v395_v25 = vmul.f32 %v817_v2, %v376_v21  ;;  %v392_v26 = vmul.f32 %v817_v2, %v373_v22  ;;  %v318_v22 = vld [vmem:[%s873_s12 + $0x50] sm:$0xff] }
  0x7b   : > { %v397_v31 = vmul.f32 %v817_v2, %v378_v27  ;;  %v394_v32 = vmul.f32 %v817_v2, %v375_v28  ;;  %v399_v37 = vmul.f32 %v817_v2, %v380_v33  ;;  %v396_v38 = vmul.f32 %v817_v2, %v377_v34  ;;  %v320_v33 = vld [vmem:[%s873_s12 + $0x60] sm:$0xff] }
  0x7c   : > { %v404_v8 = vpop.permute.xlu0 %403  ;;  %v401_v43 = vmul.f32 %v817_v2, %v382_v39  ;;  %v398_v44 = vmul.f32 %v817_v2, %v379_v40  ;;  %v400_v48 = vmul.f32 %v817_v2, %v381_v45  ;;  %v402_v51 = vmul.f32 %v817_v2, %v383_v49  ;;  %v311_v2 = vld [vmem:[%s873_s12 + $0x18] sm:$0xff] }
  0x7d   : > { %v408_v11 = vadd.f32 %v404_v8, %v389_v6  ;;  %v406_v12 = vadd.f32 %v404_v8, %v387_v7  ;;  %v410_v17 = vadd.f32 %v404_v8, %v391_v13  ;;  %v407_v18 = vadd.f32 %v404_v8, %v388_v14  ;;  %v313_v13 = vld [vmem:[%s873_s12 + $0x28] sm:$0xff] }
  0x7e   : > { %v412_v23 = vadd.f32 %v404_v8, %v393_v19  ;;  %v409_v24 = vadd.f32 %v404_v8, %v390_v20  ;;  %v414_v29 = vadd.f32 %v404_v8, %v395_v25  ;;  %v411_v30 = vadd.f32 %v404_v8, %v392_v26 }
  0x7f   : > { %442 = vrot.lane.b32.xlu0 %v408_v11, %s749_s9  ;;  %438 = vrot.lane.b32.xlu1 %v406_v12, %s749_s9  ;;  %v416_v35 = vadd.f32 %v404_v8, %v397_v31  ;;  %v413_v36 = vadd.f32 %v404_v8, %v394_v32  ;;  %v418_v41 = vadd.f32 %v404_v8, %v399_v37  ;;  %v316_v12 = vld [vmem:[%s873_s12 + $0x40] sm:$0xff] }
  0x80   : > { %v415_v42 = vadd.f32 %v404_v8, %v396_v38  ;;  %v420_v46 = vadd.f32 %v404_v8, %v401_v43  ;;  %v417_v47 = vadd.f32 %v404_v8, %v398_v44  ;;  %v419_v50 = vadd.f32 %v404_v8, %v400_v48  ;;  %v322_v44 = vld [vmem:[%s873_s12 + $0x70] sm:$0xff] }
  0x81   : > { %v421_v52 = vadd.f32 %v404_v8, %v402_v51  ;;  %v356_v6 = vadd.f32 %v805_v1, %v334_v59  ;;  %v353_v7 = vadd.f32 %v805_v1, %v331_v60  ;;  %v336_v10 = vmul.f32 %v799_v0, %v314_v63 }
  0x82   : > { %v333_v11 = vmul.f32 %v799_v0, %v311_v2  ;;  %v338_v16 = vmul.f32 %v799_v0, %v316_v12  ;;  %v340_v27 = vmul.f32 %v799_v0, %v318_v22  ;;  %v342_v39 = vmul.f32 %v799_v0, %v320_v33 }
  0x83   : > { %446 = vrot.lane.b32.xlu0 %v410_v17, %s749_s9  ;;  %440 = vrot.lane.b32.xlu1 %v407_v18, %s749_s9  ;;  %v335_v17 = vmul.f32 %v799_v0, %v313_v13  ;;  %v358_v20 = vadd.f32 %v805_v1, %v336_v10  ;;  %v343_v63 = vmul.f32 %v799_v0, %v321_v56 }
  0x84   : > { %v355_v21 = vadd.f32 %v805_v1, %v333_v11  ;;  %v360_v31 = vadd.f32 %v805_v1, %v338_v16  ;;  %v362_v38 = vadd.f32 %v805_v1, %v340_v27  ;;  %v364_v49 = vadd.f32 %v805_v1, %v342_v39 }
  0x85   : > { %v357_v32 = vadd.f32 %v805_v1, %v335_v17 }
  0x87   : > { %450 = vrot.lane.b32.xlu0 %v412_v23, %s749_s9  ;;  %444 = vrot.lane.b32.xlu1 %v409_v24, %s749_s9  ;;  %v315_v23 = vld [vmem:[%s873_s12 + $0x38] sm:$0xff] }
  0x88   : > { %v337_v28 = vmul.f32 %v799_v0, %v315_v23 }
  0x8b   : > { %454 = vrot.lane.b32.xlu0 %v414_v29, %s749_s9  ;;  %448 = vrot.lane.b32.xlu1 %v411_v30, %s749_s9 }
  0x8f   : > { %458 = vrot.lane.b32.xlu0 %v416_v35, %s749_s9  ;;  %452 = vrot.lane.b32.xlu1 %v413_v36, %s749_s9  ;;  %v317_v35 = vld [vmem:[%s873_s12 + $0x48] sm:$0xff] }
  0x90   : > { %v339_v43 = vmul.f32 %v799_v0, %v317_v35 }
  0x92   : > { %v361_v53 = vadd.f32 %v805_v1, %v339_v43 }
  0x93   : > { %462 = vrot.lane.b32.xlu0 %v418_v41, %s749_s9  ;;  %456 = vrot.lane.b32.xlu1 %v415_v42, %s749_s9  ;;  %v359_v42 = vadd.f32 %v805_v1, %v337_v28 }
  0x97   : > { %466 = vrot.lane.b32.xlu0 %v420_v46, %s749_s9  ;;  %460 = vrot.lane.b32.xlu1 %v417_v47, %s749_s9  ;;  %v319_v46 = vld [vmem:[%s873_s12 + $0x58] sm:$0xff] }
  0x98   : > { %v341_v54 = vmul.f32 %v799_v0, %v319_v46 }
  0x9b   : > { %464 = vrot.lane.b32.xlu1 %v419_v50, %s749_s9  ;;  %v344_v50 = vmul.f32 %v799_v0, %v322_v44 }
  0x9d   : > { %v366_v59 = vadd.f32 %v805_v1, %v344_v50 }
  0x9f   : > { %468 = vrot.lane.b32.xlu1 %v421_v52, %s749_s9 }
  0xf1   : > { %v443_v3 = vpop.permute.xlu0 %442  ;;  %v439_v4 = vpop.permute.xlu1 %438 }
  0xf2   : > { %v489_v8 = vsel %vm486_vm1, %v354_v61, %v443_v3  ;;  %v487_v9 = vsel %vm486_vm1, %v352_v62, %v439_v4  ;;  %v363_v62 = vadd.f32 %v805_v1, %v341_v54  ;;  %v323_v3 = vld [vmem:[%s873_s12 + $0x78] sm:$0xff] }
  0xf3   : > { %506 = vst.msk [vmem:[%s891_s15 + $0x10] sm:$0xff] %vm503_vm2, %v489_v8  ;;  %504 = vst.msk [vmem:[%s891_s15] sm:$0xff] %vm503_vm2, %v487_v9  ;;  %v345_v10 = vmul.f32 %v799_v0, %v323_v3 }
  0xf5   : > { %v447_v14 = vpop.permute.xlu0 %446  ;;  %v441_v15 = vpop.permute.xlu1 %440 }
  0xf6   : > { %v491_v18 = vsel %vm486_vm1, %v356_v6, %v447_v14  ;;  %v488_v19 = vsel %vm486_vm1, %v353_v7, %v441_v15  ;;  %v367_v14 = vadd.f32 %v805_v1, %v345_v10 }
  0xf7   : > { %508 = vst.msk [vmem:[%s891_s15 + $0x20] sm:$0xff] %vm503_vm2, %v491_v18  ;;  %505 = vst.msk [vmem:[%s891_s15 + $0x8] sm:$0xff] %vm503_vm2, %v488_v19  ;;  %v521_v24 = vpack.c.bf16 %v488_v19, %v487_v9  ;;  %v365_v9 = vadd.f32 %v805_v1, %v343_v63 }
  0xf9   : > { %v451_v25 = vpop.permute.xlu0 %450  ;;  %v445_v26 = vpop.permute.xlu1 %444  ;;  %708 = vmatpush3.bf16.msra.mxu0 %v521_v24 }
  0xfa   : > { %v493_v29 = vsel %vm486_vm1, %v358_v20, %v451_v25  ;;  %v490_v30 = vsel %vm486_vm1, %v355_v21, %v445_v26  ;;  %709 = vmatprep.subr.bf16.mxu0 %v748_v5 }
  0xfb   : > { %510 = vst.msk [vmem:[%s891_s15 + $0x30] sm:$0xff] %vm503_vm2, %v493_v29  ;;  %507 = vst.msk [vmem:[%s891_s15 + $0x18] sm:$0xff] %vm503_vm2, %v490_v30  ;;  %v522_v34 = vpack.c.bf16 %v490_v30, %v489_v8 }
  0xfd   : > { %v455_v36 = vpop.permute.xlu0 %454  ;;  %v449_v37 = vpop.permute.xlu1 %448  ;;  %710 = vmatpush3.bf16.msra.mxu0 %v522_v34 }
  0xfe   : > { %v495_v40 = vsel %vm486_vm1, %v360_v31, %v455_v36  ;;  %v492_v41 = vsel %vm486_vm1, %v357_v32, %v449_v37  ;;  %711 = vmatprep.subr.bf16.mxu0 %v748_v5 }
  0xff   : > { %512 = vst.msk [vmem:[%s891_s15 + $0x40] sm:$0xff] %vm503_vm2, %v495_v40  ;;  %509 = vst.msk [vmem:[%s891_s15 + $0x28] sm:$0xff] %vm503_vm2, %v492_v41  ;;  %v523_v45 = vpack.c.bf16 %v492_v41, %v491_v18  ;;  %v520_v18 = vld [vmem:[%s294_s19] sm:$0xf] }
 0x101   : > { %v459_v47 = vpop.permute.xlu0 %458  ;;  %v453_v48 = vpop.permute.xlu1 %452  ;;  %712 = vmatpush3.bf16.msra.mxu0 %v523_v45 }
 0x102   : > { %v497_v51 = vsel %vm486_vm1, %v362_v38, %v459_v47  ;;  %v494_v52 = vsel %vm486_vm1, %v359_v42, %v453_v48  ;;  %713 = vmatprep.subr.bf16.mxu0 %v748_v5 }
 0x103   : > { %514 = vst.msk [vmem:[%s891_s15 + $0x50] sm:$0xff] %vm503_vm2, %v497_v51  ;;  %511 = vst.msk [vmem:[%s891_s15 + $0x38] sm:$0xff] %vm503_vm2, %v494_v52  ;;  %v524_v55 = vpack.c.bf16 %v494_v52, %v493_v29 }
 0x105   : > { %v463_v57 = vpop.permute.xlu0 %462  ;;  %v457_v58 = vpop.permute.xlu1 %456  ;;  %714 = vmatpush3.bf16.msra.mxu0 %v524_v55 }
 0x106   : > { %v499_v60 = vsel %vm486_vm1, %v364_v49, %v463_v57  ;;  %v496_v61 = vsel %vm486_vm1, %v361_v53, %v457_v58  ;;  %715 = vmatprep.subr.bf16.mxu0 %v748_v5 }
 0x107   : > { %516 = vst.msk [vmem:[%s891_s15 + $0x60] sm:$0xff] %vm503_vm2, %v499_v60  ;;  %513 = vst.msk [vmem:[%s891_s15 + $0x48] sm:$0xff] %vm503_vm2, %v496_v61  ;;  %v525_v2 = vpack.c.bf16 %v496_v61, %v495_v40 }
 0x109   : > { %v467_v4 = vpop.permute.xlu0 %466  ;;  %v461_v6 = vpop.permute.xlu1 %460  ;;  %716 = vmatpush3.bf16.msra.mxu0 %v525_v2 }
 0x10a   : > { %v501_v7 = vsel %vm486_vm1, %v366_v59, %v467_v4  ;;  %v498_v8 = vsel %vm486_vm1, %v363_v62, %v461_v6  ;;  %717 = vmatprep.subr.bf16.mxu0 %v748_v5 }
 0x10b   : > { %518 = vst.msk [vmem:[%s891_s15 + $0x70] sm:$0xff] %vm503_vm2, %v501_v7  ;;  %515 = vst.msk [vmem:[%s891_s15 + $0x58] sm:$0xff] %vm503_vm2, %v498_v8  ;;  %v526_v11 = vpack.c.bf16 %v498_v8, %v497_v51 }
 0x10d   : > { %v465_v12 = vpop.permute.xlu1 %464  ;;  %718 = vmatpush3.bf16.msra.mxu0 %v526_v11 }
 0x10e   : > { %v500_v13 = vsel %vm486_vm1, %v365_v9, %v465_v12  ;;  %719 = vmatprep.subr.bf16.mxu0 %v748_v5 }
 0x10f   : > { %517 = vst.msk [vmem:[%s891_s15 + $0x68] sm:$0xff] %vm503_vm2, %v500_v13  ;;  %v527_v15 = vpack.c.bf16 %v500_v13, %v499_v60 }
 0x111   : > { %v469_v0 = vpop.permute.xlu1 %468  ;;  %720 = vmatpush3.bf16.msra.mxu0 %v527_v15 }
 0x112   : > { %v502_v16 = vsel %vm486_vm1, %v367_v14, %v469_v0  ;;  %721 = vmatprep.subr.bf16.mxu0 %v748_v5 }
 0x113   : > { %519 = vst.msk [vmem:[%s891_s15 + $0x78] sm:$0xff] %vm503_vm2, %v502_v16  ;;  %v528_v17 = vpack.c.bf16 %v502_v16, %v501_v7 }
 0x115   : > { %722 = vmatpush3.bf16.msra.mxu0 %v528_v17 }
 0x118   : > { %724 = vmatmul.mubr.bf16.vlgmr.msra.gmra.mrb[0].mxu0 %v520_v18 }
 0x1eb   : > { %v563_v1 = vpop.f32.mrb[0].mxu0 }
 0x1ec   : > { %569 = vst.msk [vmem:[%s304_s25] sm:$0xff] %vm503_vm2, %v563_v1  ;;  %v725_v19 = vpop.f32.mrb[1].mxu0 }
 0x1ed   : > { %v566_v5 = vpop.f32.mrb[2].mxu0 }
 0x1ee   : > { %v726_v20 = vpop.f32.mrb[3].mxu0 }
 0x1ef PF: > { %s17_s21 = sadd.s32 1, %s745_s21  }
 0x1f0   : > { %p14_p5 = scmp.ge.s32.totalorder %s17_s21, 4  }
 0x1f2   :  { %16 = sbr.rel (!%p14_p5) target bundleno = 1 (0x1), region = 88 }

// kernel: gcn_forward.3
= control target key start
LH: loop header
LB: loop body
LE: loop exit
PB: predicated region body
PF: predicated region fallthrough
CT: control target
= control target key end

     0   :  { %s2301_s0 = inlined_call_operand.vmem [shape: s8[256,256], index: 0, kind: input, shape index: {}]   ;;  %s2302_s1 = inlined_call_operand.vmem [shape: f32[256,16], index: 1, kind: input, shape index: {}]   ;;  %s2303_s2 = inlined_call_operand.vmem [shape: f32[256,1], index: 2, kind: input, shape index: {}]   ;;  %s2304_s3 = inlined_call_operand.vmem [shape: f32[16,32], index: 3, kind: input, shape index: {}]   ;;  %s2305_s4 = inlined_call_operand.vmem [shape: f32[1,32], index: 4, kind: input, shape index: {}]   ;;  %s2306_s5 = inlined_call_operand.vmem [shape: f32[1,32], index: 5, kind: input, shape index: {}]   ;;  %s2307_s6 = inlined_call_operand.vmem [shape: f32[32,32], index: 6, kind: input, shape index: {}]   ;;  %s2308_s7 = inlined_call_operand.vmem [shape: f32[1,32], index: 7, kind: input, shape index: {}]   ;;  %s2309_s8 = inlined_call_operand.vmem [shape: f32[256,32], index: 8, kind: output, shape index: {0}]   ;;  %s2310_s9 = inlined_call_operand.vmem [shape: f32[2,2,32], index: 9, kind: output, shape index: {1}]  }
   0x1   :  { %2313 = sst [smem:[#allocation6_spill]] %s2301_s0 }
   0x2   :  { %s1913_s30 = smov 0   ;;  %s1915_s10 = smov 0  }
   0x3   :  { %s1917_s11 = smov 0   ;;  %s1919_s12 = smov 0  }
   0x4   :  { %s1921_s13 = smov 0   ;;  %s1923_s14 = smov 0  }
   0x5   :  { %s1925_s15 = smov 0  }
   0x6 LB: > { %s29_s16 = sadd.s32 1, %s1851_s13  ;;  %s32_s17 = sadd.s32 1, %s1855_s14  ;;  %s1859_s15 = sphi %s1925_s15, %s20_s15   ;;  %s1855_s14 = sphi %s1923_s14, %s2324_s14   ;;  %s1851_s13 = sphi %s1921_s13, %s2323_s13   ;;  %s1847_s12 = sphi %s1919_s12, %s2322_s12   ;;  %s1843_s11 = sphi %s1917_s11, %s2321_s11   ;;  %s1839_s10 = sphi %s1915_s10, %s2320_s10   ;;  %s1835_s30 = sphi %s1913_s30, %s2319_s30  }
   0x7   : > { %p30_p0 = scmp.ge.s32.totalorder %s29_s16, 2  ;;  %p48_p1 = scmp.ne.s32.totalorder %s1839_s10, %s1835_s30 }
   0x8   : > { %p49_p2 = scmp.eq.s32.totalorder %s1859_s15, 0  ;;  %s41_s21 = sadd.s32 1, %s1839_s10 }
   0x9   : > { %s2326_s16 = smov (%p30_p0, %s29_s16), 0  ;;  %s2328_s17 = smov (!%p30_p0, %s32_s17), %s1855_s14 }
   0xa   : > { %2314 = sst [smem:[#allocation4_spill]] %s2326_s16  ;;  %p50_p3 = por %p49_p2, %p48_p1 }
   0xb   : > { %p34_p4 = scmp.ge.s32.totalorder %s2328_s17, 2  ;;  %s37_s18 = ssub.s32 %s1851_s13, %s2326_s16 }
   0xc   : > { %p1517_p6 = scmp.ge.s32.totalorder %s1859_s15, 4 }
   0xd   : > { %s2330_s17 = smov (%p34_p4, %s2328_s17), 0 }
   0xe   : > { %2315 = sst [smem:[#allocation5_spill]] %s2330_s17  ;;  %s36_s19 = ssub.s32 %s1855_s14, %s2330_s17 }
   0xf   : > { %s38_s20 = sor.u32 %s37_s18, %s36_s19  ;;  %296 = sbr.rel (%p1517_p6) target bundleno = 34 (0x22), region = 40 }
  0x10   : > { %p39_p5 = scmp.eq.s32.totalorder %s38_s20, 0 }
  0x12   : > { %s1964_s22 = scalar_select %p39_p5, %s1839_s10, %s41_s21  }
  0x16   : > { %299 = sbr.rel (!%p50_p3) target bundleno = 34 (0x22), region = 44  ;;  %s301_s23 = sand.u32 (%p50_p3), 1, %s1839_s10  }
  0x17   : > { %s1570_s24 = sshll.u32 (%p50_p3), %s1855_s14, 3  ;;  %s1518_s25 = sshll.u32 (%p50_p3), %s301_s23, 5 }
  0x18   : > { %s306_s26 = sadd.s32 (%p50_p3), %s1851_s13, %s1570_s24  ;;  %s2316_s0 = sld [smem:[#allocation6_spill]] (%p50_p3) }
  0x19   : > { %s1521_s27 = sshll.u32 (%p50_p3), %s306_s26, 3  ;;  %s303_s19 = scalar_lea.vmem (%p50_p3), [#allocation3], %s1518_s25 }
  0x1e   : > { %s308_s18 = scalar_lea.vmem %s2316_s0, %s1521_s27 }
  0x1f   : > { %v342_v0 = vld [vmem:[%s308_s18] sm:$0xff]  ;;  %v344_v1 = vld [vmem:[%s308_s18 + $0x10] sm:$0xff] }
  0x20   : > { %v346_v2 = vld [vmem:[%s308_s18 + $0x20] sm:$0xff]  ;;  %343 = vst [vmem:[%s303_s19] sm:$0xff] %v342_v0  ;;  %345 = vst [vmem:[%s303_s19 + $0x8] sm:$0xff] %v344_v1  ;;  %v348_v3 = vld [vmem:[%s308_s18 + $0x30] sm:$0xff] }
  0x21   : > { %347 = vst [vmem:[%s303_s19 + $0x10] sm:$0xff] %v346_v2  ;;  %349 = vst [vmem:[%s303_s19 + $0x18] sm:$0xff] %v348_v3 }
  0x22 PF: > { %p1522_p7 = scmp.ge.s32.totalorder %s1859_s15, 1  ;;  %p363_p8 = scmp.lt.s32.totalorder %s1859_s15, 5 }
  0x24   : > { %p364_p9 = pnand %p1522_p7, %p363_p8 }
  0x25   : > { %s370_s20 = sand.u32 (!%p364_p9), 1, %s1835_s30   ;;  %s1524_s21 = sshll.u32 (!%p364_p9), %s1847_s12, 4 }
  0x26   : > { %367 = sbr.rel (%p364_p9) target bundleno = 806 (0x326), region = 86  ;;  %s1523_s23 = sshll.u32 (!%p364_p9), %s370_s20, 5 }
  0x27   : > { %p416_p10 = scmp.lt.s32.totalorder (!%p364_p9), %s1524_s21, 31  ;;  %p427_p11 = scmp.lt.s32.totalorder (!%p364_p9), %s1847_s12, 1 }
  0x28   : > { %s1994_s16 = scalar_lea.vmem (!%p364_p9), [#allocation3], %s1523_s23  ;;  %p1529_p12 = scmp.ne.s32.totalorder (!%p364_p9), %s1843_s11, 0 }
  0x2d   : > { %s2332_s21 = smov (!%p416_p10, %s1524_s21), 31  ;;  %435 = sbr.rel (%p1529_p12) target bundleno = 56 (0x38), region = 94 }
  0x2e   : > { %s428_s24 = scalar_select %p427_p11, %s1847_s12, 1 }
  0x2f   : > { %s1525_s25 = sshll.u32 %s2332_s21, 3  ;;  %vm436_vm0 = vcmask (!%p1529_p12), 130048   ;;  %v1861_v4 = vmov (!%p1529_p12), 0.0  }
  0x30   : > { %s1982_s28 = scalar_lea.vmem %s2303_s2, %s1525_s25  ;;  %s1987_s19 = scalar_lea.vmem %s2309_s8, %s1525_s25  ;;  %437 = vst.msk [vmem:[#allocation2] sm:$0xff] (!%p1529_p12), %vm436_vm0, %v1861_v4  ;;  %438 = vst.msk [vmem:[#allocation2 + $0x8] sm:$0xff] (!%p1529_p12), %vm436_vm0, %v1861_v4 }
  0x31   : > { %s1528_s0 = sshll.u32 %s428_s24, 1  ;;  %439 = vst.msk [vmem:[#allocation2 + $0x10] sm:$0xff] (!%p1529_p12), %vm436_vm0, %v1861_v4  ;;  %440 = vst.msk [vmem:[#allocation2 + $0x18] sm:$0xff] (!%p1529_p12), %vm436_vm0, %v1861_v4 }
  0x32   : > { %s1992_s20 = scalar_lea.vmem %s2310_s9, %s1528_s0  ;;  %441 = vst.msk [vmem:[#allocation2 + $0x20] sm:$0xff] (!%p1529_p12), %vm436_vm0, %v1861_v4  ;;  %442 = vst.msk [vmem:[#allocation2 + $0x28] sm:$0xff] (!%p1529_p12), %vm436_vm0, %v1861_v4 }
  0x33   : > { %443 = vst.msk [vmem:[#allocation2 + $0x30] sm:$0xff] (!%p1529_p12), %vm436_vm0, %v1861_v4  ;;  %444 = vst.msk [vmem:[#allocation2 + $0x38] sm:$0xff] (!%p1529_p12), %vm436_vm0, %v1861_v4 }
  0x34   : > { %445 = vst.msk [vmem:[#allocation2 + $0x40] sm:$0xff] %vm436_vm0, %v1861_v4  ;;  %446 = vst.msk [vmem:[#allocation2 + $0x48] sm:$0xff] %vm436_vm0, %v1861_v4 }
  0x35   : > { %447 = vst.msk [vmem:[#allocation2 + $0x50] sm:$0xff] %vm436_vm0, %v1861_v4  ;;  %448 = vst.msk [vmem:[#allocation2 + $0x58] sm:$0xff] %vm436_vm0, %v1861_v4 }
  0x36   : > { %449 = vst.msk [vmem:[#allocation2 + $0x60] sm:$0xff] %vm436_vm0, %v1861_v4  ;;  %450 = vst.msk [vmem:[#allocation2 + $0x68] sm:$0xff] %vm436_vm0, %v1861_v4 }
  0x37   : > { %451 = vst.msk [vmem:[#allocation2 + $0x70] sm:$0xff] %vm436_vm0, %v1861_v4  ;;  %452 = vst.msk [vmem:[#allocation2 + $0x78] sm:$0xff] %vm436_vm0, %v1861_v4 }
  0x38 PF: > { %s1530_s0 = sshll.u32 %s1843_s11, 7  ;;  %v2015_v5 = vld [vmem:[%s1994_s16] sm:$0xff]  ;;  %v2018_v6 = vld [vmem:[%s1994_s16 + $0x10] sm:$0xff]  ;;  %v455_v33 = vld [vmem:[%s1994_s16 + $0x8] sm:$0xff]  ;;  %vm620_vm1 = vcmask 130048   ;;  %p1531_p13 = scmp.ne.s32.totalorder %s1843_s11, 1 }
  0x39   : > { %s2023_s23 = scalar_lea.vmem %s2302_s1, %s1530_s0  ;;  %v458_v7 = vunpack.c.l.s8.bf16 %v2015_v5  ;;  %v462_v8 = vunpack.c.l.s8.bf16 %v2018_v6  ;;  %v457_v34 = vld [vmem:[%s1994_s16 + $0x18] sm:$0xff]  ;;  %v459_v35 = vunpack.c.h.s8.bf16 %v2015_v5  ;;  %v463_v36 = vunpack.c.h.s8.bf16 %v2018_v6  ;;  %s1532_s27 = sshll.u32 (!%p1531_p13), %s1847_s12, 7 }
  0x3a   : > { %v467_v9 = vld [vmem:[%s2023_s23] sm:$0xff]  ;;  %v468_v10 = vld [vmem:[%s2023_s23 + $0x8] sm:$0xff]  ;;  %v469_v11 = vld [vmem:[%s2023_s23 + $0x10] sm:$0xff]  ;;  %v460_v37 = vunpack.c.l.s8.bf16 %v455_v33  ;;  %v464_v38 = vunpack.c.l.s8.bf16 %v457_v34  ;;  %v461_v39 = vunpack.c.h.s8.bf16 %v455_v33  ;;  %v465_v40 = vunpack.c.h.s8.bf16 %v457_v34  ;;  %s2074_s30 = scalar_lea.vmem (!%p1531_p13), %s2302_s1, %s1532_s27 }
  0x3b   : > { %v483_v12 = vpack.c.bf16 %v468_v10, %v467_v9  ;;  %v470_v13 = vld [vmem:[%s2023_s23 + $0x18] sm:$0xff]  ;;  %1641 = vmatprep.mubr.bf16.mxu0 %v458_v7  ;;  %1649 = vmatprep.mubr.bf16.mxu1 %v462_v8  ;;  %v471_v15 = vld [vmem:[%s2023_s23 + $0x20] sm:$0xff]  ;;  %v472_v16 = vld [vmem:[%s2023_s23 + $0x28] sm:$0xff]  ;;  %vm1071_vm2 = vcmask (!%p1531_p13), 261120   ;;  %vm1387_vm3 = vcmask (!%p1531_p13), 1040384   ;;  %vm1389_vm4 = vcmask (!%p1531_p13), 254976  }
  0x3c   : > { %v484_v14 = vpack.c.bf16 %v470_v13, %v469_v11  ;;  %v485_v17 = vpack.c.bf16 %v472_v16, %v471_v15  ;;  %v473_v18 = vld [vmem:[%s2023_s23 + $0x30] sm:$0xff]  ;;  %v474_v19 = vld [vmem:[%s2023_s23 + $0x38] sm:$0xff]  ;;  %v475_v21 = vld [vmem:[%s2023_s23 + $0x40] sm:$0xff] }
  0x3d   : > { %1625 = vmatprep.subr.bf16.mxu0 %v483_v12  ;;  %1729 = vmatprep.subr.bf16.mxu1 %v483_v12  ;;  %v486_v20 = vpack.c.bf16 %v474_v19, %v473_v18  ;;  %v476_v22 = vld [vmem:[%s2023_s23 + $0x48] sm:$0xff]  ;;  %v477_v24 = vld [vmem:[%s2023_s23 + $0x50] sm:$0xff]  ;;  %v478_v25 = vld [vmem:[%s2023_s23 + $0x58] sm:$0xff] }
  0x3e   : > { %1626 = vmatpush3.bf16.msra.mxu0 %v483_v12  ;;  %1737 = vmatpush3.bf16.msra.mxu1 %v483_v12  ;;  %v487_v23 = vpack.c.bf16 %v476_v22, %v475_v21  ;;  %v488_v26 = vpack.c.bf16 %v478_v25, %v477_v24  ;;  %v479_v27 = vld [vmem:[%s2023_s23 + $0x60] sm:$0xff]  ;;  %v480_v28 = vld [vmem:[%s2023_s23 + $0x68] sm:$0xff]  ;;  %v481_v30 = vld [vmem:[%s2023_s23 + $0x70] sm:$0xff] }
  0x3f   : > { %1627 = vmatprep.subr.bf16.mxu0 %v484_v14  ;;  %1730 = vmatprep.subr.bf16.mxu1 %v484_v14  ;;  %v489_v29 = vpack.c.bf16 %v480_v28, %v479_v27  ;;  %v482_v31 = vld [vmem:[%s2023_s23 + $0x78] sm:$0xff]  ;;  %v491_v43 = vld [vmem:[#allocation2] sm:$0xff]  ;;  %v494_v47 = vld [vmem:[#allocation2 + $0x18] sm:$0xff] }
  0x40   : > { %v490_v32 = vpack.c.bf16 %v482_v31, %v481_v30  ;;  %v493_v41 = vld [vmem:[#allocation2 + $0x10] sm:$0xff]  ;;  %v499_v44 = vld [vmem:[#allocation2 + $0x40] sm:$0xff]  ;;  %v502_v48 = vld [vmem:[#allocation2 + $0x58] sm:$0xff]  ;;  %v1862_v31 = vmov (!%p1531_p13), 0  }
  0x41   : > { %v501_v42 = vld [vmem:[#allocation2 + $0x50] sm:$0xff]  ;;  %v492_v53 = vld [vmem:[#allocation2 + $0x8] sm:$0xff]  ;;  %v495_v3 = vld [vmem:[#allocation2 + $0x20] sm:$0xff]  ;;  %1803 = vset.pattern.permute.xlu0 (!%p1531_p13), %v1862_v31  ;;  %1804 = vset.pattern.permute.xlu1 (!%p1531_p13), %v1862_v31 }
  0x42   : > { %1628 = vmatpush3.bf16.msra.mxu0 %v484_v14  ;;  %1738 = vmatpush3.bf16.msra.mxu1 %v484_v14  ;;  %v500_v54 = vld [vmem:[#allocation2 + $0x48] sm:$0xff]  ;;  %v497_v1 = vld [vmem:[#allocation2 + $0x30] sm:$0xff]  ;;  %v503_v4 = vld [vmem:[#allocation2 + $0x60] sm:$0xff] }
  0x43   : > { %1629 = vmatprep.subr.bf16.mxu0 %v485_v17  ;;  %1731 = vmatprep.subr.bf16.mxu1 %v485_v17  ;;  %v505_v2 = vld [vmem:[#allocation2 + $0x70] sm:$0xff]  ;;  %v498_v7 = vld [vmem:[#allocation2 + $0x38] sm:$0xff]  ;;  %v496_v13 = vld [vmem:[#allocation2 + $0x28] sm:$0xff] }
  0x44   : > { %v506_v8 = vld [vmem:[#allocation2 + $0x78] sm:$0xff]  ;;  %v504_v14 = vld [vmem:[#allocation2 + $0x68] sm:$0xff]  ;;  %v644_v33 = vld [vmem:[%s2074_s30 + $0x8] sm:$0xff] (!%p1531_p13) }
  0x45   : > { %v691_v25 = vld [vmem:[%s2304_s3] sm:$0xff] (!%p1531_p13)  ;;  %v645_v34 = vld [vmem:[%s2074_s30 + $0x10] sm:$0xff] (!%p1531_p13) }
  0x46   : > { %1630 = vmatpush3.bf16.msra.mxu0 %v485_v17  ;;  %1739 = vmatpush3.bf16.msra.mxu1 %v485_v17 }
  0x47   : > { %1631 = vmatprep.subr.bf16.mxu0 %v486_v20  ;;  %1732 = vmatprep.subr.bf16.mxu1 %v486_v20 }
  0x4a   : > { %1632 = vmatpush3.bf16.msra.mxu0 %v486_v20  ;;  %1740 = vmatpush3.bf16.msra.mxu1 %v486_v20 }
  0x4b   : > { %1633 = vmatprep.subr.bf16.mxu0 %v487_v23  ;;  %1733 = vmatprep.subr.bf16.mxu1 %v487_v23 }
  0x4e   : > { %1634 = vmatpush3.bf16.msra.mxu0 %v487_v23  ;;  %1741 = vmatpush3.bf16.msra.mxu1 %v487_v23 }
  0x4f   : > { %1635 = vmatprep.subr.bf16.mxu0 %v488_v26  ;;  %1734 = vmatprep.subr.bf16.mxu1 %v488_v26 }
  0x52   : > { %1636 = vmatpush3.bf16.msra.mxu0 %v488_v26  ;;  %1742 = vmatpush3.bf16.msra.mxu1 %v488_v26  ;;  %v692_v26 = vld [vmem:[%s2304_s3 + $0x8] sm:$0xff] (!%p1531_p13) }
  0x53   : > { %1637 = vmatprep.subr.bf16.mxu0 %v489_v29  ;;  %1735 = vmatprep.subr.bf16.mxu1 %v489_v29  ;;  %v1717_v28 = vpack.c.bf16 (!%p1531_p13), %v692_v26, %v691_v25 }
  0x56   : > { %1638 = vmatpush3.bf16.msra.mxu0 %v489_v29  ;;  %1743 = vmatpush3.bf16.msra.mxu1 %v489_v29 }
  0x57   : > { %1639 = vmatprep.subr.bf16.mxu0 %v490_v32  ;;  %1736 = vmatprep.subr.bf16.mxu1 %v490_v32 }
  0x5a   : > { %1640 = vmatpush3.bf16.msra.mxu0 %v490_v32  ;;  %1744 = vmatpush3.bf16.msra.mxu1 %v490_v32  ;;  %v643_v32 = vld [vmem:[%s2074_s30] sm:$0xff] (!%p1531_p13) }
  0x5b   : > { %1718 = vmatprep.subr.bf16.mxu0 (!%p1531_p13), %v1717_v28 }
  0x5d   : > { %1642 = vmatmul.mubr.bf16.vlgmr.msra.gmra.mrb[0].mxu0 %v459_v35  ;;  %1650 = vmatmul.mubr.bf16.vlgmr.msra.gmra.mrb[0].mxu1 %v463_v36 }
  0x5e   : > { %1645 = vmatprep.mubr.bf16.mxu0 %v460_v37  ;;  %1653 = vmatprep.mubr.bf16.mxu1 %v464_v38  ;;  %v646_v38 = vld [vmem:[%s2074_s30 + $0x18] sm:$0xff] (!%p1531_p13) }
  0x5f   : > { %1720 = vmatpush3.bf16.msra.mxu0 (!%p1531_p13), %v1717_v28 }
  0x65   : > { %1646 = vmatmul.mubr.bf16.gmra.mrb[4].mxu0 %v461_v39  ;;  %1654 = vmatmul.mubr.bf16.gmra.mrb[4].mxu1 %v465_v40  ;;  %v647_v40 = vld [vmem:[%s2074_s30 + $0x20] sm:$0xff] (!%p1531_p13) }
 0x130   : > { %v1643_v45 = vpop.f32.mrb[0].mxu0  ;;  %v1651_v46 = vpop.f32.mrb[0].mxu1 }
 0x131   : > { %v606_v49 = vadd.f32 %v1643_v45, %v493_v41  ;;  %v614_v50 = vadd.f32 %v1651_v46, %v501_v42  ;;  %v541_v51 = vpop.f32.mrb[1].mxu0  ;;  %v573_v52 = vpop.f32.mrb[1].mxu1  ;;  %v649_v46 = vld [vmem:[%s2074_s30 + $0x30] sm:$0xff] (!%p1531_p13) }
 0x132   : > { %v604_v55 = vadd.f32 %v541_v51, %v491_v43  ;;  %v612_v56 = vadd.f32 %v573_v52, %v499_v44  ;;  %v1644_v57 = vpop.f32.mrb[2].mxu0  ;;  %v1652_v58 = vpop.f32.mrb[2].mxu1  ;;  %v648_v44 = vld [vmem:[%s2074_s30 + $0x28] sm:$0xff] (!%p1531_p13)  ;;  %v895_v51 = vld [vmem:[%s1982_s28 + $0x10] sm:$0xff] (!%p1531_p13) }
 0x133   : > { %623 = vst.msk [vmem:[#allocation2 + $0x10] sm:$0xff] %vm620_vm1, %v606_v49  ;;  %631 = vst.msk [vmem:[#allocation2 + $0x50] sm:$0xff] %vm620_vm1, %v614_v50  ;;  %v607_v59 = vadd.f32 %v1644_v57, %v494_v47  ;;  %v615_v60 = vadd.f32 %v1652_v58, %v502_v48  ;;  %v544_v61 = vpop.f32.mrb[3].mxu0  ;;  %v576_v62 = vpop.f32.mrb[3].mxu1  ;;  %v650_v49 = vld [vmem:[%s2074_s30 + $0x38] sm:$0xff] (!%p1531_p13)  ;;  %v893_v50 = vld [vmem:[%s1982_s28] sm:$0xff] (!%p1531_p13) }
 0x134   : > { %621 = vst.msk [vmem:[#allocation2] sm:$0xff] %vm620_vm1, %v604_v55  ;;  %629 = vst.msk [vmem:[#allocation2 + $0x40] sm:$0xff] %vm620_vm1, %v612_v56  ;;  %v605_v63 = vadd.f32 %v544_v61, %v492_v53  ;;  %v613_v0 = vadd.f32 %v576_v62, %v500_v54  ;;  %v909_v54 = vadd.f32 (!%p1531_p13), 1.0, %v893_v50  ;;  %v911_v55 = vadd.f32 (!%p1531_p13), 1.0, %v895_v51  ;;  %v894_v56 = vld [vmem:[%s1982_s28 + $0x8] sm:$0xff] (!%p1531_p13)  ;;  %v896_v57 = vld [vmem:[%s1982_s28 + $0x18] sm:$0xff] (!%p1531_p13) }
 0x135   : > { %624 = vst.msk [vmem:[#allocation2 + $0x18] sm:$0xff] %vm620_vm1, %v607_v59  ;;  %632 = vst.msk [vmem:[#allocation2 + $0x58] sm:$0xff] %vm620_vm1, %v615_v60  ;;  %v651_v58 = vld [vmem:[%s2074_s30 + $0x40] sm:$0xff] (!%p1531_p13)  ;;  %v910_v60 = vadd.f32 (!%p1531_p13), 1.0, %v894_v56  ;;  %v912_v61 = vadd.f32 (!%p1531_p13), 1.0, %v896_v57 }
 0x136   : > { %622 = vst.msk [vmem:[#allocation2 + $0x8] sm:$0xff] %vm620_vm1, %v605_v63  ;;  %630 = vst.msk [vmem:[#allocation2 + $0x48] sm:$0xff] %vm620_vm1, %v613_v0  ;;  %928 = vperm.xlu0 (!%p1531_p13), %1803, %v909_v54   ;;  %938 = vperm.xlu1 (!%p1531_p13), %1804, %v911_v55   ;;  %v897_v63 = vld [vmem:[%s1982_s28 + $0x20] sm:$0xff] (!%p1531_p13)  ;;  %v898_v0 = vld [vmem:[%s1982_s28 + $0x28] sm:$0xff] (!%p1531_p13) }
 0x137   : > { %v2139_v57 = vld [vmem:[%s2306_s5] ss:$0 sm:$0xff] (!%p1531_p13) }
 0x138   : > { %v1647_v5 = vpop.f32.mrb[4].mxu0  ;;  %v1655_v6 = vpop.f32.mrb[4].mxu1  ;;  %640 = sbr.rel (%p1531_p13) target bundleno = 806 (0x326), region = 98 }
 0x139   : > { %v610_v9 = vadd.f32 %v1647_v5, %v497_v1  ;;  %v618_v10 = vadd.f32 %v1655_v6, %v505_v2  ;;  %v557_v11 = vpop.f32.mrb[5].mxu0  ;;  %v589_v12 = vpop.f32.mrb[5].mxu1  ;;  %v652_v2 = vld [vmem:[%s2074_s30 + $0x48] sm:$0xff] (!%p1531_p13)  ;;  %v913_v6 = vadd.f32 (!%p1531_p13), 1.0, %v897_v63 }
 0x13a   : > { %v608_v15 = vadd.f32 %v557_v11, %v495_v3  ;;  %v616_v16 = vadd.f32 %v589_v12, %v503_v4  ;;  %v1648_v17 = vpop.f32.mrb[6].mxu0  ;;  %v1656_v18 = vpop.f32.mrb[6].mxu1  ;;  %v661_v30 = vld [vmem:[#allocation2 + $0x10] sm:$0xff] (!%p1531_p13)  ;;  %v653_v4 = vld [vmem:[%s2074_s30 + $0x50] sm:$0xff] (!%p1531_p13)  ;;  %933 = vperm.xlu0 (!%p1531_p13), %1803, %v910_v60   ;;  %943 = vperm.xlu1 (!%p1531_p13), %1804, %v912_v61  }
 0x13b   : > { %627 = vst.msk [vmem:[#allocation2 + $0x30] sm:$0xff] %vm620_vm1, %v610_v9  ;;  %635 = vst.msk [vmem:[#allocation2 + $0x70] sm:$0xff] %vm620_vm1, %v618_v10  ;;  %v611_v19 = vadd.f32 %v1648_v17, %v498_v7  ;;  %v619_v20 = vadd.f32 %v1656_v18, %v506_v8  ;;  %v560_v21 = vpop.f32.mrb[7].mxu0  ;;  %v592_v22 = vpop.f32.mrb[7].mxu1  ;;  %v659_v27 = vld [vmem:[#allocation2] sm:$0xff] (!%p1531_p13)  ;;  %v677_v37 = vadd.f32 (!%p1531_p13), %v661_v30, %v645_v34  ;;  %v669_v5 = vld [vmem:[#allocation2 + $0x50] sm:$0xff] (!%p1531_p13) }
 0x13c   : > { %625 = vst.msk [vmem:[#allocation2 + $0x20] sm:$0xff] %vm620_vm1, %v608_v15  ;;  %633 = vst.msk [vmem:[#allocation2 + $0x60] sm:$0xff] %vm620_vm1, %v616_v16  ;;  %v609_v23 = vadd.f32 %v560_v21, %v496_v13  ;;  %v617_v24 = vadd.f32 %v592_v22, %v504_v14  ;;  %v675_v35 = vadd.f32 (!%p1531_p13), %v659_v27, %v643_v32  ;;  %v662_v39 = vld [vmem:[#allocation2 + $0x18] sm:$0xff] (!%p1531_p13)  ;;  %v667_v59 = vld [vmem:[#allocation2 + $0x40] sm:$0xff] (!%p1531_p13)  ;;  %v914_v7 = vadd.f32 (!%p1531_p13), 1.0, %v898_v0 }
 0x13d   : > { %628 = vst.msk [vmem:[#allocation2 + $0x38] sm:$0xff] %vm620_vm1, %v611_v19  ;;  %636 = vst.msk [vmem:[#allocation2 + $0x78] sm:$0xff] %vm620_vm1, %v619_v20  ;;  %v660_v29 = vld [vmem:[#allocation2 + $0x8] sm:$0xff] (!%p1531_p13)  ;;  %v678_v42 = vadd.f32 (!%p1531_p13), %v662_v39, %v646_v38  ;;  %v683_v1 = vadd.f32 (!%p1531_p13), %v667_v59, %v651_v58  ;;  %v900_v10 = vld [vmem:[%s1982_s28 + $0x38] sm:$0xff] (!%p1531_p13)  ;;  %v685_v11 = vadd.f32 (!%p1531_p13), %v669_v5, %v653_v4 }
 0x13e   : > { %626 = vst.msk [vmem:[#allocation2 + $0x28] sm:$0xff] %vm620_vm1, %v609_v23  ;;  %634 = vst.msk [vmem:[#allocation2 + $0x68] sm:$0xff] %vm620_vm1, %v617_v24  ;;  %v676_v36 = vadd.f32 (!%p1531_p13), %v660_v29, %v644_v33  ;;  %1661 = vmatprep.mubr.msk.f32.mxu0 (!%p1531_p13), %vm620_vm1, %v675_v35  ;;  %v668_v3 = vld [vmem:[#allocation2 + $0x48] sm:$0xff] (!%p1531_p13)  ;;  %v654_v12 = vld [vmem:[%s2074_s30 + $0x58] sm:$0xff] (!%p1531_p13)  ;;  %948 = vperm.xlu0 (!%p1531_p13), %1803, %v913_v6   ;;  %v916_v17 = vadd.f32 (!%p1531_p13), 1.0, %v900_v10 }
 0x13f   : > { %v684_v8 = vadd.f32 %v668_v3, %v652_v2  ;;  %v899_v9 = vld [vmem:[%s1982_s28 + $0x30] sm:$0xff]  ;;  %v670_v13 = vld [vmem:[#allocation2 + $0x58] sm:$0xff]  ;;  %953 = vperm.xlu1 %1804, %v914_v7   ;;  %v902_v20 = vld [vmem:[%s1982_s28 + $0x48] sm:$0xff] }
 0x140   : > { %1662 = vmatmul.mubr.msk.f32.vlgmr.msra.gmra.mrb[0].mxu0 %vm620_vm1, %v676_v36  ;;  %v655_v14 = vld [vmem:[%s2074_s30 + $0x60] sm:$0xff]  ;;  %v915_v16 = vadd.f32 1.0, %v899_v9  ;;  %v686_v18 = vadd.f32 %v670_v13, %v654_v12  ;;  %v656_v22 = vld [vmem:[%s2074_s30 + $0x68] sm:$0xff]  ;;  %v657_v24 = vld [vmem:[%s2074_s30 + $0x70] sm:$0xff]  ;;  %v918_v27 = vadd.f32 1.0, %v902_v20 }
 0x141   : > { %1664 = vmatprep.mubr.msk.f32.mxu0 %vm620_vm1, %v677_v37  ;;  %v901_v19 = vld [vmem:[%s1982_s28 + $0x40] sm:$0xff]  ;;  %v903_v29 = vld [vmem:[%s1982_s28 + $0x50] sm:$0xff]  ;;  %v904_v30 = vld [vmem:[%s1982_s28 + $0x58] sm:$0xff] }
 0x142   : > { %v665_v47 = vld [vmem:[#allocation2 + $0x30] sm:$0xff]  ;;  %958 = vperm.xlu0 %1803, %v915_v16   ;;  %v917_v26 = vadd.f32 1.0, %v901_v19  ;;  %v919_v34 = vadd.f32 1.0, %v903_v29  ;;  %v920_v35 = vadd.f32 1.0, %v904_v30  ;;  %v905_v37 = vld [vmem:[%s1982_s28 + $0x60] sm:$0xff]  ;;  %v906_v38 = vld [vmem:[%s1982_s28 + $0x68] sm:$0xff] }
 0x143   : > { %v663_v41 = vld [vmem:[#allocation2 + $0x20] sm:$0xff]  ;;  %v681_v52 = vadd.f32 %v665_v47, %v649_v46  ;;  %v673_v25 = vld [vmem:[#allocation2 + $0x70] sm:$0xff]  ;;  %963 = vperm.xlu1 %1804, %v916_v17   ;;  %v921_v39 = vadd.f32 1.0, %v905_v37  ;;  %v2144_v58 = vld [vmem:[%s2305_s4] ss:$0 sm:$0xff] }
 0x144   : > { %v679_v43 = vadd.f32 %v663_v41, %v647_v40  ;;  %1665 = vmatmul.mubr.msk.f32.gmra.mrb[2].mxu0 %vm620_vm1, %v678_v42  ;;  %v666_v53 = vld [vmem:[#allocation2 + $0x38] sm:$0xff]  ;;  %v671_v15 = vld [vmem:[#allocation2 + $0x60] sm:$0xff]  ;;  %v689_v31 = vadd.f32 %v673_v25, %v657_v24  ;;  %v658_v32 = vld [vmem:[%s2074_s30 + $0x78] sm:$0xff]  ;;  %v922_v40 = vadd.f32 1.0, %v906_v38 }
 0x145   : > { %v664_v45 = vld [vmem:[#allocation2 + $0x28] sm:$0xff]  ;;  %v682_v62 = vadd.f32 %v666_v53, %v650_v49  ;;  %v687_v21 = vadd.f32 %v671_v15, %v655_v14  ;;  %v674_v33 = vld [vmem:[#allocation2 + $0x78] sm:$0xff]  ;;  %v908_v42 = vld [vmem:[%s1982_s28 + $0x78] sm:$0xff] }
 0x146   : > { %v680_v48 = vadd.f32 %v664_v45, %v648_v44  ;;  %1667 = vmatprep.mubr.msk.f32.mxu0 %vm620_vm1, %v679_v43  ;;  %v672_v23 = vld [vmem:[#allocation2 + $0x68] sm:$0xff]  ;;  %968 = vperm.xlu0 %1803, %v917_v26   ;;  %v690_v36 = vadd.f32 %v674_v33, %v658_v32  ;;  %v924_v44 = vadd.f32 1.0, %v908_v42  ;;  %v1060_v45 = vld [vmem:[%s2307_s6] sm:$0xff]  ;;  %v1061_v46 = vld [vmem:[%s2307_s6 + $0x8] sm:$0xff] }
 0x147   : > { %v688_v28 = vadd.f32 %v672_v23, %v656_v22  ;;  %973 = vperm.xlu1 %1804, %v918_v27   ;;  %v907_v41 = vld [vmem:[%s1982_s28 + $0x70] sm:$0xff]  ;;  %v1721_v47 = vpack.c.bf16 %v1061_v46, %v1060_v45  ;;  %v1063_v49 = vld [vmem:[%s2307_s6 + $0x18] sm:$0xff] }
 0x148   : > { %1668 = vmatmul.mubr.msk.f32.gmra.mrb[4].mxu0 %vm620_vm1, %v680_v48  ;;  %v923_v43 = vadd.f32 1.0, %v907_v41  ;;  %v1062_v48 = vld [vmem:[%s2307_s6 + $0x10] sm:$0xff] }
 0x149   : > { %1670 = vmatprep.mubr.msk.f32.mxu0 %vm620_vm1, %v681_v52  ;;  %1722 = vmatprep.subr.bf16.mxu1 %v1721_v47  ;;  %v1725_v50 = vpack.c.bf16 %v1063_v49, %v1062_v48 }
 0x14a   : > { %978 = vperm.xlu0 %1803, %v919_v34   ;;  %1724 = vmatpush3.bf16.msra.mxu1 %v1721_v47 }
 0x14b   : > { %983 = vperm.xlu1 %1804, %v920_v35   ;;  %1726 = vmatprep.subr.bf16.mxu1 %v1725_v50 }
 0x14c   : > { %1671 = vmatmul.mubr.msk.f32.gmra.mrb[6].mxu0 %vm620_vm1, %v682_v62 }
 0x14d   : > { %1673 = vmatprep.mubr.msk.f32.mxu0 %vm620_vm1, %v683_v1 }
 0x14e   : > { %988 = vperm.xlu0 %1803, %v921_v39   ;;  %1728 = vmatpush3.bf16.msra.mxu1 %v1725_v50 }
 0x14f   : > { %993 = vperm.xlu1 %1804, %v922_v40  }
 0x150   : > { %1674 = vmatmul.mubr.msk.f32.gmra.mrb[8].mxu0 %vm620_vm1, %v684_v8 }
 0x151   : > { %1676 = vmatprep.mubr.msk.f32.mxu0 %vm620_vm1, %v685_v11 }
 0x152   : > { %998 = vperm.xlu0 %1803, %v923_v43  }
 0x153   : > { %1003 = vperm.xlu1 %1804, %v924_v44  }
 0x154   : > { %1677 = vmatmul.mubr.msk.f32.gmra.mrb[10].mxu0 %vm620_vm1, %v686_v18 }
 0x155   : > { %1679 = vmatprep.mubr.msk.f32.mxu0 %vm620_vm1, %v687_v21 }
 0x158   : > { %1680 = vmatmul.mubr.msk.f32.gmra.mrb[12].mxu0 %vm620_vm1, %v688_v28 }
 0x159   : > { %1682 = vmatprep.mubr.msk.f32.mxu0 %vm620_vm1, %v689_v31 }
 0x15c   : > { %1683 = vmatmul.mubr.msk.f32.gmra.mrb[14].mxu0 %vm620_vm1, %v690_v36 }
 0x1b5   : > { %v939_v51 = vpop.permute.xlu1 %938  ;;  %v929_v52 = vpop.permute.xlu0 %928 }
 0x1b6   : > { %v1012_v63 = vmul.f32 %v2139_v57, %v929_v52  ;;  %v1014_v9 = vmul.f32 %v2139_v57, %v939_v51 }
 0x1b9   : > { %v944_v53 = vpop.permute.xlu1 %943  ;;  %v934_v54 = vpop.permute.xlu0 %933 }
 0x1ba   : > { %v1013_v60 = vmul.f32 %v2139_v57, %v934_v54  ;;  %v1015_v6 = vmul.f32 %v2139_v57, %v944_v53 }
 0x1bd   : > { %v949_v56 = vpop.permute.xlu0 %948 }
 0x1be   : > { %v954_v55 = vpop.permute.xlu1 %953  ;;  %v1016_v21 = vmul.f32 %v2139_v57, %v949_v56 }
 0x1bf   : > { %v1017_v17 = vmul.f32 %v2139_v57, %v954_v55 }
 0x1c1   : > { %v959_v2 = vpop.permute.xlu0 %958 }
 0x1c2   : > { %v964_v0 = vpop.permute.xlu1 %963  ;;  %v1018_v31 = vmul.f32 %v2139_v57, %v959_v2 }
 0x1c3   : > { %v1019_v28 = vmul.f32 %v2139_v57, %v964_v0 }
 0x1c5   : > { %v969_v18 = vpop.permute.xlu0 %968 }
 0x1c6   : > { %v974_v14 = vpop.permute.xlu1 %973  ;;  %v1020_v43 = vmul.f32 %v2139_v57, %v969_v18 }
 0x1c7   : > { %v1021_v40 = vmul.f32 %v2139_v57, %v974_v14 }
 0x1c9   : > { %v979_v35 = vpop.permute.xlu0 %978 }
 0x1ca   : > { %v984_v32 = vpop.permute.xlu1 %983  ;;  %v1022_v55 = vmul.f32 %v2139_v57, %v979_v35 }
 0x1cb   : > { %v1023_v51 = vmul.f32 %v2139_v57, %v984_v32 }
 0x1cd   : > { %v989_v52 = vpop.permute.xlu0 %988 }
 0x1ce   : > { %v994_v48 = vpop.permute.xlu1 %993 }
 0x1cf   : > { %v1025_v0 = vmul.f32 %v2139_v57, %v994_v48 }
 0x213   : > { %v1663_v59 = vpop.f32.mrb[0].mxu0 }
 0x214   : > { %v820_v61 = vadd.f32 %v1663_v59, %v2144_v58  ;;  %v814_v62 = vpop.f32.mrb[1].mxu0 }
 0x215   : > { %v815_v1 = vadd.f32 %v2144_v58, %v814_v62 }
 0x216   : > { %v1029_v3 = vadd.f32 %v1013_v60, %v820_v61 }
 0x217   : > { %v1666_v4 = vpop.f32.mrb[2].mxu0  ;;  %v1028_v5 = vadd.f32 %v1012_v63, %v815_v1 }
 0x218   : > { %v830_v7 = vadd.f32 %v1666_v4, %v2144_v58  ;;  %v824_v8 = vpop.f32.mrb[3].mxu0  ;;  %v1045_v12 = vmax.f32 %v1029_v3, 0.0  ;;  %v1024_v3 = vmul.f32 %v2139_v57, %v989_v52  ;;  %v1004_v4 = vpop.permute.xlu1 %1003 }
 0x219   : > { %v825_v10 = vadd.f32 %v2144_v58, %v824_v8  ;;  %v1044_v11 = vmax.f32 %v1028_v5, 0.0 }
 0x21a   : > { %v1031_v13 = vadd.f32 %v1015_v6, %v830_v7  ;;  %v999_v7 = vpop.permute.xlu0 %998 }
 0x21b   : > { %v1030_v15 = vadd.f32 %v1014_v9, %v825_v10  ;;  %v1669_v16 = vpop.f32.mrb[4].mxu0  ;;  %1693 = vmatprep.mubr.msk.f32.mxu1 %vm1071_vm2, %v1044_v11 }
 0x21c   : > { %v840_v19 = vadd.f32 %v1669_v16, %v2144_v58  ;;  %v834_v20 = vpop.f32.mrb[5].mxu0  ;;  %1694 = vmatmul.mubr.msk.f32.vlgmr.msra.gmra.mrb[0].mxu1 %vm1071_vm2, %v1045_v12  ;;  %v1047_v24 = vmax.f32 %v1031_v13, 0.0  ;;  %v1027_v12 = vmul.f32 %v2139_v57, %v1004_v4 }
 0x21d   : > { %v1046_v22 = vmax.f32 %v1030_v15, 0.0  ;;  %v835_v23 = vadd.f32 %v2144_v58, %v834_v20  ;;  %v1026_v15 = vmul.f32 %v2139_v57, %v999_v7  ;;  %v2197_v57 = vld [vmem:[%s2308_s7] ss:$0 sm:$0xff] }
 0x21e   : > { %v1033_v25 = vadd.f32 %v1017_v17, %v840_v19 }
 0x21f   : > { %v1032_v26 = vadd.f32 %v1016_v21, %v835_v23  ;;  %v1672_v27 = vpop.f32.mrb[6].mxu0  ;;  %1696 = vmatprep.mubr.msk.f32.mxu1 %vm1071_vm2, %v1046_v22 }
 0x220   : > { %v850_v29 = vadd.f32 %v1672_v27, %v2144_v58  ;;  %v844_v30 = vpop.f32.mrb[7].mxu0  ;;  %1697 = vmatmul.mubr.msk.f32.gmra.mrb[2].mxu1 %vm1071_vm2, %v1047_v24  ;;  %v1049_v36 = vmax.f32 %v1033_v25, 0.0 }
 0x221   : > { %v1048_v33 = vmax.f32 %v1032_v26, 0.0  ;;  %v845_v34 = vadd.f32 %v2144_v58, %v844_v30 }
 0x222   : > { %v1035_v37 = vadd.f32 %v1019_v28, %v850_v29 }
 0x223   : > { %v1034_v38 = vadd.f32 %v1018_v31, %v845_v34  ;;  %v1675_v39 = vpop.f32.mrb[8].mxu0  ;;  %1699 = vmatprep.mubr.msk.f32.mxu1 %vm1071_vm2, %v1048_v33 }
 0x224   : > { %v860_v41 = vadd.f32 %v1675_v39, %v2144_v58  ;;  %v854_v42 = vpop.f32.mrb[9].mxu0  ;;  %1700 = vmatmul.mubr.msk.f32.gmra.mrb[4].mxu1 %vm1071_vm2, %v1049_v36  ;;  %v1051_v46 = vmax.f32 %v1035_v37, 0.0 }
 0x225   : > { %v1050_v44 = vmax.f32 %v1034_v38, 0.0  ;;  %v855_v45 = vadd.f32 %v2144_v58, %v854_v42 }
 0x226   : > { %v1037_v47 = vadd.f32 %v1021_v40, %v860_v41 }
 0x227   : > { %v1036_v49 = vadd.f32 %v1020_v43, %v855_v45  ;;  %v1678_v50 = vpop.f32.mrb[10].mxu0  ;;  %1702 = vmatprep.mubr.msk.f32.mxu1 %vm1071_vm2, %v1050_v44 }
 0x228   : > { %v870_v53 = vadd.f32 %v1678_v50, %v2144_v58  ;;  %v864_v54 = vpop.f32.mrb[11].mxu0  ;;  %1703 = vmatmul.mubr.msk.f32.gmra.mrb[6].mxu1 %vm1071_vm2, %v1051_v46  ;;  %v1053_v60 = vmax.f32 %v1037_v47, 0.0 }
 0x229   : > { %v1052_v56 = vmax.f32 %v1036_v49, 0.0  ;;  %v865_v59 = vadd.f32 %v2144_v58, %v864_v54 }
 0x22a   : > { %v1039_v61 = vadd.f32 %v1023_v51, %v870_v53 }
 0x22b   : > { %v1038_v62 = vadd.f32 %v1022_v55, %v865_v59  ;;  %v1681_v63 = vpop.f32.mrb[12].mxu0  ;;  %1705 = vmatprep.mubr.msk.f32.mxu1 %vm1071_vm2, %v1052_v56 }
 0x22c   : > { %v880_v1 = vadd.f32 %v1681_v63, %v2144_v58  ;;  %v874_v2 = vpop.f32.mrb[13].mxu0  ;;  %1706 = vmatmul.mubr.msk.f32.gmra.mrb[8].mxu1 %vm1071_vm2, %v1053_v60  ;;  %v1055_v8 = vmax.f32 %v1039_v61, 0.0 }
 0x22d   : > { %v1054_v5 = vmax.f32 %v1038_v62, 0.0  ;;  %v875_v6 = vadd.f32 %v2144_v58, %v874_v2 }
 0x22e   : > { %v1041_v9 = vadd.f32 %v1025_v0, %v880_v1 }
 0x22f   : > { %v1040_v10 = vadd.f32 %v1024_v3, %v875_v6  ;;  %v1684_v11 = vpop.f32.mrb[14].mxu0  ;;  %1708 = vmatprep.mubr.msk.f32.mxu1 %vm1071_vm2, %v1054_v5 }
 0x230   : > { %v890_v13 = vadd.f32 %v1684_v11, %v2144_v58  ;;  %v884_v14 = vpop.f32.mrb[15].mxu0  ;;  %1709 = vmatmul.mubr.msk.f32.gmra.mrb[10].mxu1 %vm1071_vm2, %v1055_v8  ;;  %v1057_v18 = vmax.f32 %v1041_v9, 0.0 }
 0x231   : > { %v1056_v16 = vmax.f32 %v1040_v10, 0.0  ;;  %v885_v17 = vadd.f32 %v2144_v58, %v884_v14 }
 0x232   : > { %v1043_v19 = vadd.f32 %v1027_v12, %v890_v13 }
 0x233   : > { %v1042_v20 = vadd.f32 %v1026_v15, %v885_v17  ;;  %1711 = vmatprep.mubr.msk.f32.mxu1 %vm1071_vm2, %v1056_v16 }
 0x234   : > { %1712 = vmatmul.mubr.msk.f32.gmra.mrb[12].mxu1 %vm1071_vm2, %v1057_v18  ;;  %v1059_v22 = vmax.f32 %v1043_v19, 0.0 }
 0x235   : > { %v1058_v21 = vmax.f32 %v1042_v20, 0.0 }
 0x237   : > { %1714 = vmatprep.mubr.msk.f32.mxu1 %vm1071_vm2, %v1058_v21 }
 0x238   : > { %1715 = vmatmul.mubr.msk.f32.gmra.mrb[14].mxu1 %vm1071_vm2, %v1059_v22 }
 0x2ef   : > { %v1695_v58 = vpop.f32.mrb[0].mxu1 }
 0x2f0   : > { %v1192_v23 = vadd.f32 %v1695_v58, %v2197_v57  ;;  %v1186_v24 = vpop.f32.mrb[1].mxu1 }
 0x2f1   : > { %v1187_v25 = vadd.f32 %v2197_v57, %v1186_v24 }
 0x2f2   : > { %v1266_v26 = vmax.f32 %v1192_v23, 0.0 }
 0x2f3   : > { %v1265_v27 = vmax.f32 %v1187_v25, 0.0  ;;  %v1698_v28 = vpop.f32.mrb[2].mxu1 }
 0x2f4   : > { %1282 = vst.msk [vmem:[%s1987_s19 + $0x8] sm:$0xff] %vm1071_vm2, %v1266_v26  ;;  %v1298_v29 = vsel %vm1071_vm2, %v1266_v26, 0.0  ;;  %v1335_v30 = vmul.f32 %v1266_v26, %v1266_v26  ;;  %v1202_v31 = vadd.f32 %v1698_v28, %v2197_v57  ;;  %v1196_v32 = vpop.f32.mrb[3].mxu1 }
 0x2f5   : > { %1281 = vst.msk [vmem:[%s1987_s19] sm:$0xff] %vm1071_vm2, %v1265_v27  ;;  %v1297_v33 = vsel %vm1071_vm2, %v1265_v27, 0.0  ;;  %v1334_v34 = vmul.f32 %v1265_v27, %v1265_v27  ;;  %v1197_v35 = vadd.f32 %v2197_v57, %v1196_v32 }
 0x2f6   : > { %v1351_v36 = vsel %vm1071_vm2, %v1335_v30, 0.0  ;;  %v1299_v37 = vadd.f32 %v1298_v29, %v1297_v33  ;;  %v1268_v38 = vmax.f32 %v1202_v31, 0.0 }
 0x2f7   : > { %v1350_v39 = vsel %vm1071_vm2, %v1334_v34, 0.0  ;;  %v1267_v40 = vmax.f32 %v1197_v35, 0.0  ;;  %v1701_v41 = vpop.f32.mrb[4].mxu1 }
 0x2f8   : > { %v1352_v42 = vadd.f32 %v1351_v36, %v1350_v39  ;;  %1284 = vst.msk [vmem:[%s1987_s19 + $0x18] sm:$0xff] %vm1071_vm2, %v1268_v38  ;;  %v1337_v43 = vmul.f32 %v1268_v38, %v1268_v38  ;;  %v1212_v44 = vadd.f32 %v1701_v41, %v2197_v57  ;;  %v1206_v45 = vpop.f32.mrb[5].mxu1  ;;  %v1302_v51 = vsel %vm1071_vm2, %v1268_v38, 0.0 }
 0x2f9   : > { %1283 = vst.msk [vmem:[%s1987_s19 + $0x10] sm:$0xff] %vm1071_vm2, %v1267_v40  ;;  %v1300_v46 = vsel %vm1071_vm2, %v1267_v40, 0.0  ;;  %v1336_v47 = vmul.f32 %v1267_v40, %v1267_v40  ;;  %v1207_v48 = vadd.f32 %v2197_v57, %v1206_v45 }
 0x2fa   : > { %v1301_v49 = vadd.f32 %v1300_v46, %v1299_v37  ;;  %v1270_v50 = vmax.f32 %v1212_v44, 0.0  ;;  %v1355_v55 = vsel %vm1071_vm2, %v1337_v43, 0.0 }
 0x2fb   : > { %v1353_v52 = vsel %vm1071_vm2, %v1336_v47, 0.0  ;;  %v1269_v53 = vmax.f32 %v1207_v48, 0.0  ;;  %v1704_v54 = vpop.f32.mrb[6].mxu1 }
 0x2fc   : > { %v1354_v56 = vadd.f32 %v1353_v52, %v1352_v42  ;;  %1286 = vst.msk [vmem:[%s1987_s19 + $0x28] sm:$0xff] %vm1071_vm2, %v1270_v50  ;;  %v1339_v59 = vmul.f32 %v1270_v50, %v1270_v50  ;;  %v1303_v60 = vadd.f32 %v1302_v51, %v1301_v49  ;;  %v1216_v61 = vpop.f32.mrb[7].mxu1  ;;  %v1222_v0 = vadd.f32 %v1704_v54, %v2197_v57 }
 0x2fd   : > { %1285 = vst.msk [vmem:[%s1987_s19 + $0x20] sm:$0xff] %vm1071_vm2, %v1269_v53  ;;  %v1304_v62 = vsel %vm1071_vm2, %v1269_v53, 0.0  ;;  %v1338_v63 = vmul.f32 %v1269_v53, %v1269_v53  ;;  %v1217_v1 = vadd.f32 %v2197_v57, %v1216_v61  ;;  %v1306_v4 = vsel %vm1071_vm2, %v1270_v50, 0.0 }
 0x2fe   : > { %v1305_v2 = vadd.f32 %v1304_v62, %v1303_v60  ;;  %v1356_v3 = vadd.f32 %v1355_v55, %v1354_v56  ;;  %v1272_v6 = vmax.f32 %v1222_v0, 0.0  ;;  %v1359_v13 = vsel %vm1071_vm2, %v1339_v59, 0.0 }
 0x2ff   : > { %v1357_v5 = vsel %vm1071_vm2, %v1338_v63, 0.0  ;;  %v1271_v7 = vmax.f32 %v1217_v1, 0.0  ;;  %v1707_v8 = vpop.f32.mrb[8].mxu1 }
 0x300   : > { %v1358_v9 = vadd.f32 %v1357_v5, %v1356_v3  ;;  %v1307_v10 = vadd.f32 %v1306_v4, %v1305_v2  ;;  %v1232_v11 = vadd.f32 %v1707_v8, %v2197_v57  ;;  %v1226_v12 = vpop.f32.mrb[9].mxu1  ;;  %1288 = vst.msk [vmem:[%s1987_s19 + $0x38] sm:$0xff] %vm1071_vm2, %v1272_v6  ;;  %v1341_v14 = vmul.f32 %v1272_v6, %v1272_v6 }
 0x301   : > { %1287 = vst.msk [vmem:[%s1987_s19 + $0x30] sm:$0xff] %vm1071_vm2, %v1271_v7  ;;  %v1308_v15 = vsel %vm1071_vm2, %v1271_v7, 0.0  ;;  %v1340_v16 = vmul.f32 %v1271_v7, %v1271_v7  ;;  %v1227_v20 = vadd.f32 %v2197_v57, %v1226_v12  ;;  %v1310_v58 = vsel %vm1071_vm2, %v1272_v6, 0.0 }
 0x302   : > { %v1309_v17 = vadd.f32 %v1308_v15, %v1307_v10  ;;  %v1360_v18 = vadd.f32 %v1359_v13, %v1358_v9  ;;  %v1274_v19 = vmax.f32 %v1232_v11, 0.0  ;;  %v1363_v23 = vsel %vm1071_vm2, %v1341_v14, 0.0 }
 0x303   : > { %v1361_v21 = vsel %vm1071_vm2, %v1340_v16, 0.0  ;;  %v1710_v22 = vpop.f32.mrb[10].mxu1  ;;  %v1273_v25 = vmax.f32 %v1227_v20, 0.0 }
 0x304   : > { %v1362_v24 = vadd.f32 %v1361_v21, %v1360_v18  ;;  %1290 = vst.msk [vmem:[%s1987_s19 + $0x48] sm:$0xff] %vm1071_vm2, %v1274_v19  ;;  %v1236_v26 = vpop.f32.mrb[11].mxu1  ;;  %v1343_v27 = vmul.f32 %v1274_v19, %v1274_v19  ;;  %v1311_v28 = vadd.f32 %v1310_v58, %v1309_v17  ;;  %v1242_v29 = vadd.f32 %v1710_v22, %v2197_v57 }
 0x305   : > { %v1237_v30 = vadd.f32 %v2197_v57, %v1236_v26  ;;  %1289 = vst.msk [vmem:[%s1987_s19 + $0x40] sm:$0xff] %vm1071_vm2, %v1273_v25  ;;  %v1312_v31 = vsel %vm1071_vm2, %v1273_v25, 0.0  ;;  %v1342_v32 = vmul.f32 %v1273_v25, %v1273_v25  ;;  %v1314_v38 = vsel %vm1071_vm2, %v1274_v19, 0.0 }
 0x306   : > { %v1364_v33 = vadd.f32 %v1363_v23, %v1362_v24  ;;  %v1313_v34 = vadd.f32 %v1312_v31, %v1311_v28  ;;  %v1276_v35 = vmax.f32 %v1242_v29, 0.0  ;;  %v1367_v42 = vsel %vm1071_vm2, %v1343_v27, 0.0 }
 0x307   : > { %v1275_v36 = vmax.f32 %v1237_v30, 0.0  ;;  %v1713_v37 = vpop.f32.mrb[12].mxu1  ;;  %v1365_v39 = vsel %vm1071_vm2, %v1342_v32, 0.0 }
 0x308   : > { %v1252_v40 = vadd.f32 %v1713_v37, %v2197_v57  ;;  %v1246_v41 = vpop.f32.mrb[13].mxu1  ;;  %v1366_v43 = vadd.f32 %v1365_v39, %v1364_v33  ;;  %1292 = vst.msk [vmem:[%s1987_s19 + $0x58] sm:$0xff] %vm1071_vm2, %v1276_v35  ;;  %v1345_v44 = vmul.f32 %v1276_v35, %v1276_v35  ;;  %v1315_v45 = vadd.f32 %v1314_v38, %v1313_v34 }
 0x309   : > { %1291 = vst.msk [vmem:[%s1987_s19 + $0x50] sm:$0xff] %vm1071_vm2, %v1275_v36  ;;  %v1316_v46 = vsel %vm1071_vm2, %v1275_v36, 0.0  ;;  %v1344_v47 = vmul.f32 %v1275_v36, %v1275_v36  ;;  %v1247_v49 = vadd.f32 %v2197_v57, %v1246_v41  ;;  %v1318_v53 = vsel %vm1071_vm2, %v1276_v35, 0.0 }
 0x30a   : > { %v1278_v48 = vmax.f32 %v1252_v40, 0.0  ;;  %v1317_v50 = vadd.f32 %v1316_v46, %v1315_v45  ;;  %v1368_v51 = vadd.f32 %v1367_v42, %v1366_v43  ;;  %v1371_v63 = vsel %vm1071_vm2, %v1345_v44, 0.0 }
 0x30b   : > { %v1716_v52 = vpop.f32.mrb[14].mxu1  ;;  %v1369_v54 = vsel %vm1071_vm2, %v1344_v47, 0.0  ;;  %v1277_v55 = vmax.f32 %v1247_v49, 0.0 }
 0x30c   : > { %1294 = vst.msk [vmem:[%s1987_s19 + $0x68] sm:$0xff] %vm1071_vm2, %v1278_v48  ;;  %v1256_v56 = vpop.f32.mrb[15].mxu1  ;;  %v1370_v59 = vadd.f32 %v1369_v54, %v1368_v51  ;;  %v1319_v60 = vadd.f32 %v1318_v53, %v1317_v50  ;;  %v1262_v61 = vadd.f32 %v1716_v52, %v2197_v57  ;;  %v1347_v0 = vmul.f32 %v1278_v48, %v1278_v48 }
 0x30d   : > { %v1257_v62 = vadd.f32 %v2197_v57, %v1256_v56  ;;  %1293 = vst.msk [vmem:[%s1987_s19 + $0x60] sm:$0xff] %vm1071_vm2, %v1277_v55  ;;  %v1320_v1 = vsel %vm1071_vm2, %v1277_v55, 0.0  ;;  %v1346_v2 = vmul.f32 %v1277_v55, %v1277_v55  ;;  %v1322_v7 = vsel %vm1071_vm2, %v1278_v48, 0.0 }
 0x30e   : > { %v1321_v3 = vadd.f32 %v1320_v1, %v1319_v60  ;;  %v1372_v4 = vadd.f32 %v1371_v63, %v1370_v59  ;;  %v1280_v5 = vmax.f32 %v1262_v61, 0.0  ;;  %v1375_v10 = vsel %vm1071_vm2, %v1347_v0, 0.0 }
 0x30f   : > { %v1279_v6 = vmax.f32 %v1257_v62, 0.0  ;;  %v1373_v8 = vsel %vm1071_vm2, %v1346_v2, 0.0 }
 0x310   : > { %v1374_v9 = vadd.f32 %v1373_v8, %v1372_v4  ;;  %1296 = vst.msk [vmem:[%s1987_s19 + $0x78] sm:$0xff] %vm1071_vm2, %v1280_v5  ;;  %v1323_v57 = vadd.f32 %v1322_v7, %v1321_v3  ;;  %v1349_v11 = vmul.f32 %v1280_v5, %v1280_v5  ;;  %v1326_v16 = vsel %vm1071_vm2, %v1280_v5, 0.0 }
 0x311   : > { %1295 = vst.msk [vmem:[%s1987_s19 + $0x70] sm:$0xff] %vm1071_vm2, %v1279_v6  ;;  %v1324_v12 = vsel %vm1071_vm2, %v1279_v6, 0.0  ;;  %v1348_v13 = vmul.f32 %v1279_v6, %v1279_v6 }
 0x312   : > { %v1325_v14 = vadd.f32 %v1324_v12, %v1323_v57  ;;  %v1376_v15 = vadd.f32 %v1375_v10, %v1374_v9  ;;  %v1379_v20 = vsel %vm1071_vm2, %v1349_v11, 0.0 }
 0x313   : > { %v1377_v17 = vsel %vm1071_vm2, %v1348_v13, 0.0 }
 0x314   : > { %v1327_v18 = vadd.f32 %v1326_v16, %v1325_v14  ;;  %v1378_v19 = vadd.f32 %v1377_v17, %v1376_v15 }
 0x316   : > { %v1328_v21 = vrot.slane %v1327_v18, 4  ;;  %v1380_v22 = vadd.f32 %v1379_v20, %v1378_v19 }
 0x318   : > { %v1329_v58 = vadd.f32 %v1328_v21, %v1327_v18  ;;  %v1381_v23 = vrot.slane %v1380_v22, 4 }
 0x31a   : > { %v1330_v24 = vrot.slane %v1329_v58, 2  ;;  %v1382_v25 = vadd.f32 %v1381_v23, %v1380_v22 }
 0x31c   : > { %v1331_v26 = vadd.f32 %v1330_v24, %v1329_v58  ;;  %v1383_v27 = vrot.slane %v1382_v25, 2 }
 0x31e   : > { %v1332_v28 = vrot.slane %v1331_v26, 1  ;;  %v1384_v29 = vadd.f32 %v1383_v27, %v1382_v25 }
 0x320   : > { %v1385_v30 = vrot.slane %v1384_v29, 1  ;;  %v1333_v31 = vadd.f32 %v1332_v28, %v1331_v26 }
 0x322   : > { %v1386_v32 = vadd.f32 %v1385_v30, %v1384_v29 }
 0x324   : > { %v1388_v33 = vsel %vm1387_vm3, %v1333_v31, %v1386_v32 }
 0x325   : > { %1390 = vst.msk [vmem:[%s1992_s20] sm:$0x3] %vm1389_vm4, %v1388_v33 }
 0x326 PF: > { %s20_s15 = sadd.s32 1, %s1859_s15   ;;  %s2317_s19 = sld [smem:[#allocation4_spill]] }
 0x327   : > { %p17_p0 = scmp.ge.s32.totalorder %s20_s15, 6   ;;  %s2318_s0 = sld [smem:[#allocation5_spill]] }
 0x328   : > { %s2319_s30 = smov %s1839_s10  ;;  %s2320_s10 = smov %s1964_s22 }
 0x329   : > { %s2321_s11 = smov %s1851_s13  ;;  %s2322_s12 = smov %s1855_s14 }
 0x32a   :  { %19 = sbr.rel (!%p17_p0) target bundleno = 6 (0x6), region = 150 }
 0x32c   : > { %s2323_s13 = smov %s2317_s19 }
 0x32d   : > { %s2324_s14 = smov %s2318_s0 }

// kernel: gcn_forward.4
= control target key start
LH: loop header
LB: loop body
LE: loop exit
PB: predicated region body
PF: predicated region fallthrough
CT: control target
= control target key end

     0   :  { %s2318_s0 = inlined_call_operand.vmem [shape: s8[256,256], index: 0, kind: input, shape index: {}]   ;;  %s2319_s1 = inlined_call_operand.vmem [shape: f32[256,32], index: 1, kind: input, shape index: {}]   ;;  %s2320_s2 = inlined_call_operand.vmem [shape: f32[256,1], index: 2, kind: input, shape index: {}]   ;;  %s2321_s3 = inlined_call_operand.vmem [shape: f32[32,32], index: 3, kind: input, shape index: {}]   ;;  %s2322_s4 = inlined_call_operand.vmem [shape: f32[1,32], index: 4, kind: input, shape index: {}]   ;;  %s2323_s5 = inlined_call_operand.vmem [shape: f32[1,32], index: 5, kind: input, shape index: {}]   ;;  %s2324_s6 = inlined_call_operand.vmem [shape: f32[32,32], index: 6, kind: input, shape index: {}]   ;;  %s2325_s7 = inlined_call_operand.vmem [shape: f32[1,32], index: 7, kind: input, shape index: {}]   ;;  %s2326_s8 = inlined_call_operand.vmem [shape: f32[256,32], index: 8, kind: output, shape index: {0}]   ;;  %s2327_s9 = inlined_call_operand.vmem [shape: f32[2,2,32], index: 9, kind: output, shape index: {1}]  }
   0x1   :  { %2330 = sst [smem:[#allocation6_spill]] %s2318_s0 }
   0x2   :  { %s1924_s30 = smov 0   ;;  %s1926_s10 = smov 0  }
   0x3   :  { %s1928_s11 = smov 0   ;;  %s1930_s12 = smov 0  }
   0x4   :  { %s1932_s13 = smov 0   ;;  %s1934_s14 = smov 0  }
   0x5   :  { %s1936_s15 = smov 0  }
   0x6 LB: > { %s29_s16 = sadd.s32 1, %s1862_s13  ;;  %s32_s17 = sadd.s32 1, %s1866_s14  ;;  %s1870_s15 = sphi %s1936_s15, %s20_s15   ;;  %s1866_s14 = sphi %s1934_s14, %s2341_s14   ;;  %s1862_s13 = sphi %s1932_s13, %s2340_s13   ;;  %s1858_s12 = sphi %s1930_s12, %s2339_s12   ;;  %s1854_s11 = sphi %s1928_s11, %s2338_s11   ;;  %s1850_s10 = sphi %s1926_s10, %s2337_s10   ;;  %s1846_s30 = sphi %s1924_s30, %s2336_s30  }
   0x7   : > { %p30_p0 = scmp.ge.s32.totalorder %s29_s16, 2  ;;  %p48_p1 = scmp.ne.s32.totalorder %s1850_s10, %s1846_s30 }
   0x8   : > { %p49_p2 = scmp.eq.s32.totalorder %s1870_s15, 0  ;;  %s41_s21 = sadd.s32 1, %s1850_s10 }
   0x9   : > { %s2343_s16 = smov (%p30_p0, %s29_s16), 0  ;;  %s2345_s17 = smov (!%p30_p0, %s32_s17), %s1866_s14 }
   0xa   : > { %2331 = sst [smem:[#allocation4_spill]] %s2343_s16  ;;  %p50_p3 = por %p49_p2, %p48_p1 }
   0xb   : > { %p34_p4 = scmp.ge.s32.totalorder %s2345_s17, 2  ;;  %s37_s18 = ssub.s32 %s1862_s13, %s2343_s16 }
   0xc   : > { %p1518_p6 = scmp.ge.s32.totalorder %s1870_s15, 4 }
   0xd   : > { %s2347_s17 = smov (%p34_p4, %s2345_s17), 0 }
   0xe   : > { %2332 = sst [smem:[#allocation5_spill]] %s2347_s17  ;;  %s36_s19 = ssub.s32 %s1866_s14, %s2347_s17 }
   0xf   : > { %s38_s20 = sor.u32 %s37_s18, %s36_s19  ;;  %296 = sbr.rel (%p1518_p6) target bundleno = 34 (0x22), region = 40 }
  0x10   : > { %p39_p5 = scmp.eq.s32.totalorder %s38_s20, 0 }
  0x12   : > { %s1975_s22 = scalar_select %p39_p5, %s1850_s10, %s41_s21  }
  0x16   : > { %299 = sbr.rel (!%p50_p3) target bundleno = 34 (0x22), region = 44  ;;  %s301_s23 = sand.u32 (%p50_p3), 1, %s1850_s10  }
  0x17   : > { %s1571_s24 = sshll.u32 (%p50_p3), %s1866_s14, 3  ;;  %s1519_s25 = sshll.u32 (%p50_p3), %s301_s23, 5 }
  0x18   : > { %s306_s26 = sadd.s32 (%p50_p3), %s1862_s13, %s1571_s24  ;;  %s2333_s0 = sld [smem:[#allocation6_spill]] (%p50_p3) }
  0x19   : > { %s1522_s27 = sshll.u32 (%p50_p3), %s306_s26, 3  ;;  %s303_s19 = scalar_lea.vmem (%p50_p3), [#allocation3], %s1519_s25 }
  0x1e   : > { %s308_s18 = scalar_lea.vmem %s2333_s0, %s1522_s27 }
  0x1f   : > { %v342_v0 = vld [vmem:[%s308_s18] sm:$0xff]  ;;  %v344_v1 = vld [vmem:[%s308_s18 + $0x10] sm:$0xff] }
  0x20   : > { %v346_v2 = vld [vmem:[%s308_s18 + $0x20] sm:$0xff]  ;;  %343 = vst [vmem:[%s303_s19] sm:$0xff] %v342_v0  ;;  %345 = vst [vmem:[%s303_s19 + $0x8] sm:$0xff] %v344_v1  ;;  %v348_v3 = vld [vmem:[%s308_s18 + $0x30] sm:$0xff] }
  0x21   : > { %347 = vst [vmem:[%s303_s19 + $0x10] sm:$0xff] %v346_v2  ;;  %349 = vst [vmem:[%s303_s19 + $0x18] sm:$0xff] %v348_v3 }
  0x22 PF: > { %p1523_p7 = scmp.ge.s32.totalorder %s1870_s15, 1  ;;  %p363_p8 = scmp.lt.s32.totalorder %s1870_s15, 5 }
  0x24   : > { %p364_p9 = pnand %p1523_p7, %p363_p8 }
  0x25   : > { %s370_s20 = sand.u32 (!%p364_p9), 1, %s1846_s30   ;;  %s1525_s21 = sshll.u32 (!%p364_p9), %s1858_s12, 4 }
  0x26   : > { %367 = sbr.rel (%p364_p9) target bundleno = 806 (0x326), region = 86  ;;  %s1524_s23 = sshll.u32 (!%p364_p9), %s370_s20, 5 }
  0x27   : > { %p416_p10 = scmp.lt.s32.totalorder (!%p364_p9), %s1525_s21, 31  ;;  %p427_p11 = scmp.lt.s32.totalorder (!%p364_p9), %s1858_s12, 1 }
  0x28   : > { %s2005_s16 = scalar_lea.vmem (!%p364_p9), [#allocation3], %s1524_s23  ;;  %p1530_p12 = scmp.ne.s32.totalorder (!%p364_p9), %s1854_s11, 0 }
  0x2d   : > { %s2349_s21 = smov (!%p416_p10, %s1525_s21), 31  ;;  %435 = sbr.rel (%p1530_p12) target bundleno = 56 (0x38), region = 94 }
  0x2e   : > { %s428_s24 = scalar_select %p427_p11, %s1858_s12, 1 }
  0x2f   : > { %s1526_s25 = sshll.u32 %s2349_s21, 3  ;;  %vm436_vm0 = vcmask (!%p1530_p12), 261120   ;;  %v1872_v4 = vmov (!%p1530_p12), 0.0  }
  0x30   : > { %s1993_s28 = scalar_lea.vmem %s2320_s2, %s1526_s25  ;;  %s1998_s19 = scalar_lea.vmem %s2326_s8, %s1526_s25  ;;  %437 = vst.msk [vmem:[#allocation2] sm:$0xff] (!%p1530_p12), %vm436_vm0, %v1872_v4  ;;  %438 = vst.msk [vmem:[#allocation2 + $0x8] sm:$0xff] (!%p1530_p12), %vm436_vm0, %v1872_v4 }
  0x31   : > { %s1529_s0 = sshll.u32 %s428_s24, 1  ;;  %439 = vst.msk [vmem:[#allocation2 + $0x10] sm:$0xff] (!%p1530_p12), %vm436_vm0, %v1872_v4  ;;  %440 = vst.msk [vmem:[#allocation2 + $0x18] sm:$0xff] (!%p1530_p12), %vm436_vm0, %v1872_v4 }
  0x32   : > { %s2003_s20 = scalar_lea.vmem %s2327_s9, %s1529_s0  ;;  %441 = vst.msk [vmem:[#allocation2 + $0x20] sm:$0xff] (!%p1530_p12), %vm436_vm0, %v1872_v4  ;;  %442 = vst.msk [vmem:[#allocation2 + $0x28] sm:$0xff] (!%p1530_p12), %vm436_vm0, %v1872_v4 }
  0x33   : > { %443 = vst.msk [vmem:[#allocation2 + $0x30] sm:$0xff] (!%p1530_p12), %vm436_vm0, %v1872_v4  ;;  %444 = vst.msk [vmem:[#allocation2 + $0x38] sm:$0xff] (!%p1530_p12), %vm436_vm0, %v1872_v4 }
  0x34   : > { %445 = vst.msk [vmem:[#allocation2 + $0x40] sm:$0xff] %vm436_vm0, %v1872_v4  ;;  %446 = vst.msk [vmem:[#allocation2 + $0x48] sm:$0xff] %vm436_vm0, %v1872_v4 }
  0x35   : > { %447 = vst.msk [vmem:[#allocation2 + $0x50] sm:$0xff] %vm436_vm0, %v1872_v4  ;;  %448 = vst.msk [vmem:[#allocation2 + $0x58] sm:$0xff] %vm436_vm0, %v1872_v4 }
  0x36   : > { %449 = vst.msk [vmem:[#allocation2 + $0x60] sm:$0xff] %vm436_vm0, %v1872_v4  ;;  %450 = vst.msk [vmem:[#allocation2 + $0x68] sm:$0xff] %vm436_vm0, %v1872_v4 }
  0x37   : > { %451 = vst.msk [vmem:[#allocation2 + $0x70] sm:$0xff] %vm436_vm0, %v1872_v4  ;;  %452 = vst.msk [vmem:[#allocation2 + $0x78] sm:$0xff] %vm436_vm0, %v1872_v4 }
  0x38 PF: > { %s1531_s0 = sshll.u32 %s1854_s11, 7  ;;  %v2026_v5 = vld [vmem:[%s2005_s16] sm:$0xff]  ;;  %v2029_v6 = vld [vmem:[%s2005_s16 + $0x10] sm:$0xff]  ;;  %v455_v33 = vld [vmem:[%s2005_s16 + $0x8] sm:$0xff]  ;;  %vm620_vm1 = vcmask 261120   ;;  %p1532_p13 = scmp.ne.s32.totalorder %s1854_s11, 1 }
  0x39   : > { %s2034_s23 = scalar_lea.vmem %s2319_s1, %s1531_s0  ;;  %v458_v7 = vunpack.c.l.s8.bf16 %v2026_v5  ;;  %v462_v8 = vunpack.c.l.s8.bf16 %v2029_v6  ;;  %v457_v34 = vld [vmem:[%s2005_s16 + $0x18] sm:$0xff]  ;;  %v459_v35 = vunpack.c.h.s8.bf16 %v2026_v5  ;;  %v463_v36 = vunpack.c.h.s8.bf16 %v2029_v6  ;;  %s1533_s18 = sshll.u32 (!%p1532_p13), %s1858_s12, 7 }
  0x3a   : > { %v467_v9 = vld [vmem:[%s2034_s23] sm:$0xff]  ;;  %v468_v10 = vld [vmem:[%s2034_s23 + $0x8] sm:$0xff]  ;;  %v469_v11 = vld [vmem:[%s2034_s23 + $0x10] sm:$0xff]  ;;  %v460_v37 = vunpack.c.l.s8.bf16 %v455_v33  ;;  %v464_v38 = vunpack.c.l.s8.bf16 %v457_v34  ;;  %v461_v39 = vunpack.c.h.s8.bf16 %v455_v33  ;;  %v465_v40 = vunpack.c.h.s8.bf16 %v457_v34  ;;  %s2091_s21 = scalar_lea.vmem (!%p1532_p13), %s2319_s1, %s1533_s18 }
  0x3b   : > { %v483_v12 = vpack.c.bf16 %v468_v10, %v467_v9  ;;  %v470_v13 = vld [vmem:[%s2034_s23 + $0x18] sm:$0xff]  ;;  %1644 = vmatprep.mubr.bf16.mxu0 %v458_v7  ;;  %1652 = vmatprep.mubr.bf16.mxu1 %v462_v8  ;;  %v471_v15 = vld [vmem:[%s2034_s23 + $0x20] sm:$0xff]  ;;  %v472_v16 = vld [vmem:[%s2034_s23 + $0x28] sm:$0xff]  ;;  %vm1388_vm2 = vcmask (!%p1532_p13), 1040384   ;;  %vm1390_vm3 = vcmask (!%p1532_p13), 254976  }
  0x3c   : > { %v484_v14 = vpack.c.bf16 %v470_v13, %v469_v11  ;;  %v485_v17 = vpack.c.bf16 %v472_v16, %v471_v15  ;;  %v473_v18 = vld [vmem:[%s2034_s23 + $0x30] sm:$0xff]  ;;  %v474_v19 = vld [vmem:[%s2034_s23 + $0x38] sm:$0xff]  ;;  %v475_v21 = vld [vmem:[%s2034_s23 + $0x40] sm:$0xff] }
  0x3d   : > { %1628 = vmatprep.subr.bf16.mxu0 %v483_v12  ;;  %1740 = vmatprep.subr.bf16.mxu1 %v483_v12  ;;  %v486_v20 = vpack.c.bf16 %v474_v19, %v473_v18  ;;  %v476_v22 = vld [vmem:[%s2034_s23 + $0x48] sm:$0xff]  ;;  %v477_v24 = vld [vmem:[%s2034_s23 + $0x50] sm:$0xff]  ;;  %v478_v25 = vld [vmem:[%s2034_s23 + $0x58] sm:$0xff] }
  0x3e   : > { %1629 = vmatpush3.bf16.msra.mxu0 %v483_v12  ;;  %1748 = vmatpush3.bf16.msra.mxu1 %v483_v12  ;;  %v487_v23 = vpack.c.bf16 %v476_v22, %v475_v21  ;;  %v488_v26 = vpack.c.bf16 %v478_v25, %v477_v24  ;;  %v479_v27 = vld [vmem:[%s2034_s23 + $0x60] sm:$0xff]  ;;  %v480_v28 = vld [vmem:[%s2034_s23 + $0x68] sm:$0xff]  ;;  %v481_v30 = vld [vmem:[%s2034_s23 + $0x70] sm:$0xff] }
  0x3f   : > { %1630 = vmatprep.subr.bf16.mxu0 %v484_v14  ;;  %1741 = vmatprep.subr.bf16.mxu1 %v484_v14  ;;  %v489_v29 = vpack.c.bf16 %v480_v28, %v479_v27  ;;  %v482_v31 = vld [vmem:[%s2034_s23 + $0x78] sm:$0xff]  ;;  %v491_v43 = vld [vmem:[#allocation2] sm:$0xff]  ;;  %v494_v47 = vld [vmem:[#allocation2 + $0x18] sm:$0xff] }
  0x40   : > { %v490_v32 = vpack.c.bf16 %v482_v31, %v481_v30  ;;  %v493_v41 = vld [vmem:[#allocation2 + $0x10] sm:$0xff]  ;;  %v499_v44 = vld [vmem:[#allocation2 + $0x40] sm:$0xff]  ;;  %v502_v48 = vld [vmem:[#allocation2 + $0x58] sm:$0xff]  ;;  %v1873_v31 = vmov (!%p1532_p13), 0  }
  0x41   : > { %v501_v42 = vld [vmem:[#allocation2 + $0x50] sm:$0xff]  ;;  %v492_v53 = vld [vmem:[#allocation2 + $0x8] sm:$0xff]  ;;  %v495_v3 = vld [vmem:[#allocation2 + $0x20] sm:$0xff]  ;;  %1814 = vset.pattern.permute.xlu0 (!%p1532_p13), %v1873_v31  ;;  %1815 = vset.pattern.permute.xlu1 (!%p1532_p13), %v1873_v31 }
  0x42   : > { %1631 = vmatpush3.bf16.msra.mxu0 %v484_v14  ;;  %1749 = vmatpush3.bf16.msra.mxu1 %v484_v14  ;;  %v500_v54 = vld [vmem:[#allocation2 + $0x48] sm:$0xff]  ;;  %v497_v1 = vld [vmem:[#allocation2 + $0x30] sm:$0xff]  ;;  %v503_v4 = vld [vmem:[#allocation2 + $0x60] sm:$0xff] }
  0x43   : > { %1632 = vmatprep.subr.bf16.mxu0 %v485_v17  ;;  %1742 = vmatprep.subr.bf16.mxu1 %v485_v17  ;;  %v505_v2 = vld [vmem:[#allocation2 + $0x70] sm:$0xff]  ;;  %v498_v7 = vld [vmem:[#allocation2 + $0x38] sm:$0xff]  ;;  %v496_v13 = vld [vmem:[#allocation2 + $0x28] sm:$0xff] }
  0x44   : > { %v506_v8 = vld [vmem:[#allocation2 + $0x78] sm:$0xff]  ;;  %v504_v14 = vld [vmem:[#allocation2 + $0x68] sm:$0xff] }
  0x45   : > { %v691_v25 = vld [vmem:[%s2321_s3] sm:$0xff] (!%p1532_p13)  ;;  %v693_v27 = vld [vmem:[%s2321_s3 + $0x10] sm:$0xff] (!%p1532_p13) }
  0x46   : > { %1633 = vmatpush3.bf16.msra.mxu0 %v485_v17  ;;  %1750 = vmatpush3.bf16.msra.mxu1 %v485_v17  ;;  %v643_v33 = vld [vmem:[%s2091_s21] sm:$0xff] (!%p1532_p13) }
  0x47   : > { %1634 = vmatprep.subr.bf16.mxu0 %v486_v20  ;;  %1743 = vmatprep.subr.bf16.mxu1 %v486_v20 }
  0x4a   : > { %1635 = vmatpush3.bf16.msra.mxu0 %v486_v20  ;;  %1751 = vmatpush3.bf16.msra.mxu1 %v486_v20 }
  0x4b   : > { %1636 = vmatprep.subr.bf16.mxu0 %v487_v23  ;;  %1744 = vmatprep.subr.bf16.mxu1 %v487_v23 }
  0x4e   : > { %1637 = vmatpush3.bf16.msra.mxu0 %v487_v23  ;;  %1752 = vmatpush3.bf16.msra.mxu1 %v487_v23 }
  0x4f   : > { %1638 = vmatprep.subr.bf16.mxu0 %v488_v26  ;;  %1745 = vmatprep.subr.bf16.mxu1 %v488_v26 }
  0x52   : > { %1639 = vmatpush3.bf16.msra.mxu0 %v488_v26  ;;  %1753 = vmatpush3.bf16.msra.mxu1 %v488_v26  ;;  %v692_v26 = vld [vmem:[%s2321_s3 + $0x8] sm:$0xff] (!%p1532_p13) }
  0x53   : > { %1640 = vmatprep.subr.bf16.mxu0 %v489_v29  ;;  %1746 = vmatprep.subr.bf16.mxu1 %v489_v29  ;;  %v1724_v28 = vpack.c.bf16 (!%p1532_p13), %v692_v26, %v691_v25  ;;  %v656_v26 = vld [vmem:[%s2091_s21 + $0x68] sm:$0xff] (!%p1532_p13) }
  0x56   : > { %1641 = vmatpush3.bf16.msra.mxu0 %v489_v29  ;;  %1754 = vmatpush3.bf16.msra.mxu1 %v489_v29  ;;  %v694_v29 = vld [vmem:[%s2321_s3 + $0x18] sm:$0xff] (!%p1532_p13) }
  0x57   : > { %1642 = vmatprep.subr.bf16.mxu0 %v490_v32  ;;  %1747 = vmatprep.subr.bf16.mxu1 %v490_v32 }
  0x5a   : > { %1643 = vmatpush3.bf16.msra.mxu0 %v490_v32  ;;  %1755 = vmatpush3.bf16.msra.mxu1 %v490_v32  ;;  %v1728_v32 = vpack.c.bf16 (!%p1532_p13), %v694_v29, %v693_v27  ;;  %v905_v29 = vld [vmem:[%s1993_s28 + $0x50] sm:$0xff] (!%p1532_p13) }
  0x5b   : > { %1725 = vmatprep.subr.bf16.mxu0 (!%p1532_p13), %v1724_v28 }
  0x5d   : > { %1645 = vmatmul.mubr.bf16.vlgmr.msra.gmra.mrb[0].mxu0 %v459_v35  ;;  %1653 = vmatmul.mubr.bf16.vlgmr.msra.gmra.mrb[0].mxu1 %v463_v36  ;;  %v644_v35 = vld [vmem:[%s2091_s21 + $0x8] sm:$0xff] (!%p1532_p13) }
  0x5e   : > { %1648 = vmatprep.mubr.bf16.mxu0 %v460_v37  ;;  %1656 = vmatprep.mubr.bf16.mxu1 %v464_v38  ;;  %v645_v37 = vld [vmem:[%s2091_s21 + $0x10] sm:$0xff] (!%p1532_p13) }
  0x5f   : > { %1727 = vmatpush3.bf16.msra.mxu0 (!%p1532_p13), %v1724_v28 }
  0x60   : > { %1729 = vmatprep.subr.bf16.mxu0 (!%p1532_p13), %v1728_v32 }
  0x63   : > { %1731 = vmatpush3.bf16.msra.mxu0 (!%p1532_p13), %v1728_v32  ;;  %v906_v32 = vld [vmem:[%s1993_s28 + $0x58] sm:$0xff] (!%p1532_p13) }
  0x65   : > { %1649 = vmatmul.mubr.bf16.gmra.mrb[4].mxu0 %v461_v39  ;;  %1657 = vmatmul.mubr.bf16.gmra.mrb[4].mxu1 %v465_v40 }
 0x130   : > { %v1646_v45 = vpop.f32.mrb[0].mxu0  ;;  %v1654_v46 = vpop.f32.mrb[0].mxu1 }
 0x131   : > { %v606_v49 = vadd.f32 %v1646_v45, %v493_v41  ;;  %v614_v50 = vadd.f32 %v1654_v46, %v501_v42  ;;  %v541_v51 = vpop.f32.mrb[1].mxu0  ;;  %v573_v52 = vpop.f32.mrb[1].mxu1  ;;  %v646_v41 = vld [vmem:[%s2091_s21 + $0x18] sm:$0xff] (!%p1532_p13)  ;;  %v648_v46 = vld [vmem:[%s2091_s21 + $0x28] sm:$0xff] (!%p1532_p13) }
 0x132   : > { %v604_v55 = vadd.f32 %v541_v51, %v491_v43  ;;  %v612_v56 = vadd.f32 %v573_v52, %v499_v44  ;;  %v1647_v57 = vpop.f32.mrb[2].mxu0  ;;  %v1655_v58 = vpop.f32.mrb[2].mxu1  ;;  %v647_v43 = vld [vmem:[%s2091_s21 + $0x20] sm:$0xff] (!%p1532_p13)  ;;  %v896_v51 = vld [vmem:[%s1993_s28 + $0x8] sm:$0xff] (!%p1532_p13)  ;;  %v649_v52 = vld [vmem:[%s2091_s21 + $0x30] sm:$0xff] (!%p1532_p13) }
 0x133   : > { %623 = vst.msk [vmem:[#allocation2 + $0x10] sm:$0xff] %vm620_vm1, %v606_v49  ;;  %631 = vst.msk [vmem:[#allocation2 + $0x50] sm:$0xff] %vm620_vm1, %v614_v50  ;;  %v607_v59 = vadd.f32 %v1647_v57, %v494_v47  ;;  %v615_v60 = vadd.f32 %v1655_v58, %v502_v48  ;;  %v544_v61 = vpop.f32.mrb[3].mxu0  ;;  %v576_v62 = vpop.f32.mrb[3].mxu1  ;;  %v895_v49 = vld [vmem:[%s1993_s28] sm:$0xff] (!%p1532_p13)  ;;  %v897_v50 = vld [vmem:[%s1993_s28 + $0x10] sm:$0xff] (!%p1532_p13) }
 0x134   : > { %621 = vst.msk [vmem:[#allocation2] sm:$0xff] %vm620_vm1, %v604_v55  ;;  %629 = vst.msk [vmem:[#allocation2 + $0x40] sm:$0xff] %vm620_vm1, %v612_v56  ;;  %v605_v63 = vadd.f32 %v544_v61, %v492_v53  ;;  %v613_v0 = vadd.f32 %v576_v62, %v500_v54  ;;  %v911_v54 = vadd.f32 (!%p1532_p13), 1.0, %v895_v49  ;;  %v913_v55 = vadd.f32 (!%p1532_p13), 1.0, %v897_v50  ;;  %v898_v56 = vld [vmem:[%s1993_s28 + $0x18] sm:$0xff] (!%p1532_p13)  ;;  %v1063_v49 = vld [vmem:[%s2324_s6 + $0x8] sm:$0xff] (!%p1532_p13) }
 0x135   : > { %624 = vst.msk [vmem:[#allocation2 + $0x18] sm:$0xff] %vm620_vm1, %v607_v59  ;;  %632 = vst.msk [vmem:[#allocation2 + $0x58] sm:$0xff] %vm620_vm1, %v615_v60  ;;  %v912_v58 = vadd.f32 (!%p1532_p13), 1.0, %v896_v51  ;;  %v650_v60 = vld [vmem:[%s2091_s21 + $0x38] sm:$0xff] (!%p1532_p13)  ;;  %v914_v62 = vadd.f32 (!%p1532_p13), 1.0, %v898_v56  ;;  %v1064_v51 = vld [vmem:[%s2324_s6 + $0x10] sm:$0xff] (!%p1532_p13) }
 0x136   : > { %622 = vst.msk [vmem:[#allocation2 + $0x8] sm:$0xff] %vm620_vm1, %v605_v63  ;;  %630 = vst.msk [vmem:[#allocation2 + $0x48] sm:$0xff] %vm620_vm1, %v613_v0  ;;  %930 = vperm.xlu0 (!%p1532_p13), %1814, %v911_v54   ;;  %940 = vperm.xlu1 (!%p1532_p13), %1815, %v913_v55   ;;  %v899_v63 = vld [vmem:[%s1993_s28 + $0x20] sm:$0xff] (!%p1532_p13) }
 0x137   : > { %v651_v0 = vld [vmem:[%s2091_s21 + $0x40] sm:$0xff] (!%p1532_p13) }
 0x138   : > { %v1650_v5 = vpop.f32.mrb[4].mxu0  ;;  %v1658_v6 = vpop.f32.mrb[4].mxu1  ;;  %640 = sbr.rel (%p1532_p13) target bundleno = 806 (0x326), region = 98 }
 0x139   : > { %v610_v9 = vadd.f32 %v1650_v5, %v497_v1  ;;  %v618_v10 = vadd.f32 %v1658_v6, %v505_v2  ;;  %v557_v11 = vpop.f32.mrb[5].mxu0  ;;  %v589_v12 = vpop.f32.mrb[5].mxu1  ;;  %v900_v2 = vld [vmem:[%s1993_s28 + $0x28] sm:$0xff] (!%p1532_p13) }
 0x13a   : > { %v608_v15 = vadd.f32 %v557_v11, %v495_v3  ;;  %v616_v16 = vadd.f32 %v589_v12, %v503_v4  ;;  %v1651_v17 = vpop.f32.mrb[6].mxu0  ;;  %v1659_v18 = vpop.f32.mrb[6].mxu1  ;;  %v661_v38 = vld [vmem:[#allocation2 + $0x10] sm:$0xff] (!%p1532_p13)  ;;  %935 = vperm.xlu0 (!%p1532_p13), %1814, %v912_v58   ;;  %v915_v4 = vadd.f32 (!%p1532_p13), 1.0, %v899_v63  ;;  %v652_v6 = vld [vmem:[%s2091_s21 + $0x48] sm:$0xff] (!%p1532_p13)  ;;  %945 = vperm.xlu1 (!%p1532_p13), %1815, %v914_v62  }
 0x13b   : > { %627 = vst.msk [vmem:[#allocation2 + $0x30] sm:$0xff] %vm620_vm1, %v610_v9  ;;  %635 = vst.msk [vmem:[#allocation2 + $0x70] sm:$0xff] %vm620_vm1, %v618_v10  ;;  %v611_v19 = vadd.f32 %v1651_v17, %v498_v7  ;;  %v619_v20 = vadd.f32 %v1659_v18, %v506_v8  ;;  %v560_v21 = vpop.f32.mrb[7].mxu0  ;;  %v592_v22 = vpop.f32.mrb[7].mxu1  ;;  %v659_v30 = vld [vmem:[#allocation2] sm:$0xff] (!%p1532_p13)  ;;  %v677_v40 = vadd.f32 (!%p1532_p13), %v661_v38, %v645_v37  ;;  %v916_v8 = vadd.f32 (!%p1532_p13), 1.0, %v900_v2 }
 0x13c   : > { %625 = vst.msk [vmem:[#allocation2 + $0x20] sm:$0xff] %vm620_vm1, %v608_v15  ;;  %633 = vst.msk [vmem:[#allocation2 + $0x60] sm:$0xff] %vm620_vm1, %v616_v16  ;;  %v609_v23 = vadd.f32 %v560_v21, %v496_v13  ;;  %v617_v24 = vadd.f32 %v592_v22, %v504_v14  ;;  %v675_v34 = vadd.f32 (!%p1532_p13), %v659_v30, %v643_v33  ;;  %v662_v42 = vld [vmem:[#allocation2 + $0x18] sm:$0xff] (!%p1532_p13)  ;;  %v667_v1 = vld [vmem:[#allocation2 + $0x40] sm:$0xff] (!%p1532_p13)  ;;  %v922_v38 = vadd.f32 (!%p1532_p13), 1.0, %v906_v32 }
 0x13d   : > { %628 = vst.msk [vmem:[#allocation2 + $0x38] sm:$0xff] %vm620_vm1, %v611_v19  ;;  %636 = vst.msk [vmem:[#allocation2 + $0x78] sm:$0xff] %vm620_vm1, %v619_v20  ;;  %v660_v36 = vld [vmem:[#allocation2 + $0x8] sm:$0xff] (!%p1532_p13)  ;;  %v678_v45 = vadd.f32 (!%p1532_p13), %v662_v42, %v646_v41  ;;  %v683_v5 = vadd.f32 (!%p1532_p13), %v667_v1, %v651_v0  ;;  %v669_v11 = vld [vmem:[#allocation2 + $0x50] sm:$0xff] (!%p1532_p13) }
 0x13e   : > { %626 = vst.msk [vmem:[#allocation2 + $0x28] sm:$0xff] %vm620_vm1, %v609_v23  ;;  %634 = vst.msk [vmem:[#allocation2 + $0x68] sm:$0xff] %vm620_vm1, %v617_v24  ;;  %1668 = vmatprep.mubr.msk.f32.mxu0 (!%p1532_p13), %vm620_vm1, %v675_v34  ;;  %v676_v39 = vadd.f32 (!%p1532_p13), %v660_v36, %v644_v35  ;;  %v668_v7 = vld [vmem:[#allocation2 + $0x48] sm:$0xff] (!%p1532_p13)  ;;  %v902_v12 = vld [vmem:[%s1993_s28 + $0x38] sm:$0xff] (!%p1532_p13)  ;;  %950 = vperm.xlu0 (!%p1532_p13), %1814, %v915_v4   ;;  %v921_v34 = vadd.f32 (!%p1532_p13), 1.0, %v905_v29 }
 0x13f   : > { %v901_v9 = vld [vmem:[%s1993_s28 + $0x30] sm:$0xff]  ;;  %v684_v13 = vadd.f32 %v668_v7, %v652_v6  ;;  %v654_v16 = vld [vmem:[%s2091_s21 + $0x58] sm:$0xff]  ;;  %v670_v17 = vld [vmem:[#allocation2 + $0x58] sm:$0xff]  ;;  %955 = vperm.xlu1 %1815, %v916_v8   ;;  %v918_v18 = vadd.f32 1.0, %v902_v12 }
 0x140   : > { %1669 = vmatmul.mubr.msk.f32.vlgmr.msra.gmra.mrb[0].mxu0 %vm620_vm1, %v676_v39  ;;  %v653_v10 = vld [vmem:[%s2091_s21 + $0x50] sm:$0xff]  ;;  %v917_v14 = vadd.f32 1.0, %v901_v9  ;;  %v903_v19 = vld [vmem:[%s1993_s28 + $0x40] sm:$0xff]  ;;  %v904_v22 = vld [vmem:[%s1993_s28 + $0x48] sm:$0xff]  ;;  %v686_v23 = vadd.f32 %v670_v17, %v654_v16 }
 0x141   : > { %1671 = vmatprep.mubr.msk.f32.mxu0 %vm620_vm1, %v677_v40  ;;  %v685_v15 = vadd.f32 %v669_v11, %v653_v10  ;;  %v655_v20 = vld [vmem:[%s2091_s21 + $0x60] sm:$0xff]  ;;  %v919_v24 = vadd.f32 1.0, %v903_v19  ;;  %v920_v28 = vadd.f32 1.0, %v904_v22  ;;  %v657_v30 = vld [vmem:[%s2091_s21 + $0x70] sm:$0xff]  ;;  %v658_v36 = vld [vmem:[%s2091_s21 + $0x78] sm:$0xff] }
 0x142   : > { %v665_v53 = vld [vmem:[#allocation2 + $0x30] sm:$0xff]  ;;  %960 = vperm.xlu0 %1814, %v917_v14   ;;  %v907_v39 = vld [vmem:[%s1993_s28 + $0x60] sm:$0xff]  ;;  %v908_v40 = vld [vmem:[%s1993_s28 + $0x68] sm:$0xff] }
 0x143   : > { %v663_v44 = vld [vmem:[#allocation2 + $0x20] sm:$0xff]  ;;  %v681_v59 = vadd.f32 %v665_v53, %v649_v52  ;;  %965 = vperm.xlu1 %1815, %v918_v18   ;;  %v673_v31 = vld [vmem:[#allocation2 + $0x70] sm:$0xff]  ;;  %v923_v42 = vadd.f32 1.0, %v907_v39 }
 0x144   : > { %v679_v48 = vadd.f32 %v663_v44, %v647_v43  ;;  %1672 = vmatmul.mubr.msk.f32.gmra.mrb[2].mxu0 %vm620_vm1, %v678_v45  ;;  %v666_v61 = vld [vmem:[#allocation2 + $0x38] sm:$0xff]  ;;  %v671_v21 = vld [vmem:[#allocation2 + $0x60] sm:$0xff]  ;;  %v689_v35 = vadd.f32 %v673_v31, %v657_v30  ;;  %v924_v43 = vadd.f32 1.0, %v908_v40  ;;  %v909_v44 = vld [vmem:[%s1993_s28 + $0x70] sm:$0xff] }
 0x145   : > { %v664_v47 = vld [vmem:[#allocation2 + $0x28] sm:$0xff]  ;;  %v682_v3 = vadd.f32 %v666_v61, %v650_v60  ;;  %v687_v25 = vadd.f32 %v671_v21, %v655_v20  ;;  %v674_v37 = vld [vmem:[#allocation2 + $0x78] sm:$0xff]  ;;  %v910_v45 = vld [vmem:[%s1993_s28 + $0x78] sm:$0xff] }
 0x146   : > { %v680_v57 = vadd.f32 %v664_v47, %v648_v46  ;;  %1674 = vmatprep.mubr.msk.f32.mxu0 %vm620_vm1, %v679_v48  ;;  %v672_v27 = vld [vmem:[#allocation2 + $0x68] sm:$0xff]  ;;  %970 = vperm.xlu0 %1814, %v919_v24   ;;  %v690_v41 = vadd.f32 %v674_v37, %v658_v36  ;;  %v925_v46 = vadd.f32 1.0, %v909_v44  ;;  %v926_v47 = vadd.f32 1.0, %v910_v45  ;;  %v1062_v48 = vld [vmem:[%s2324_s6] sm:$0xff]  ;;  %v1065_v52 = vld [vmem:[%s2324_s6 + $0x18] sm:$0xff] }
 0x147   : > { %v688_v33 = vadd.f32 %v672_v27, %v656_v26  ;;  %975 = vperm.xlu1 %1815, %v920_v28   ;;  %v1732_v50 = vpack.c.bf16 %v1063_v49, %v1062_v48  ;;  %v1736_v53 = vpack.c.bf16 %v1065_v52, %v1064_v51  ;;  %v2156_v60 = vld [vmem:[%s2323_s5] ss:$0 sm:$0xff] }
 0x148   : > { %1675 = vmatmul.mubr.msk.f32.gmra.mrb[4].mxu0 %vm620_vm1, %v680_v57  ;;  %v2161_v61 = vld [vmem:[%s2322_s4] ss:$0 sm:$0xff] }
 0x149   : > { %1677 = vmatprep.mubr.msk.f32.mxu0 %vm620_vm1, %v681_v59  ;;  %1733 = vmatprep.subr.bf16.mxu1 %v1732_v50 }
 0x14a   : > { %980 = vperm.xlu0 %1814, %v921_v34   ;;  %1735 = vmatpush3.bf16.msra.mxu1 %v1732_v50 }
 0x14b   : > { %985 = vperm.xlu1 %1815, %v922_v38   ;;  %1737 = vmatprep.subr.bf16.mxu1 %v1736_v53 }
 0x14c   : > { %1678 = vmatmul.mubr.msk.f32.gmra.mrb[6].mxu0 %vm620_vm1, %v682_v3 }
 0x14d   : > { %1680 = vmatprep.mubr.msk.f32.mxu0 %vm620_vm1, %v683_v5 }
 0x14e   : > { %990 = vperm.xlu0 %1814, %v923_v42   ;;  %1739 = vmatpush3.bf16.msra.mxu1 %v1736_v53 }
 0x14f   : > { %995 = vperm.xlu1 %1815, %v924_v43  }
 0x150   : > { %1681 = vmatmul.mubr.msk.f32.gmra.mrb[8].mxu0 %vm620_vm1, %v684_v13 }
 0x151   : > { %1683 = vmatprep.mubr.msk.f32.mxu0 %vm620_vm1, %v685_v15 }
 0x152   : > { %1000 = vperm.xlu0 %1814, %v925_v46  }
 0x153   : > { %1005 = vperm.xlu1 %1815, %v926_v47  }
 0x154   : > { %1684 = vmatmul.mubr.msk.f32.gmra.mrb[10].mxu0 %vm620_vm1, %v686_v23 }
 0x155   : > { %1686 = vmatprep.mubr.msk.f32.mxu0 %vm620_vm1, %v687_v25 }
 0x158   : > { %1687 = vmatmul.mubr.msk.f32.gmra.mrb[12].mxu0 %vm620_vm1, %v688_v33 }
 0x159   : > { %1689 = vmatprep.mubr.msk.f32.mxu0 %vm620_vm1, %v689_v35 }
 0x15c   : > { %1690 = vmatmul.mubr.msk.f32.gmra.mrb[14].mxu0 %vm620_vm1, %v690_v41 }
 0x1b5   : > { %v941_v54 = vpop.permute.xlu1 %940  ;;  %v931_v55 = vpop.permute.xlu0 %930 }
 0x1b6   : > { %v1014_v2 = vmul.f32 %v2156_v60, %v931_v55  ;;  %v1016_v12 = vmul.f32 %v2156_v60, %v941_v54 }
 0x1b9   : > { %v946_v56 = vpop.permute.xlu1 %945  ;;  %v936_v57 = vpop.permute.xlu0 %935 }
 0x1ba   : > { %v1015_v63 = vmul.f32 %v2156_v60, %v936_v57  ;;  %v1017_v9 = vmul.f32 %v2156_v60, %v946_v56 }
 0x1bd   : > { %v951_v59 = vpop.permute.xlu0 %950 }
 0x1be   : > { %v956_v58 = vpop.permute.xlu1 %955  ;;  %v1018_v24 = vmul.f32 %v2156_v60, %v951_v59 }
 0x1bf   : > { %v1019_v20 = vmul.f32 %v2156_v60, %v956_v58 }
 0x1c1   : > { %v961_v5 = vpop.permute.xlu0 %960 }
 0x1c2   : > { %v966_v3 = vpop.permute.xlu1 %965  ;;  %v1020_v34 = vmul.f32 %v2156_v60, %v961_v5 }
 0x1c3   : > { %v1021_v31 = vmul.f32 %v2156_v60, %v966_v3 }
 0x1c5   : > { %v971_v21 = vpop.permute.xlu0 %970 }
 0x1c6   : > { %v976_v17 = vpop.permute.xlu1 %975  ;;  %v1022_v46 = vmul.f32 %v2156_v60, %v971_v21 }
 0x1c7   : > { %v1023_v43 = vmul.f32 %v2156_v60, %v976_v17 }
 0x1c9   : > { %v981_v38 = vpop.permute.xlu0 %980 }
 0x1ca   : > { %v986_v35 = vpop.permute.xlu1 %985  ;;  %v1024_v58 = vmul.f32 %v2156_v60, %v981_v38 }
 0x1cb   : > { %v1025_v54 = vmul.f32 %v2156_v60, %v986_v35 }
 0x1cd   : > { %v991_v55 = vpop.permute.xlu0 %990 }
 0x1ce   : > { %v996_v51 = vpop.permute.xlu1 %995 }
 0x1cf   : > { %v1027_v3 = vmul.f32 %v2156_v60, %v996_v51 }
 0x213   : > { %v1670_v62 = vpop.f32.mrb[0].mxu0 }
 0x214   : > { %v822_v0 = vadd.f32 %v1670_v62, %v2161_v61  ;;  %v816_v1 = vpop.f32.mrb[1].mxu0 }
 0x215   : > { %v817_v4 = vadd.f32 %v2161_v61, %v816_v1 }
 0x216   : > { %v1031_v6 = vadd.f32 %v1015_v63, %v822_v0 }
 0x217   : > { %v1673_v7 = vpop.f32.mrb[2].mxu0  ;;  %v1030_v8 = vadd.f32 %v1014_v2, %v817_v4 }
 0x218   : > { %v832_v10 = vadd.f32 %v1673_v7, %v2161_v61  ;;  %v826_v11 = vpop.f32.mrb[3].mxu0  ;;  %v1047_v15 = vmax.f32 %v1031_v6, 0.0  ;;  %v1026_v6 = vmul.f32 %v2156_v60, %v991_v55  ;;  %v1006_v7 = vpop.permute.xlu1 %1005 }
 0x219   : > { %v827_v13 = vadd.f32 %v2161_v61, %v826_v11  ;;  %v1046_v14 = vmax.f32 %v1030_v8, 0.0 }
 0x21a   : > { %v1033_v16 = vadd.f32 %v1017_v9, %v832_v10  ;;  %v1001_v10 = vpop.permute.xlu0 %1000 }
 0x21b   : > { %v1032_v18 = vadd.f32 %v1016_v12, %v827_v13  ;;  %v1676_v19 = vpop.f32.mrb[4].mxu0  ;;  %1700 = vmatprep.mubr.msk.f32.mxu1 %vm620_vm1, %v1046_v14 }
 0x21c   : > { %v842_v22 = vadd.f32 %v1676_v19, %v2161_v61  ;;  %v836_v23 = vpop.f32.mrb[5].mxu0  ;;  %1701 = vmatmul.mubr.msk.f32.vlgmr.msra.gmra.mrb[0].mxu1 %vm620_vm1, %v1047_v15  ;;  %v1049_v27 = vmax.f32 %v1033_v16, 0.0  ;;  %v1029_v15 = vmul.f32 %v2156_v60, %v1006_v7 }
 0x21d   : > { %v1048_v25 = vmax.f32 %v1032_v18, 0.0  ;;  %v837_v26 = vadd.f32 %v2161_v61, %v836_v23  ;;  %v1028_v18 = vmul.f32 %v2156_v60, %v1001_v10  ;;  %v2214_v60 = vld [vmem:[%s2325_s7] ss:$0 sm:$0xff] }
 0x21e   : > { %v1035_v28 = vadd.f32 %v1019_v20, %v842_v22 }
 0x21f   : > { %v1034_v29 = vadd.f32 %v1018_v24, %v837_v26  ;;  %v1679_v30 = vpop.f32.mrb[6].mxu0  ;;  %1703 = vmatprep.mubr.msk.f32.mxu1 %vm620_vm1, %v1048_v25 }
 0x220   : > { %v852_v32 = vadd.f32 %v1679_v30, %v2161_v61  ;;  %v846_v33 = vpop.f32.mrb[7].mxu0  ;;  %1704 = vmatmul.mubr.msk.f32.gmra.mrb[2].mxu1 %vm620_vm1, %v1049_v27  ;;  %v1051_v39 = vmax.f32 %v1035_v28, 0.0 }
 0x221   : > { %v1050_v36 = vmax.f32 %v1034_v29, 0.0  ;;  %v847_v37 = vadd.f32 %v2161_v61, %v846_v33 }
 0x222   : > { %v1037_v40 = vadd.f32 %v1021_v31, %v852_v32 }
 0x223   : > { %v1036_v41 = vadd.f32 %v1020_v34, %v847_v37  ;;  %v1682_v42 = vpop.f32.mrb[8].mxu0  ;;  %1706 = vmatprep.mubr.msk.f32.mxu1 %vm620_vm1, %v1050_v36 }
 0x224   : > { %v862_v44 = vadd.f32 %v1682_v42, %v2161_v61  ;;  %v856_v45 = vpop.f32.mrb[9].mxu0  ;;  %1707 = vmatmul.mubr.msk.f32.gmra.mrb[4].mxu1 %vm620_vm1, %v1051_v39  ;;  %v1053_v49 = vmax.f32 %v1037_v40, 0.0 }
 0x225   : > { %v1052_v47 = vmax.f32 %v1036_v41, 0.0  ;;  %v857_v48 = vadd.f32 %v2161_v61, %v856_v45 }
 0x226   : > { %v1039_v50 = vadd.f32 %v1023_v43, %v862_v44 }
 0x227   : > { %v1038_v52 = vadd.f32 %v1022_v46, %v857_v48  ;;  %v1685_v53 = vpop.f32.mrb[10].mxu0  ;;  %1709 = vmatprep.mubr.msk.f32.mxu1 %vm620_vm1, %v1052_v47 }
 0x228   : > { %v872_v56 = vadd.f32 %v1685_v53, %v2161_v61  ;;  %v866_v57 = vpop.f32.mrb[11].mxu0  ;;  %1710 = vmatmul.mubr.msk.f32.gmra.mrb[6].mxu1 %vm620_vm1, %v1053_v49  ;;  %v1055_v63 = vmax.f32 %v1039_v50, 0.0 }
 0x229   : > { %v1054_v59 = vmax.f32 %v1038_v52, 0.0  ;;  %v867_v62 = vadd.f32 %v2161_v61, %v866_v57 }
 0x22a   : > { %v1041_v0 = vadd.f32 %v1025_v54, %v872_v56 }
 0x22b   : > { %v1040_v1 = vadd.f32 %v1024_v58, %v867_v62  ;;  %v1688_v2 = vpop.f32.mrb[12].mxu0  ;;  %1712 = vmatprep.mubr.msk.f32.mxu1 %vm620_vm1, %v1054_v59 }
 0x22c   : > { %v882_v4 = vadd.f32 %v1688_v2, %v2161_v61  ;;  %v876_v5 = vpop.f32.mrb[13].mxu0  ;;  %1713 = vmatmul.mubr.msk.f32.gmra.mrb[8].mxu1 %vm620_vm1, %v1055_v63  ;;  %v1057_v11 = vmax.f32 %v1041_v0, 0.0 }
 0x22d   : > { %v1056_v8 = vmax.f32 %v1040_v1, 0.0  ;;  %v877_v9 = vadd.f32 %v2161_v61, %v876_v5 }
 0x22e   : > { %v1043_v12 = vadd.f32 %v1027_v3, %v882_v4 }
 0x22f   : > { %v1042_v13 = vadd.f32 %v1026_v6, %v877_v9  ;;  %v1691_v14 = vpop.f32.mrb[14].mxu0  ;;  %1715 = vmatprep.mubr.msk.f32.mxu1 %vm620_vm1, %v1056_v8 }
 0x230   : > { %v892_v16 = vadd.f32 %v1691_v14, %v2161_v61  ;;  %v886_v17 = vpop.f32.mrb[15].mxu0  ;;  %1716 = vmatmul.mubr.msk.f32.gmra.mrb[10].mxu1 %vm620_vm1, %v1057_v11  ;;  %v1059_v21 = vmax.f32 %v1043_v12, 0.0 }
 0x231   : > { %v1058_v19 = vmax.f32 %v1042_v13, 0.0  ;;  %v887_v20 = vadd.f32 %v2161_v61, %v886_v17 }
 0x232   : > { %v1045_v22 = vadd.f32 %v1029_v15, %v892_v16 }
 0x233   : > { %v1044_v23 = vadd.f32 %v1028_v18, %v887_v20  ;;  %1718 = vmatprep.mubr.msk.f32.mxu1 %vm620_vm1, %v1058_v19 }
 0x234   : > { %1719 = vmatmul.mubr.msk.f32.gmra.mrb[12].mxu1 %vm620_vm1, %v1059_v21  ;;  %v1061_v25 = vmax.f32 %v1045_v22, 0.0 }
 0x235   : > { %v1060_v24 = vmax.f32 %v1044_v23, 0.0 }
 0x237   : > { %1721 = vmatprep.mubr.msk.f32.mxu1 %vm620_vm1, %v1060_v24 }
 0x238   : > { %1722 = vmatmul.mubr.msk.f32.gmra.mrb[14].mxu1 %vm620_vm1, %v1061_v25 }
 0x2ef   : > { %v1702_v61 = vpop.f32.mrb[0].mxu1 }
 0x2f0   : > { %v1193_v26 = vadd.f32 %v1702_v61, %v2214_v60  ;;  %v1187_v27 = vpop.f32.mrb[1].mxu1 }
 0x2f1   : > { %v1188_v28 = vadd.f32 %v2214_v60, %v1187_v27 }
 0x2f2   : > { %v1267_v29 = vmax.f32 %v1193_v26, 0.0 }
 0x2f3   : > { %v1266_v30 = vmax.f32 %v1188_v28, 0.0  ;;  %v1705_v31 = vpop.f32.mrb[2].mxu1 }
 0x2f4   : > { %1283 = vst.msk [vmem:[%s1998_s19 + $0x8] sm:$0xff] %vm620_vm1, %v1267_v29  ;;  %v1299_v32 = vsel %vm620_vm1, %v1267_v29, 0.0  ;;  %v1336_v33 = vmul.f32 %v1267_v29, %v1267_v29  ;;  %v1203_v34 = vadd.f32 %v1705_v31, %v2214_v60  ;;  %v1197_v35 = vpop.f32.mrb[3].mxu1 }
 0x2f5   : > { %1282 = vst.msk [vmem:[%s1998_s19] sm:$0xff] %vm620_vm1, %v1266_v30  ;;  %v1298_v36 = vsel %vm620_vm1, %v1266_v30, 0.0  ;;  %v1335_v37 = vmul.f32 %v1266_v30, %v1266_v30  ;;  %v1198_v38 = vadd.f32 %v2214_v60, %v1197_v35 }
 0x2f6   : > { %v1352_v39 = vsel %vm620_vm1, %v1336_v33, 0.0  ;;  %v1300_v40 = vadd.f32 %v1299_v32, %v1298_v36  ;;  %v1269_v41 = vmax.f32 %v1203_v34, 0.0 }
 0x2f7   : > { %v1351_v42 = vsel %vm620_vm1, %v1335_v37, 0.0  ;;  %v1268_v43 = vmax.f32 %v1198_v38, 0.0  ;;  %v1708_v44 = vpop.f32.mrb[4].mxu1 }
 0x2f8   : > { %v1353_v45 = vadd.f32 %v1352_v39, %v1351_v42  ;;  %1285 = vst.msk [vmem:[%s1998_s19 + $0x18] sm:$0xff] %vm620_vm1, %v1269_v41  ;;  %v1338_v46 = vmul.f32 %v1269_v41, %v1269_v41  ;;  %v1213_v47 = vadd.f32 %v1708_v44, %v2214_v60  ;;  %v1207_v48 = vpop.f32.mrb[5].mxu1  ;;  %v1303_v54 = vsel %vm620_vm1, %v1269_v41, 0.0 }
 0x2f9   : > { %1284 = vst.msk [vmem:[%s1998_s19 + $0x10] sm:$0xff] %vm620_vm1, %v1268_v43  ;;  %v1301_v49 = vsel %vm620_vm1, %v1268_v43, 0.0  ;;  %v1337_v50 = vmul.f32 %v1268_v43, %v1268_v43  ;;  %v1208_v51 = vadd.f32 %v2214_v60, %v1207_v48 }
 0x2fa   : > { %v1302_v52 = vadd.f32 %v1301_v49, %v1300_v40  ;;  %v1271_v53 = vmax.f32 %v1213_v47, 0.0  ;;  %v1356_v58 = vsel %vm620_vm1, %v1338_v46, 0.0 }
 0x2fb   : > { %v1354_v55 = vsel %vm620_vm1, %v1337_v50, 0.0  ;;  %v1270_v56 = vmax.f32 %v1208_v51, 0.0  ;;  %v1711_v57 = vpop.f32.mrb[6].mxu1 }
 0x2fc   : > { %v1355_v59 = vadd.f32 %v1354_v55, %v1353_v45  ;;  %1287 = vst.msk [vmem:[%s1998_s19 + $0x28] sm:$0xff] %vm620_vm1, %v1271_v53  ;;  %v1340_v62 = vmul.f32 %v1271_v53, %v1271_v53  ;;  %v1304_v63 = vadd.f32 %v1303_v54, %v1302_v52  ;;  %v1217_v0 = vpop.f32.mrb[7].mxu1  ;;  %v1223_v3 = vadd.f32 %v1711_v57, %v2214_v60 }
 0x2fd   : > { %1286 = vst.msk [vmem:[%s1998_s19 + $0x20] sm:$0xff] %vm620_vm1, %v1270_v56  ;;  %v1305_v1 = vsel %vm620_vm1, %v1270_v56, 0.0  ;;  %v1339_v2 = vmul.f32 %v1270_v56, %v1270_v56  ;;  %v1218_v4 = vadd.f32 %v2214_v60, %v1217_v0  ;;  %v1307_v7 = vsel %vm620_vm1, %v1271_v53, 0.0 }
 0x2fe   : > { %v1306_v5 = vadd.f32 %v1305_v1, %v1304_v63  ;;  %v1357_v6 = vadd.f32 %v1356_v58, %v1355_v59  ;;  %v1273_v9 = vmax.f32 %v1223_v3, 0.0  ;;  %v1360_v16 = vsel %vm620_vm1, %v1340_v62, 0.0 }
 0x2ff   : > { %v1358_v8 = vsel %vm620_vm1, %v1339_v2, 0.0  ;;  %v1272_v10 = vmax.f32 %v1218_v4, 0.0  ;;  %v1714_v11 = vpop.f32.mrb[8].mxu1 }
 0x300   : > { %v1359_v12 = vadd.f32 %v1358_v8, %v1357_v6  ;;  %v1308_v13 = vadd.f32 %v1307_v7, %v1306_v5  ;;  %v1233_v14 = vadd.f32 %v1714_v11, %v2214_v60  ;;  %v1227_v15 = vpop.f32.mrb[9].mxu1  ;;  %1289 = vst.msk [vmem:[%s1998_s19 + $0x38] sm:$0xff] %vm620_vm1, %v1273_v9  ;;  %v1342_v17 = vmul.f32 %v1273_v9, %v1273_v9 }
 0x301   : > { %1288 = vst.msk [vmem:[%s1998_s19 + $0x30] sm:$0xff] %vm620_vm1, %v1272_v10  ;;  %v1309_v18 = vsel %vm620_vm1, %v1272_v10, 0.0  ;;  %v1341_v19 = vmul.f32 %v1272_v10, %v1272_v10  ;;  %v1228_v23 = vadd.f32 %v2214_v60, %v1227_v15  ;;  %v1311_v61 = vsel %vm620_vm1, %v1273_v9, 0.0 }
 0x302   : > { %v1310_v20 = vadd.f32 %v1309_v18, %v1308_v13  ;;  %v1361_v21 = vadd.f32 %v1360_v16, %v1359_v12  ;;  %v1275_v22 = vmax.f32 %v1233_v14, 0.0  ;;  %v1364_v26 = vsel %vm620_vm1, %v1342_v17, 0.0 }
 0x303   : > { %v1362_v24 = vsel %vm620_vm1, %v1341_v19, 0.0  ;;  %v1717_v25 = vpop.f32.mrb[10].mxu1  ;;  %v1274_v28 = vmax.f32 %v1228_v23, 0.0 }
 0x304   : > { %v1363_v27 = vadd.f32 %v1362_v24, %v1361_v21  ;;  %1291 = vst.msk [vmem:[%s1998_s19 + $0x48] sm:$0xff] %vm620_vm1, %v1275_v22  ;;  %v1237_v29 = vpop.f32.mrb[11].mxu1  ;;  %v1344_v30 = vmul.f32 %v1275_v22, %v1275_v22  ;;  %v1312_v31 = vadd.f32 %v1311_v61, %v1310_v20  ;;  %v1243_v32 = vadd.f32 %v1717_v25, %v2214_v60 }
 0x305   : > { %v1238_v33 = vadd.f32 %v2214_v60, %v1237_v29  ;;  %1290 = vst.msk [vmem:[%s1998_s19 + $0x40] sm:$0xff] %vm620_vm1, %v1274_v28  ;;  %v1313_v34 = vsel %vm620_vm1, %v1274_v28, 0.0  ;;  %v1343_v35 = vmul.f32 %v1274_v28, %v1274_v28  ;;  %v1315_v41 = vsel %vm620_vm1, %v1275_v22, 0.0 }
 0x306   : > { %v1365_v36 = vadd.f32 %v1364_v26, %v1363_v27  ;;  %v1314_v37 = vadd.f32 %v1313_v34, %v1312_v31  ;;  %v1277_v38 = vmax.f32 %v1243_v32, 0.0  ;;  %v1368_v45 = vsel %vm620_vm1, %v1344_v30, 0.0 }
 0x307   : > { %v1276_v39 = vmax.f32 %v1238_v33, 0.0  ;;  %v1720_v40 = vpop.f32.mrb[12].mxu1  ;;  %v1366_v42 = vsel %vm620_vm1, %v1343_v35, 0.0 }
 0x308   : > { %v1253_v43 = vadd.f32 %v1720_v40, %v2214_v60  ;;  %v1247_v44 = vpop.f32.mrb[13].mxu1  ;;  %v1367_v46 = vadd.f32 %v1366_v42, %v1365_v36  ;;  %1293 = vst.msk [vmem:[%s1998_s19 + $0x58] sm:$0xff] %vm620_vm1, %v1277_v38  ;;  %v1346_v47 = vmul.f32 %v1277_v38, %v1277_v38  ;;  %v1316_v48 = vadd.f32 %v1315_v41, %v1314_v37 }
 0x309   : > { %1292 = vst.msk [vmem:[%s1998_s19 + $0x50] sm:$0xff] %vm620_vm1, %v1276_v39  ;;  %v1317_v49 = vsel %vm620_vm1, %v1276_v39, 0.0  ;;  %v1345_v50 = vmul.f32 %v1276_v39, %v1276_v39  ;;  %v1248_v52 = vadd.f32 %v2214_v60, %v1247_v44  ;;  %v1319_v56 = vsel %vm620_vm1, %v1277_v38, 0.0 }
 0x30a   : > { %v1279_v51 = vmax.f32 %v1253_v43, 0.0  ;;  %v1318_v53 = vadd.f32 %v1317_v49, %v1316_v48  ;;  %v1369_v54 = vadd.f32 %v1368_v45, %v1367_v46  ;;  %v1372_v2 = vsel %vm620_vm1, %v1346_v47, 0.0 }
 0x30b   : > { %v1723_v55 = vpop.f32.mrb[14].mxu1  ;;  %v1370_v57 = vsel %vm620_vm1, %v1345_v50, 0.0  ;;  %v1278_v58 = vmax.f32 %v1248_v52, 0.0 }
 0x30c   : > { %1295 = vst.msk [vmem:[%s1998_s19 + $0x68] sm:$0xff] %vm620_vm1, %v1279_v51  ;;  %v1257_v59 = vpop.f32.mrb[15].mxu1  ;;  %v1371_v62 = vadd.f32 %v1370_v57, %v1369_v54  ;;  %v1320_v63 = vadd.f32 %v1319_v56, %v1318_v53  ;;  %v1263_v0 = vadd.f32 %v1723_v55, %v2214_v60  ;;  %v1348_v3 = vmul.f32 %v1279_v51, %v1279_v51 }
 0x30d   : > { %v1258_v1 = vadd.f32 %v2214_v60, %v1257_v59  ;;  %1294 = vst.msk [vmem:[%s1998_s19 + $0x60] sm:$0xff] %vm620_vm1, %v1278_v58  ;;  %v1321_v4 = vsel %vm620_vm1, %v1278_v58, 0.0  ;;  %v1347_v5 = vmul.f32 %v1278_v58, %v1278_v58  ;;  %v1323_v10 = vsel %vm620_vm1, %v1279_v51, 0.0 }
 0x30e   : > { %v1322_v6 = vadd.f32 %v1321_v4, %v1320_v63  ;;  %v1373_v7 = vadd.f32 %v1372_v2, %v1371_v62  ;;  %v1281_v8 = vmax.f32 %v1263_v0, 0.0  ;;  %v1376_v13 = vsel %vm620_vm1, %v1348_v3, 0.0 }
 0x30f   : > { %v1280_v9 = vmax.f32 %v1258_v1, 0.0  ;;  %v1374_v11 = vsel %vm620_vm1, %v1347_v5, 0.0 }
 0x310   : > { %v1375_v12 = vadd.f32 %v1374_v11, %v1373_v7  ;;  %1297 = vst.msk [vmem:[%s1998_s19 + $0x78] sm:$0xff] %vm620_vm1, %v1281_v8  ;;  %v1324_v60 = vadd.f32 %v1323_v10, %v1322_v6  ;;  %v1350_v14 = vmul.f32 %v1281_v8, %v1281_v8  ;;  %v1327_v19 = vsel %vm620_vm1, %v1281_v8, 0.0 }
 0x311   : > { %1296 = vst.msk [vmem:[%s1998_s19 + $0x70] sm:$0xff] %vm620_vm1, %v1280_v9  ;;  %v1325_v15 = vsel %vm620_vm1, %v1280_v9, 0.0  ;;  %v1349_v16 = vmul.f32 %v1280_v9, %v1280_v9 }
 0x312   : > { %v1326_v17 = vadd.f32 %v1325_v15, %v1324_v60  ;;  %v1377_v18 = vadd.f32 %v1376_v13, %v1375_v12  ;;  %v1380_v23 = vsel %vm620_vm1, %v1350_v14, 0.0 }
 0x313   : > { %v1378_v20 = vsel %vm620_vm1, %v1349_v16, 0.0 }
 0x314   : > { %v1328_v21 = vadd.f32 %v1327_v19, %v1326_v17  ;;  %v1379_v22 = vadd.f32 %v1378_v20, %v1377_v18 }
 0x316   : > { %v1329_v24 = vrot.slane %v1328_v21, 4  ;;  %v1381_v25 = vadd.f32 %v1380_v23, %v1379_v22 }
 0x318   : > { %v1330_v61 = vadd.f32 %v1329_v24, %v1328_v21  ;;  %v1382_v26 = vrot.slane %v1381_v25, 4 }
 0x31a   : > { %v1331_v27 = vrot.slane %v1330_v61, 2  ;;  %v1383_v28 = vadd.f32 %v1382_v26, %v1381_v25 }
 0x31c   : > { %v1332_v29 = vadd.f32 %v1331_v27, %v1330_v61  ;;  %v1384_v30 = vrot.slane %v1383_v28, 2 }
 0x31e   : > { %v1333_v31 = vrot.slane %v1332_v29, 1  ;;  %v1385_v32 = vadd.f32 %v1384_v30, %v1383_v28 }
 0x320   : > { %v1386_v33 = vrot.slane %v1385_v32, 1  ;;  %v1334_v34 = vadd.f32 %v1333_v31, %v1332_v29 }
 0x322   : > { %v1387_v35 = vadd.f32 %v1386_v33, %v1385_v32 }
 0x324   : > { %v1389_v36 = vsel %vm1388_vm2, %v1334_v34, %v1387_v35 }
 0x325   : > { %1391 = vst.msk [vmem:[%s2003_s20] sm:$0x3] %vm1390_vm3, %v1389_v36 }
 0x326 PF: > { %s20_s15 = sadd.s32 1, %s1870_s15   ;;  %s2334_s19 = sld [smem:[#allocation4_spill]] }
 0x327   : > { %p17_p0 = scmp.ge.s32.totalorder %s20_s15, 6   ;;  %s2335_s21 = sld [smem:[#allocation5_spill]] }
 0x328   : > { %s2336_s30 = smov %s1850_s10  ;;  %s2337_s10 = smov %s1975_s22 }
 0x329   : > { %s2338_s11 = smov %s1862_s13  ;;  %s2339_s12 = smov %s1866_s14 }
 0x32a   :  { %19 = sbr.rel (!%p17_p0) target bundleno = 6 (0x6), region = 150 }
 0x32c   : > { %s2340_s13 = smov %s2334_s19 }
 0x32d   : > { %s2341_s14 = smov %s2335_s21 }

</bundles_post_ra>
